<compile_context>
chip_gen: v7x
topology: tpu7x:2x2x1
jax: 0.10.0
libtpu: 0.0.40
codegen_flags: <defaults>
</compile_context>

<pallas_src>
import jax
import jax.numpy as jnp
from jax.experimental import pallas as pl
from jax.experimental.pallas import tpu as pltpu

PTS_DIM = 6
FEAT_DIM = 1024
BN_EPS = 1e-5
HEAD_DIMS = (12, 199, 29)        # Tm, shape, exp output widths
HEAD_TOTAL = sum(HEAD_DIMS)      # 240
HEAD_PAD = 256                   # lane-dense padded head output width


# ----------------------------------------------------------------------------
# Fused kernel: per-point MLP (conv1..conv5, BN folded, ReLU for layers 1-4),
# raw layer-5 dot whose bias/ReLU are hoisted past the max, global max-pool
# accumulated as an (8, 1024) per-sublane partial in VMEM scratch, and the
# fused (1024, 256) head matmul at the last point tile.
# grid = (B, N // tile_n); reduction (point) axis last.
# ----------------------------------------------------------------------------
def pointnet_kernel(pts_ref,
                    w1, t1, w2, t2, w3, t3, w4, t4, w5, t5,
                    wh, th,
                    g_ref, head_ref,
                    acc_ref):
    tile_n = pts_ref.shape[1]

    def layer(h, w, t):
        y = jnp.dot(h.astype(jnp.bfloat16), w[...],
                    preferred_element_type=jnp.float32) + t[...]
        return jnp.maximum(y, 0.0)

    h = layer(pts_ref[0], w1, t1)          # (tile_n, 64)
    h = layer(h, w2, t2)                   # (tile_n, 64)
    h = layer(h, w3, t3)                   # (tile_n, 64)
    h = layer(h, w4, t4)                   # (tile_n, 128)

    # Layer 5: raw MXU dot only — the `+ t5` and ReLU are hoisted past the max
    # (max_i(y_i + t) == max_i(y_i) + t and ReLU commutes with max, so this is
    # bit-identical to applying them per point).
    raw5 = jnp.dot(h.astype(jnp.bfloat16), w5[...],
                   preferred_element_type=jnp.float32)       # (tile_n, 1024) f32

    # Per-sublane partial max: sublane-aligned reshape + leading-axis max is
    # pure VPU work (no cross-sublane XLU reduce in the inner loop).
    part = jnp.max(raw5.reshape(tile_n // 8, 8, FEAT_DIM), axis=0)   # (8, 1024)

    n = pl.program_id(1)

    @pl.when(n == 0)
    def _():
        acc_ref[...] = part

    @pl.when(n > 0)
    def _():
        acc_ref[...] = jnp.maximum(acc_ref[...], part)

    @pl.when(n == pl.num_programs(1) - 1)
    def _():
        g_raw = jnp.max(acc_ref[...], axis=0, keepdims=True)   # single 8->1 XLU reduce
        g = jnp.maximum(g_raw + t5[...], 0.0)                   # hoisted bias + ReLU
        g_ref[0] = g                                             # (1, 1024)
        head = jnp.dot(g.astype(jnp.bfloat16), wh[...],
                       preferred_element_type=jnp.float32) + th[...]
        head_ref[0] = head                                       # (1, 256) lane-dense


def _tile_config(N):
    """Per-generation tile / VMEM sizing.

    v5e/v6e (128 MiB VMEM): tile_n up to 2048 with a 64 MiB scoped limit.
    v7x / unknown (64 MiB VMEM per TC): conservative tile_n <= 1024 / 32 MiB.
    """
    tile_cap, vmem_limit = 1024, 32 * 1024 * 1024       # conservative, v7x-safe
    try:
        kind = jax.devices()[0].device_kind.lower()
        if ("v5" in kind) or ("v6" in kind):             # 128 MiB VMEM chips
            tile_cap, vmem_limit = 2048, 64 * 1024 * 1024
    except Exception:
        pass
    tile_n = min(N, tile_cap)
    while tile_n > 8 and (N % tile_n != 0 or tile_n % 8 != 0):
        tile_n -= 8
    return tile_n, vmem_limit


def pointnet_forward(pts, params, tile_n=None):
    """pts: (B, N, 6).  Returns (out_Tm, out_shape, out_exp, global_features)."""
    B, N, D = pts.shape
    assert D == PTS_DIM
    assert N % 8 == 0, "point count must be a multiple of 8 (sublane tiling)"
    if tile_n is None:
        tile_n, vmem_limit = _tile_config(N)
    else:
        vmem_limit = (32 if tile_n <= 1024 else 64) * 1024 * 1024
    assert N % tile_n == 0 and tile_n % 8 == 0

    if pts.dtype != jnp.bfloat16:          # preprocess already emits bf16
        pts = pts.astype(jnp.bfloat16)

    flat, w_specs = [], []
    for (w, t) in params["layers"]:
        flat += [w, t]
        w_specs += [pl.BlockSpec(w.shape, lambda b, n: (0, 0)),
                    pl.BlockSpec(t.shape, lambda b, n: (0, 0))]
    flat += [params["head_w"], params["head_t"]]
    w_specs += [pl.BlockSpec(params["head_w"].shape, lambda b, n: (0, 0)),
                pl.BlockSpec(params["head_t"].shape, lambda b, n: (0, 0))]

    # TODO(synk): for B == 1 on v7x, add a core-parallel split of the point
    # axis producing per-core partial maxes combined in the wrapper; as written
    # the g/head outputs rely on staying resident across the (arbitrary) point
    # axis, so that split must not be done without per-core partial outputs.
    g, head = pl.pallas_call(
        pointnet_kernel,
        out_shape=(jax.ShapeDtypeStruct((B, 1, FEAT_DIM), jnp.float32),
                   jax.ShapeDtypeStruct((B, 1, HEAD_PAD), jnp.float32)),
        grid_spec=pltpu.PrefetchScalarGridSpec(
            num_scalar_prefetch=0,
            grid=(B, N // tile_n),
            in_specs=[pl.BlockSpec((1, tile_n, D), lambda b, n: (b, n, 0))] + w_specs,
            out_specs=[pl.BlockSpec((1, 1, FEAT_DIM), lambda b, n: (b, 0, 0)),
                       pl.BlockSpec((1, 1, HEAD_PAD), lambda b, n: (b, 0, 0))],
            scratch_shapes=[pltpu.VMEM((8, FEAT_DIM), jnp.float32)]),
        compiler_params=pltpu.CompilerParams(
            # batch axis parallel -> both v7x TensorCores used when B >= 2;
            # point (reduction) axis last and arbitrary.
            dimension_semantics=("parallel", "arbitrary"),
            vmem_limit_bytes=vmem_limit),
    )(pts, *flat)

    g = g[:, 0, :]                  # (B, 1024) == global_features.squeeze(2)
    head = head[:, 0, :]            # (B, 256)
    d0, d1, d2 = HEAD_DIMS
    out_tm = head[:, :d0]
    out_shape = head[:, d0:d0 + d1]
    out_exp = head[:, d0 + d1:d0 + d1 + d2]
    return out_tm, out_shape, out_exp, g


# ----------------------------------------------------------------------------
# Parameter init (deterministic, synthetic).  Conv1d(k=1) weight (Cout,Cin,1)
# is stored transposed as (Cin,Cout); inference-mode BN + conv bias are folded
# into per-channel scale (multiplied into the weight, then cast to bf16) and a
# f32 shift.  The three head convs are concatenated into one lane-dense
# (1024, 256) matrix (zero-padded from 240).
# ----------------------------------------------------------------------------
def init_layer(key, cin, cout, with_bn=True):
    kw, kb, kg, kbe, km, kv = jax.random.split(key, 6)
    w = jax.random.normal(kw, (cin, cout), jnp.float32) / jnp.sqrt(cin)
    b = 0.1 * jax.random.normal(kb, (cout,), jnp.float32)
    if with_bn:
        gamma = 1.0 + 0.1 * jax.random.normal(kg, (cout,), jnp.float32)
        beta = 0.1 * jax.random.normal(kbe, (cout,), jnp.float32)
        mean = 0.1 * jax.random.normal(km, (cout,), jnp.float32)
        var = jax.random.uniform(kv, (cout,), jnp.float32, minval=0.5, maxval=1.5)
        scale = gamma / jnp.sqrt(var + BN_EPS)
        shift = (b - mean) * scale + beta
    else:
        scale = jnp.ones((cout,), jnp.float32)
        shift = b
    w_eff = (w * scale[None, :]).astype(jnp.bfloat16)     # BN scale folded in
    return w_eff, shift.reshape(1, cout).astype(jnp.float32)


def init_params(key):
    ks = jax.random.split(key, 8)
    dims = [(PTS_DIM, 64), (64, 64), (64, 64), (64, 128), (128, FEAT_DIM)]
    layers = [init_layer(ks[i], cin, cout, with_bn=True)
              for i, (cin, cout) in enumerate(dims)]
    w_tm, t_tm = init_layer(ks[5], FEAT_DIM, HEAD_DIMS[0], with_bn=False)  # conv6_Tm (no BN)
    w_sh, t_sh = init_layer(ks[6], FEAT_DIM, HEAD_DIMS[1], with_bn=True)   # conv6_shape + bn6_shape
    w_ex, t_ex = init_layer(ks[7], FEAT_DIM, HEAD_DIMS[2], with_bn=True)   # conv6_exp + bn6_exp
    pad = HEAD_PAD - HEAD_TOTAL
    w_head = jnp.pad(jnp.concatenate([w_tm, w_sh, w_ex], axis=1), ((0, 0), (0, pad)))
    t_head = jnp.pad(jnp.concatenate([t_tm, t_sh, t_ex], axis=1), ((0, 0), (0, pad)))
    return {"layers": layers, "head_w": w_head, "head_t": t_head}


# ----------------------------------------------------------------------------
# preprocess_kptmap: plain-JAX glue (data-dependent random gather).  Emits the
# sampled points directly in bf16 so the kernel input needs no extra cast pass.
# ----------------------------------------------------------------------------
def preprocess_kptmap(x, mask_uv, face_mask, num_pts, key):
    # TODO(synk): torch.nonzero + torch.randint replaced by jax.random.choice
    # uniform over nonzero mask positions; RNG stream differs from PyTorch.
    B, C, W, H = x.shape
    kptmap = jnp.transpose(x, (0, 2, 3, 1))  # (B, W, H, C)
    mask = mask_uv * face_mask[None]
    pts_list = []
    for b in range(B):
        kb = jax.random.fold_in(key, b)
        mflat = mask[b].reshape(-1)
        nz = (mflat != 0).astype(jnp.float32)
        cnt = nz.sum()
        p = nz / jnp.maximum(cnt, 1.0)
        idx = jax.random.choice(kb, W * H, shape=(num_pts,), replace=True, p=p)
        xi = idx // H
        yi = idx % H
        vals = kptmap[b, xi, yi]  # (num_pts, C)
        uv = jnp.stack([xi, yi], axis=1).astype(jnp.float32) / 128.0 - 1.0
        pts_b = jnp.concatenate([vals, uv], axis=1)  # (num_pts, 6)
        pts_b = jnp.where(cnt > 0, pts_b, jnp.zeros_like(pts_b))
        pts_list.append(pts_b)
    return jnp.stack(pts_list, axis=0).astype(jnp.bfloat16)  # (B, num_pts, 6) bf16


# ----------------------------------------------------------------------------
# Plain-JAX reference with the same bf16-matmul / f32-accumulate math but the
# ORIGINAL (un-hoisted) layer-5 bias/ReLU-before-max ordering, so it also
# verifies the hoist is exact.
# ----------------------------------------------------------------------------
def reference_forward(pts, params):
    h = pts.astype(jnp.bfloat16)
    h32 = None
    for (w, t) in params["layers"]:
        h32 = jnp.maximum(jnp.dot(h, w, preferred_element_type=jnp.float32) + t, 0.0)
        h = h32.astype(jnp.bfloat16)
    g = jnp.max(h32, axis=1)                                  # (B, 1024) f32
    head = jnp.dot(g.astype(jnp.bfloat16), params["head_w"],
                   preferred_element_type=jnp.float32) + params["head_t"]
    d0, d1, d2 = HEAD_DIMS
    return head[:, :d0], head[:, d0:d0 + d1], head[:, d0 + d1:d0 + d1 + d2], g


if __name__ == "__main__":
    key = jax.random.PRNGKey(0)
    B, C, W, H = 2, 4, 16, 16
    NUM_PTS = 256  # small test size (module default is 2048)
    k_x, k_mask, k_face, k_par, k_samp = jax.random.split(key, 5)

    x = jax.random.normal(k_x, (B, C, W, H), dtype=jnp.float32)
    mask_uv = (jax.random.uniform(k_mask, (B, W, H)) > 0.3).astype(jnp.float32)
    face_mask = (jax.random.uniform(k_face, (W, H)) > 0.2).astype(jnp.float32)

    params = init_params(k_par)
    pts = preprocess_kptmap(x, mask_uv, face_mask, NUM_PTS, k_samp)  # (B, N, 6) bf16

    out_tm, out_shape, out_exp, g = pointnet_forward(pts, params)
    jax.block_until_ready((out_tm, out_shape, out_exp, g))

    ref = reference_forward(pts, params)
    for got, want in zip((out_tm, out_shape, out_exp, g), ref):
        assert got.shape == want.shape
        assert jnp.allclose(got, want, rtol=5e-3, atol=5e-3), \
            float(jnp.max(jnp.abs(got - want)))

    print("KERNEL_OK")
</pallas_src>

<mosaic_0001>
module attributes {stable_mosaic.version = 11 : i64} {
  func.func @pointnet_kernel(%arg0: i32, %arg1: i32, %arg2: memref<1x256x6xbf16, #tpu.memory_space<vmem>>, %arg3: memref<6x64xbf16, #tpu.memory_space<vmem>>, %arg4: memref<1x64xf32, #tpu.memory_space<vmem>>, %arg5: memref<64x64xbf16, #tpu.memory_space<vmem>>, %arg6: memref<1x64xf32, #tpu.memory_space<vmem>>, %arg7: memref<64x64xbf16, #tpu.memory_space<vmem>>, %arg8: memref<1x64xf32, #tpu.memory_space<vmem>>, %arg9: memref<64x128xbf16, #tpu.memory_space<vmem>>, %arg10: memref<1x128xf32, #tpu.memory_space<vmem>>, %arg11: memref<128x1024xbf16, #tpu.memory_space<vmem>>, %arg12: memref<1x1024xf32, #tpu.memory_space<vmem>>, %arg13: memref<1024x256xbf16, #tpu.memory_space<vmem>>, %arg14: memref<1x256xf32, #tpu.memory_space<vmem>>, %arg15: memref<1x1x1024xf32, #tpu.memory_space<vmem>>, %arg16: memref<1x1x256xf32, #tpu.memory_space<vmem>>, %arg17: memref<8x1024xf32, #tpu.memory_space<vmem>>) attributes {dimension_semantics = [#tpu.dimension_semantics<parallel>, #tpu.dimension_semantics<arbitrary>], iteration_bounds = array<i64: 2, 1>, scalar_prefetch = 0 : i64, scratch_operands = 1 : i64, tpu.core_type = #tpu.core_type<tc>, window_params = [{transform_indices = @transform_0, window_bounds = array<i64: 1, 256, 6>}, {pipeline_mode = #tpu.pipeline_mode<synchronous>, transform_indices = @transform_1, window_bounds = array<i64: 6, 64>}, {pipeline_mode = #tpu.pipeline_mode<synchronous>, transform_indices = @transform_2, window_bounds = array<i64: 1, 64>}, {pipeline_mode = #tpu.pipeline_mode<synchronous>, transform_indices = @transform_3, window_bounds = array<i64: 64, 64>}, {pipeline_mode = #tpu.pipeline_mode<synchronous>, transform_indices = @transform_4, window_bounds = array<i64: 1, 64>}, {pipeline_mode = #tpu.pipeline_mode<synchronous>, transform_indices = @transform_5, window_bounds = array<i64: 64, 64>}, {pipeline_mode = #tpu.pipeline_mode<synchronous>, transform_indices = @transform_6, window_bounds = array<i64: 1, 64>}, {pipeline_mode = #tpu.pipeline_mode<synchronous>, transform_indices = @transform_7, window_bounds = array<i64: 64, 128>}, {pipeline_mode = #tpu.pipeline_mode<synchronous>, transform_indices = @transform_8, window_bounds = array<i64: 1, 128>}, {pipeline_mode = #tpu.pipeline_mode<synchronous>, transform_indices = @transform_9, window_bounds = array<i64: 128, 1024>}, {pipeline_mode = #tpu.pipeline_mode<synchronous>, transform_indices = @transform_10, window_bounds = array<i64: 1, 1024>}, {pipeline_mode = #tpu.pipeline_mode<synchronous>, transform_indices = @transform_11, window_bounds = array<i64: 1024, 256>}, {pipeline_mode = #tpu.pipeline_mode<synchronous>, transform_indices = @transform_12, window_bounds = array<i64: 1, 256>}, {transform_indices = @transform_13, window_bounds = array<i64: 1, 1, 1024>}, {transform_indices = @transform_14, window_bounds = array<i64: 1, 1, 256>}]} {
    %c0 = arith.constant 0 : index
    %c0_0 = arith.constant 0 : index
    %c0_1 = arith.constant 0 : index
    %0 = vector.load %arg2[%c0, %c0_0, %c0_1] : memref<1x256x6xbf16, #tpu.memory_space<vmem>>, vector<1x256x6xbf16>
    %1 = vector.shape_cast %0 : vector<1x256x6xbf16> to vector<256x6xbf16>
    %c0_2 = arith.constant 0 : index
    %c0_3 = arith.constant 0 : index
    %2 = vector.load %arg3[%c0_2, %c0_3] : memref<6x64xbf16, #tpu.memory_space<vmem>>, vector<6x64xbf16>
    %cst = arith.constant dense<0.000000e+00> : vector<256x64xf32>
    %3 = tpu.matmul %1, %2, %cst {dimension_numbers = #tpu.dot_dimension_numbers<[1], [0], [0], [1], [0, 0, 1, 1], [], []>} : vector<256x6xbf16>, vector<6x64xbf16>, vector<256x64xf32> -> vector<256x64xf32>
    %c0_4 = arith.constant 0 : index
    %c0_5 = arith.constant 0 : index
    %4 = vector.load %arg4[%c0_4, %c0_5] : memref<1x64xf32, #tpu.memory_space<vmem>>, vector<1x64xf32>
    %5 = vector.broadcast %4 : vector<1x64xf32> to vector<256x64xf32>
    %6 = arith.addf %3, %5 : vector<256x64xf32>
    %cst_6 = arith.constant 0.000000e+00 : f32
    %7 = vector.broadcast %cst_6 : f32 to vector<256x64xf32>
    %8 = arith.maximumf %6, %7 : vector<256x64xf32>
    %9 = arith.truncf %8 : vector<256x64xf32> to vector<256x64xbf16>
    %c0_7 = arith.constant 0 : index
    %c0_8 = arith.constant 0 : index
    %10 = vector.load %arg5[%c0_7, %c0_8] : memref<64x64xbf16, #tpu.memory_space<vmem>>, vector<64x64xbf16>
    %cst_9 = arith.constant dense<0.000000e+00> : vector<256x64xf32>
    %11 = tpu.matmul %9, %10, %cst_9 {dimension_numbers = #tpu.dot_dimension_numbers<[1], [0], [0], [1], [0, 0, 1, 1], [], []>} : vector<256x64xbf16>, vector<64x64xbf16>, vector<256x64xf32> -> vector<256x64xf32>
    %c0_10 = arith.constant 0 : index
    %c0_11 = arith.constant 0 : index
    %12 = vector.load %arg6[%c0_10, %c0_11] : memref<1x64xf32, #tpu.memory_space<vmem>>, vector<1x64xf32>
    %13 = vector.broadcast %12 : vector<1x64xf32> to vector<256x64xf32>
    %14 = arith.addf %11, %13 : vector<256x64xf32>
    %cst_12 = arith.constant 0.000000e+00 : f32
    %15 = vector.broadcast %cst_12 : f32 to vector<256x64xf32>
    %16 = arith.maximumf %14, %15 : vector<256x64xf32>
    %17 = arith.truncf %16 : vector<256x64xf32> to vector<256x64xbf16>
    %c0_13 = arith.constant 0 : index
    %c0_14 = arith.constant 0 : index
    %18 = vector.load %arg7[%c0_13, %c0_14] : memref<64x64xbf16, #tpu.memory_space<vmem>>, vector<64x64xbf16>
    %cst_15 = arith.constant dense<0.000000e+00> : vector<256x64xf32>
    %19 = tpu.matmul %17, %18, %cst_15 {dimension_numbers = #tpu.dot_dimension_numbers<[1], [0], [0], [1], [0, 0, 1, 1], [], []>} : vector<256x64xbf16>, vector<64x64xbf16>, vector<256x64xf32> -> vector<256x64xf32>
    %c0_16 = arith.constant 0 : index
    %c0_17 = arith.constant 0 : index
    %20 = vector.load %arg8[%c0_16, %c0_17] : memref<1x64xf32, #tpu.memory_space<vmem>>, vector<1x64xf32>
    %21 = vector.broadcast %20 : vector<1x64xf32> to vector<256x64xf32>
    %22 = arith.addf %19, %21 : vector<256x64xf32>
    %cst_18 = arith.constant 0.000000e+00 : f32
    %23 = vector.broadcast %cst_18 : f32 to vector<256x64xf32>
    %24 = arith.maximumf %22, %23 : vector<256x64xf32>
    %25 = arith.truncf %24 : vector<256x64xf32> to vector<256x64xbf16>
    %c0_19 = arith.constant 0 : index
    %c0_20 = arith.constant 0 : index
    %26 = vector.load %arg9[%c0_19, %c0_20] : memref<64x128xbf16, #tpu.memory_space<vmem>>, vector<64x128xbf16>
    %cst_21 = arith.constant dense<0.000000e+00> : vector<256x128xf32>
    %27 = tpu.matmul %25, %26, %cst_21 {dimension_numbers = #tpu.dot_dimension_numbers<[1], [0], [0], [1], [0, 0, 1, 1], [], []>} : vector<256x64xbf16>, vector<64x128xbf16>, vector<256x128xf32> -> vector<256x128xf32>
    %c0_22 = arith.constant 0 : index
    %c0_23 = arith.constant 0 : index
    %28 = vector.load %arg10[%c0_22, %c0_23] : memref<1x128xf32, #tpu.memory_space<vmem>>, vector<1x128xf32>
    %29 = vector.broadcast %28 : vector<1x128xf32> to vector<256x128xf32>
    %30 = arith.addf %27, %29 : vector<256x128xf32>
    %cst_24 = arith.constant 0.000000e+00 : f32
    %31 = vector.broadcast %cst_24 : f32 to vector<256x128xf32>
    %32 = arith.maximumf %30, %31 : vector<256x128xf32>
    %33 = arith.truncf %32 : vector<256x128xf32> to vector<256x128xbf16>
    %c0_25 = arith.constant 0 : index
    %c0_26 = arith.constant 0 : index
    %34 = vector.load %arg11[%c0_25, %c0_26] : memref<128x1024xbf16, #tpu.memory_space<vmem>>, vector<128x1024xbf16>
    %cst_27 = arith.constant dense<0.000000e+00> : vector<256x1024xf32>
    %35 = tpu.matmul %33, %34, %cst_27 {dimension_numbers = #tpu.dot_dimension_numbers<[1], [0], [0], [1], [0, 0, 1, 1], [], []>} : vector<256x128xbf16>, vector<128x1024xbf16>, vector<256x1024xf32> -> vector<256x1024xf32>
    %36 = vector.shape_cast %35 : vector<256x1024xf32> to vector<32x8x1024xf32>
    %cst_28 = arith.constant dense<0xFF800000> : vector<8x1024xf32>
    %37 = vector.multi_reduction <maximumf>, %36, %cst_28 [0] : vector<32x8x1024xf32> to vector<8x1024xf32>
    %c0_i32 = arith.constant 0 : i32
    %38 = arith.cmpi eq, %arg1, %c0_i32 : i32
    %39 = arith.extui %38 : i1 to i32
    %c0_i32_29 = arith.constant 0 : i32
    %40 = arith.cmpi ne, %39, %c0_i32_29 : i32
    scf.if %40 {
      %c0_34 = arith.constant 0 : index
      %c0_35 = arith.constant 0 : index
      %47 = vector.load %arg17[%c0_34, %c0_35] : memref<8x1024xf32, #tpu.memory_space<vmem>>, vector<8x1024xf32>
      tpu.vector_store %arg17[%c0_34, %c0_35], %37 {strides = array<i32>} : memref<8x1024xf32, #tpu.memory_space<vmem>>, vector<8x1024xf32>,
    } else {
    }
    %c0_i32_30 = arith.constant 0 : i32
    %41 = arith.cmpi sgt, %arg1, %c0_i32_30 : i32
    %42 = arith.extui %41 : i1 to i32
    %c0_i32_31 = arith.constant 0 : i32
    %43 = arith.cmpi ne, %42, %c0_i32_31 : i32
    scf.if %43 {
      %c0_34 = arith.constant 0 : index
      %c0_35 = arith.constant 0 : index
      %47 = vector.load %arg17[%c0_34, %c0_35] : memref<8x1024xf32, #tpu.memory_space<vmem>>, vector<8x1024xf32>
      %48 = arith.maximumf %47, %37 : vector<8x1024xf32>
      %c0_36 = arith.constant 0 : index
      %c0_37 = arith.constant 0 : index
      %49 = vector.load %arg17[%c0_36, %c0_37] : memref<8x1024xf32, #tpu.memory_space<vmem>>, vector<8x1024xf32>
      tpu.vector_store %arg17[%c0_36, %c0_37], %48 {strides = array<i32>} : memref<8x1024xf32, #tpu.memory_space<vmem>>, vector<8x1024xf32>,
    } else {
    }
    %c0_i32_32 = arith.constant 0 : i32
    %44 = arith.cmpi eq, %arg1, %c0_i32_32 : i32
    %45 = arith.extui %44 : i1 to i32
    %c0_i32_33 = arith.constant 0 : i32
    %46 = arith.cmpi ne, %45, %c0_i32_33 : i32
    scf.if %46 {
      %c0_34 = arith.constant 0 : index
      %c0_35 = arith.constant 0 : index
      %47 = vector.load %arg17[%c0_34, %c0_35] : memref<8x1024xf32, #tpu.memory_space<vmem>>, vector<8x1024xf32>
      %cst_36 = arith.constant dense<0xFF800000> : vector<1024xf32>
      %48 = vector.multi_reduction <maximumf>, %47, %cst_36 [0] : vector<8x1024xf32> to vector<1024xf32>
      %49 = vector.shape_cast %48 : vector<1024xf32> to vector<1x1024xf32>
      %c0_37 = arith.constant 0 : index
      %c0_38 = arith.constant 0 : index
      %50 = vector.load %arg12[%c0_37, %c0_38] : memref<1x1024xf32, #tpu.memory_space<vmem>>, vector<1x1024xf32>
      %51 = arith.addf %49, %50 : vector<1x1024xf32>
      %cst_39 = arith.constant 0.000000e+00 : f32
      %52 = vector.broadcast %cst_39 : f32 to vector<1x1024xf32>
      %53 = arith.maximumf %51, %52 : vector<1x1024xf32>
      %c0_40 = arith.constant 0 : index
      %c0_41 = arith.constant 0 : index
      %c0_42 = arith.constant 0 : index
      %54 = vector.load %arg15[%c0_40, %c0_41, %c0_42] : memref<1x1x1024xf32, #tpu.memory_space<vmem>>, vector<1x1x1024xf32>
      %55 = vector.shape_cast %54 : vector<1x1x1024xf32> to vector<1x1024xf32>
      %56 = vector.shape_cast %53 : vector<1x1024xf32> to vector<1x1x1024xf32>
      tpu.vector_store %arg15[%c0_40, %c0_41, %c0_42], %56 {strides = array<i32>} : memref<1x1x1024xf32, #tpu.memory_space<vmem>>, vector<1x1x1024xf32>,
      %57 = arith.truncf %53 : vector<1x1024xf32> to vector<1x1024xbf16>
      %c0_43 = arith.constant 0 : index
      %c0_44 = arith.constant 0 : index
      %58 = vector.load %arg13[%c0_43, %c0_44] : memref<1024x256xbf16, #tpu.memory_space<vmem>>, vector<1024x256xbf16>
      %cst_45 = arith.constant dense<0.000000e+00> : vector<1x256xf32>
      %59 = tpu.matmul %57, %58, %cst_45 {dimension_numbers = #tpu.dot_dimension_numbers<[1], [0], [0], [1], [0, 0, 1, 1], [], []>} : vector<1x1024xbf16>, vector<1024x256xbf16>, vector<1x256xf32> -> vector<1x256xf32>
      %c0_46 = arith.constant 0 : index
      %c0_47 = arith.constant 0 : index
      %60 = vector.load %arg14[%c0_46, %c0_47] : memref<1x256xf32, #tpu.memory_space<vmem>>, vector<1x256xf32>
      %61 = arith.addf %59, %60 : vector<1x256xf32>
      %c0_48 = arith.constant 0 : index
      %c0_49 = arith.constant 0 : index
      %c0_50 = arith.constant 0 : index
      %62 = vector.load %arg16[%c0_48, %c0_49, %c0_50] : memref<1x1x256xf32, #tpu.memory_space<vmem>>, vector<1x1x256xf32>
      %63 = vector.shape_cast %62 : vector<1x1x256xf32> to vector<1x256xf32>
      %64 = vector.shape_cast %61 : vector<1x256xf32> to vector<1x1x256xf32>
      tpu.vector_store %arg16[%c0_48, %c0_49, %c0_50], %64 {strides = array<i32>} : memref<1x1x256xf32, #tpu.memory_space<vmem>>, vector<1x1x256xf32>,
    } else {
    }
    return
  }
  func.func @transform_0(%arg0: i32, %arg1: i32) -> (i32, i32, i32) {
    %c0_i32 = arith.constant 0 : i32
    %c0_i32_0 = arith.constant 0 : i32
    return %arg0, %arg1, %c0_i32 : i32, i32, i32
  }
  func.func @transform_1(%arg0: i32, %arg1: i32) -> (i32, i32) {
    %c0_i32 = arith.constant 0 : i32
    %c0_i32_0 = arith.constant 0 : i32
    %c0_i32_1 = arith.constant 0 : i32
    return %c0_i32, %c0_i32_0 : i32, i32
  }
  func.func @transform_2(%arg0: i32, %arg1: i32) -> (i32, i32) {
    %c0_i32 = arith.constant 0 : i32
    %c0_i32_0 = arith.constant 0 : i32
    %c0_i32_1 = arith.constant 0 : i32
    return %c0_i32, %c0_i32_0 : i32, i32
  }
  func.func @transform_3(%arg0: i32, %arg1: i32) -> (i32, i32) {
    %c0_i32 = arith.constant 0 : i32
    %c0_i32_0 = arith.constant 0 : i32
    %c0_i32_1 = arith.constant 0 : i32
    return %c0_i32, %c0_i32_0 : i32, i32
  }
  func.func @transform_4(%arg0: i32, %arg1: i32) -> (i32, i32) {
    %c0_i32 = arith.constant 0 : i32
    %c0_i32_0 = arith.constant 0 : i32
    %c0_i32_1 = arith.constant 0 : i32
    return %c0_i32, %c0_i32_0 : i32, i32
  }
  func.func @transform_5(%arg0: i32, %arg1: i32) -> (i32, i32) {
    %c0_i32 = arith.constant 0 : i32
    %c0_i32_0 = arith.constant 0 : i32
    %c0_i32_1 = arith.constant 0 : i32
    return %c0_i32, %c0_i32_0 : i32, i32
  }
  func.func @transform_6(%arg0: i32, %arg1: i32) -> (i32, i32) {
    %c0_i32 = arith.constant 0 : i32
    %c0_i32_0 = arith.constant 0 : i32
    %c0_i32_1 = arith.constant 0 : i32
    return %c0_i32, %c0_i32_0 : i32, i32
  }
  func.func @transform_7(%arg0: i32, %arg1: i32) -> (i32, i32) {
    %c0_i32 = arith.constant 0 : i32
    %c0_i32_0 = arith.constant 0 : i32
    %c0_i32_1 = arith.constant 0 : i32
    return %c0_i32, %c0_i32_0 : i32, i32
  }
  func.func @transform_8(%arg0: i32, %arg1: i32) -> (i32, i32) {
    %c0_i32 = arith.constant 0 : i32
    %c0_i32_0 = arith.constant 0 : i32
    %c0_i32_1 = arith.constant 0 : i32
    return %c0_i32, %c0_i32_0 : i32, i32
  }
  func.func @transform_9(%arg0: i32, %arg1: i32) -> (i32, i32) {
    %c0_i32 = arith.constant 0 : i32
    %c0_i32_0 = arith.constant 0 : i32
    %c0_i32_1 = arith.constant 0 : i32
    return %c0_i32, %c0_i32_0 : i32, i32
  }
  func.func @transform_10(%arg0: i32, %arg1: i32) -> (i32, i32) {
    %c0_i32 = arith.constant 0 : i32
    %c0_i32_0 = arith.constant 0 : i32
    %c0_i32_1 = arith.constant 0 : i32
    return %c0_i32, %c0_i32_0 : i32, i32
  }
  func.func @transform_11(%arg0: i32, %arg1: i32) -> (i32, i32) {
    %c0_i32 = arith.constant 0 : i32
    %c0_i32_0 = arith.constant 0 : i32
    %c0_i32_1 = arith.constant 0 : i32
    return %c0_i32, %c0_i32_0 : i32, i32
  }
  func.func @transform_12(%arg0: i32, %arg1: i32) -> (i32, i32) {
    %c0_i32 = arith.constant 0 : i32
    %c0_i32_0 = arith.constant 0 : i32
    %c0_i32_1 = arith.constant 0 : i32
    return %c0_i32, %c0_i32_0 : i32, i32
  }
  func.func @transform_13(%arg0: i32, %arg1: i32) -> (i32, i32, i32) {
    %c0_i32 = arith.constant 0 : i32
    %c0_i32_0 = arith.constant 0 : i32
    %c0_i32_1 = arith.constant 0 : i32
    return %arg0, %c0_i32, %c0_i32_0 : i32, i32, i32
  }
  func.func @transform_14(%arg0: i32, %arg1: i32) -> (i32, i32, i32) {
    %c0_i32 = arith.constant 0 : i32
    %c0_i32_0 = arith.constant 0 : i32
    %c0_i32_1 = arith.constant 0 : i32
    return %arg0, %c0_i32, %c0_i32_0 : i32, i32, i32
  }
}

</mosaic_0001>

<bundles_post_ra>
// kernel: tpu_custom_call.1
= control target key start
LH: loop header
LB: loop body
LE: loop exit
PB: predicated region body
PF: predicated region fallthrough
CT: control target
= control target key end

     0   :  { %s6477_s0 = inlined_call_operand.vmem [shape: bf16[2,256,6], index: 0, kind: input, shape index: {}]   ;;  %s6478_s1 = inlined_call_operand.vmem [shape: bf16[6,64], index: 1, kind: input, shape index: {}]   ;;  %s6479_s2 = inlined_call_operand.vmem [shape: f32[1,64], index: 2, kind: input, shape index: {}]   ;;  %s6480_s3 = inlined_call_operand.vmem [shape: bf16[64,64], index: 3, kind: input, shape index: {}]   ;;  %s6481_s4 = inlined_call_operand.vmem [shape: f32[1,64], index: 4, kind: input, shape index: {}]   ;;  %s6482_s5 = inlined_call_operand.vmem [shape: bf16[64,64], index: 5, kind: input, shape index: {}]   ;;  %s6483_s6 = inlined_call_operand.vmem [shape: f32[1,64], index: 6, kind: input, shape index: {}]   ;;  %s6484_s7 = inlined_call_operand.vmem [shape: bf16[64,128], index: 7, kind: input, shape index: {}]   ;;  %s6485_s8 = inlined_call_operand.vmem [shape: f32[1,128], index: 8, kind: input, shape index: {}]   ;;  %s6486_s9 = inlined_call_operand.hbm [shape: bf16[128,1024], index: 9, kind: input, shape index: {}]   ;;  %s6487_s10 = inlined_call_operand.vmem [shape: f32[1,1024], index: 10, kind: input, shape index: {}]   ;;  %s6488_s11 = inlined_call_operand.hbm [shape: bf16[1024,256], index: 11, kind: input, shape index: {}]   ;;  %s6489_s12 = inlined_call_operand.vmem [shape: f32[1,256], index: 12, kind: input, shape index: {}]   ;;  %s6490_s13 = inlined_call_operand.hbm [shape: f32[2,1,1024], index: 13, kind: output, shape index: {0}]   ;;  %s6491_s14 = inlined_call_operand.hbm [shape: f32[2,1,256], index: 14, kind: output, shape index: {1}]  }
   0x1   :  { %6505 = sst [smem:[#allocation22_spill]] %s6489_s12 }
   0x2   :  { %6506 = sst [smem:[#allocation23_spill]] %s6490_s13 }
   0x3   :  { %6507 = sst [smem:[#allocation24_spill]] %s6491_s14 }
   0x4   :  { %20 = vsyncpa [#allocation4], 0 }
   0x5   :  { %21 = vsyncpa [#allocation7], 0 }
   0x6   :  { %22 = vsyncpa [#allocation5], 0 }
   0x7   :  { %24 = vsyncpa [#allocation5 + $0x1], 0 }
   0x8   :  { %25 = vsyncpa [#allocation10], 0 }
   0x9   :  { %27 = vsyncpa [#allocation10 + $0x1], 0  ;;  %s5706_s29 = smov 0   ;;  %s5708_s30 = smov 0  }
   0xa   :  { %s5710_s15 = smov 0   ;;  %s5712_s16 = smov 0  }
   0xb   :  { %s5714_s17 = smov 0   ;;  %s5716_s18 = smov 0  }
   0xc LB: > { %6508 = sst [smem:[#allocation15_spill]] %s5599_s29  ;;  %s4563_s19 = sadd.s32 4294967295, %s5619_s18   ;;  %s5619_s18 = sphi %s5716_s18, %s33_s18   ;;  %s5615_s17 = sphi %s5714_s17, %s6534_s17   ;;  %s5611_s16 = sphi %s5712_s16, %s6533_s16   ;;  %s5607_s15 = sphi %s5710_s15, %s6532_s15   ;;  %s5603_s30 = sphi %s5708_s30, %s6536_s30   ;;  %s5599_s29 = sphi %s5706_s29, %s6535_s29  }
   0xd   : > { %6509 = sst [smem:[#allocation16_spill]] %s5607_s15  ;;  %s4564_s20 = sadd.s32 4294967294, %s5619_s18  }
   0xe   : > { %6510 = sst [smem:[#allocation17_spill]] %s5615_s17  ;;  %s45_s21 = sadd.s32 1, %s5615_s17 }
   0xf   : > { %6511 = sst [smem:[#allocation18_spill]] %s5619_s18  ;;  %s332_s22 = sadd.s32 1, %s5607_s15 }
  0x10   : > { %p47_p0 = scmp.ge.s32.totalorder %s45_s21, 2  ;;  %p342_p1 = scmp.ne.s32.totalorder %s5607_s15, %s5603_s30 }
  0x11   : > { %p343_p2 = scmp.eq.s32.totalorder %s4563_s19, 1  ;;  %p348_p3 = scmp.ne.s32.totalorder %s5603_s30, %s5599_s29 }
  0x12   : > { %s6538_s21 = smov (%p47_p0, %s45_s21), 0  ;;  %p349_p5 = scmp.eq.s32.totalorder %s4564_s20, 1 }
  0x13   : > { %6512 = sst [smem:[#allocation19_spill]] %s6538_s21  ;;  %p5746_p4 = por %p343_p2, %p342_p1 }
  0x14   : > { %s329_s24 = ssub.s32 %s5615_s17, %s6538_s21  ;;  %p4565_p6 = scmp.ge.s32.totalorder %s5619_s18, 1 }
  0x15   : > { %s6513_s23 = scalar_select %p5746_p4, 1, 0 }
  0x16   : > { %p330_p7 = scmp.eq.s32.totalorder %s329_s24, 0  ;;  %p5753_p8 = por %p349_p5, %p348_p3 }
  0x17   : > { %p382_p9 = scmp.lt.s32.totalorder %s5619_s18, 3  ;;  %p5765_p11 = scmp.eq.s32.totalorder %s4563_s19, 0 }
  0x18   : > { %s6514_s25 = scalar_select %p5753_p8, 1, 0 }
  0x19   : > { %s5759_s26 = scalar_select %p330_p7, %s5607_s15, %s332_s22  }
  0x1a   : > { %6515 = sst [smem:[#allocation20_spill]] %s6514_s25  ;;  %p5761_p10 = pnand %p4565_p6, %p382_p9 }
  0x1b   : > { %6516 = sst [smem:[#allocation21_spill]] %s5759_s26  ;;  %s5621_s20 = smov [#allocation3]  }
  0x1c   : > { %s6517_s27 = scalar_select %p5761_p10, 1, 0 }
  0x1d   : > { %s6518_s28 = scalar_select %p5765_p11, 1, 0 }
  0x1e   : > { %p5149_p12 = pneg %p5761_p10  ;;  %s418_s24 = sshll.u32 %s5621_s20, 4  ;;  %s419_s24 = int_to_ptr.vmem [resolvable:$true] %s418_s24 }
  0x1f   : > { %s5622_s22 = smov [#allocation6]   ;;  %s5445_s15 = scalar_lea.hbm %s6486_s9, 8192 }
  0x20   : > { %p5773_p13 = pnand %p5765_p11, %p5149_p12  ;;  %s434_s17 = sshll.u32 %s5622_s22, 4  ;;  %s5777_s17 = int_to_ptr.vmem [resolvable:$true] %s434_s17 }
  0x21   : > { %p5446_p0 = scmp.ne.s32.totalorder %s6486_s9, %s5445_s15  ;;  %p5452_p5 = scmp.lt.u32.totalorder %s5445_s15, %s6486_s9 }
  0x22   : > { %p5447_p1 = pneg %p5773_p13 }
  0x24   : > { %p5448_p2 = pnand %p5447_p1, %p5446_p0 }
  0x26   : > { %p5449_p3 = pneg %p5448_p2 }
  0x28   : > { %p5454_p6 = pnand %p5452_p5, %p5449_p3 }
  0x2a   : > { %5457 = shalt.err (!%p5454_p6)
}
  0x2b   : > { %s5458_s22 = scalar_lea.vmem %s419_s24, 8192  ;;  %p5466_p8 = scmp.lt.s32.totalorder %s419_s24, %s419_s24 }
  0x2c   : > { %p5459_p7 = scmp.ne.s32.totalorder %s419_s24, %s5458_s22  ;;  %p5467_p4 = scmp.lt.s32.totalorder %s5458_s22, %s5458_s22 }
  0x2e   : > { %p5461_p9 = pnand %p5459_p7, %p5447_p1  ;;  %p5468_p11 = por %p5467_p4, %p5466_p8 }
  0x30   : > { %p5462_p12 = pneg %p5461_p9 }
  0x32   : > { %p5469_p10 = pnand %p5468_p11, %p5462_p12 }
  0x34   : > { %5472 = shalt.err (!%p5469_p10)
}
  0x35   : > { %s5623_s29 = smov 512   ;;  %s5624_s25 = smov 32  }
  0x36   : > { %5152 = dma.hbm_to_vmem [thread:$0]  (!%p5773_p13), %s6486_s9, 8192, %s419_s24, [#allocation4], %s5623_s29, %s5623_s29, %s5624_s25  }
  0x37   : > { %s5473_s20 = scalar_lea.hbm %s6488_s11, 16384 }
  0x38   : > { %p5474_p0 = scmp.ne.s32.totalorder %s6488_s11, %s5473_s20  ;;  %p5480_p10 = scmp.lt.u32.totalorder %s5473_s20, %s6488_s11 }
  0x3a   : > { %p5476_p4 = pnand %p5474_p0, %p5447_p1 }
  0x3c   : > { %p5477_p8 = pneg %p5476_p4 }
  0x3e   : > { %p5482_p11 = pnand %p5480_p10, %p5477_p8 }
  0x40   : > { %5485 = shalt.err (!%p5482_p11)
}
  0x41   : > { %s5486_s24 = scalar_lea.vmem %s5777_s17, 16384  ;;  %p5494_p6 = scmp.lt.s32.totalorder %s5777_s17, %s5777_s17 }
  0x42   : > { %p5487_p2 = scmp.ne.s32.totalorder %s5777_s17, %s5486_s24  ;;  %p5495_p7 = scmp.lt.s32.totalorder %s5486_s24, %s5486_s24 }
  0x44   : > { %p5489_p3 = pnand %p5487_p2, %p5447_p1  ;;  %p5496_p9 = por %p5495_p7, %p5494_p6 }
  0x46   : > { %p5490_p5 = pneg %p5489_p3 }
  0x48   : > { %p5497_p12 = pnand %p5496_p9, %p5490_p5 }
  0x4a   : > { %5500 = shalt.err (!%p5497_p12)
}
  0x4b   : > { %s5625_s12 = smov 128   ;;  %s5626_s13 = smov 8  }
  0x4c   : > { %5155 = dma.hbm_to_vmem [thread:$0]  (!%p5773_p13), %s6488_s11, 16384, %s5777_s17, [#allocation7], %s5625_s12, %s5625_s12, %s5626_s13  }
  0x4d   : > { %p6520_p0 = scmp.ne.s32.totalorder %s6517_s27, 0 }
  0x4e   : > { %p6521_p1 = scmp.ne.s32.totalorder (!%p6520_p0), %s6518_s28, 0 }
  0x4f   : > { %466 = sbr.rel (%p6520_p0) target bundleno = 1815 (0x717), region = 72 }
  0x56   : > { %5582 = dma.done.wait (%p6521_p1), [#allocation4], 8192  }
  0x57   : > { %5584 = vsyncadd (%p6521_p1), [#allocation4], 4294959104 }
  0x58   : > { %5586 = dma.done.wait (%p6521_p1), [#allocation7], 16384  }
  0x59   : > { %5588 = vsyncadd (%p6521_p1), [#allocation7], 4294950912  ;;  %p526_p4 = scmp.lt.s32.totalorder %s5611_s16, 1  ;;  %vm705_vm0 = vcmask 1042432   ;;  %vm656_vm1 = vcmask 48128   ;;  %v5240_v9 = vld [vmem:[%s6480_s3] sm:$0xff]  }
  0x5a   : > { %v568_v0 = vld [vmem:[%s6478_s1] sm:$0x7]  ;;  %v5241_v10 = vld [vmem:[%s6480_s3 + $0x8] sm:$0xff]   ;;  %4986 = vmatprep.subr.bf16.mxu1 %v5240_v9  ;;  %v5242_v20 = vld [vmem:[%s6480_s3 + $0x10] sm:$0xff]   ;;  %vm957_vm2 = vcmask 523264   ;;  %s6377_s24 = sand.u32 1, %s5603_s30  }
  0x5b   : > { %s527_s21 = scalar_select %p526_p4, %s5611_s16, 1  ;;  %5136 = vmatprep.subr.msk.bf16.mxu0 %vm705_vm0, %v568_v0  ;;  %v707_v1 = vsel %vm705_vm0, %v568_v0, 0  ;;  %4987 = vmatpush3.bf16.msra.mxu1 %v5240_v9  ;;  %v5243_v21 = vld [vmem:[%s6480_s3 + $0x18] sm:$0xff]   ;;  %v5244_v22 = vld [vmem:[%s6482_s5] sm:$0xff]   ;;  %v5245_v23 = vld [vmem:[%s6482_s5 + $0x8] sm:$0xff]  }
  0x5c   : > { %4953 = vmatpush3.bf16.msra.mxu0 %v707_v1  ;;  %4988 = vmatprep.subr.bf16.mxu1 %v5241_v10  ;;  %v5246_v24 = vld [vmem:[%s6482_s5 + $0x10] sm:$0xff]   ;;  %v5247_v25 = vld [vmem:[%s6482_s5 + $0x18] sm:$0xff]   ;;  %v5905_v26 = vld [vmem:[%s6479_s2] ss:$0 sm:$0xff]  ;;  %s4572_s12 = sshll.u32 %s6377_s24, 3  ;;  %s4873_s14 = sshll.u32 %s5611_s16, 7 }
  0x5d   : > { %s4872_s17 = sshll.u32 %s527_s21, 7  ;;  %5026 = vmatprep.subr.bf16.mxu0 %v5244_v22  ;;  %s517_s13 = scalar_lea.vmem [#allocation8], %s4572_s12 }
  0x5e   : > { %s5841_s15 = scalar_lea.vmem %s6477_s0, %s4872_s17  ;;  %s6522_s17 = sld [smem:[#allocation23_spill]] }
  0x5f   : > { %v5224_v2 = vld [vmem:[%s5841_s15] sm:$0xff]   ;;  %v5225_v3 = vld [vmem:[%s5841_s15 + $0x8] sm:$0xff]   ;;  %v5226_v4 = vld [vmem:[%s5841_s15 + $0x10] sm:$0xff]   ;;  %4989 = vmatpush3.bf16.msra.mxu1 %v5241_v10  ;;  %s4403_s28 = scalar_lea.sflag [#allocation5], %s6377_s24  ;;  %p6524_p8 = scmp.ne.s32.totalorder %s6513_s23, 0 }
  0x60   : > { %4954 = vmatprep.mubr.msk.bf16.mxu0 %vm656_vm1, %v5224_v2  ;;  %v5227_v5 = vld [vmem:[%s5841_s15 + $0x18] sm:$0xff]   ;;  %v5228_v6 = vld [vmem:[%s5841_s15 + $0x20] sm:$0xff]   ;;  %v5229_v7 = vld [vmem:[%s5841_s15 + $0x28] sm:$0xff]   ;;  %4990 = vmatprep.subr.bf16.mxu1 %v5242_v20  ;;  %s5629_s26 = smov [#allocation8]  }
  0x61   : > { %4955 = vmatmul.mubr.msk.bf16.vlgmr.msra.gmra.mrb[0].mxu0 %vm656_vm1, %v5225_v3  ;;  %v5230_v8 = vld [vmem:[%s5841_s15 + $0x30] sm:$0xff]   ;;  %v5231_v11 = vld [vmem:[%s5841_s15 + $0x38] sm:$0xff]   ;;  %v5232_v12 = vld [vmem:[%s5841_s15 + $0x40] sm:$0xff]   ;;  %s5505_s19 = sshll.u32 %s5629_s26, 4  ;;  %s5506_s19 = int_to_ptr.vmem [resolvable:$false] %s5505_s19 }
  0x62   : > { %4958 = vmatprep.mubr.msk.bf16.mxu0 %vm656_vm1, %v5226_v4  ;;  %v5233_v13 = vld [vmem:[%s5841_s15 + $0x48] sm:$0xff]   ;;  %v5234_v14 = vld [vmem:[%s5841_s15 + $0x50] sm:$0xff]   ;;  %v5235_v15 = vld [vmem:[%s5841_s15 + $0x58] sm:$0xff]   ;;  %5027 = vmatpush3.bf16.msra.mxu0 %v5244_v22  ;;  %s5507_s20 = scalar_lea.vmem %s5506_s19, 256 }
  0x63   : > { %v5236_v16 = vld [vmem:[%s5841_s15 + $0x60] sm:$0xff]   ;;  %v5237_v17 = vld [vmem:[%s5841_s15 + $0x68] sm:$0xff]   ;;  %v5238_v18 = vld [vmem:[%s5841_s15 + $0x70] sm:$0xff]   ;;  %4991 = vmatpush3.bf16.msra.mxu1 %v5242_v20  ;;  %5028 = vmatprep.subr.bf16.mxu0 %v5245_v23 }
  0x64   : > { %v5239_v19 = vld [vmem:[%s5841_s15 + $0x78] sm:$0xff]   ;;  %4992 = vmatprep.subr.bf16.mxu1 %v5243_v21  ;;  %s6523_s27 = smov %s6522_s17  ;;  %s6394_s25 = scalar_lea.hbm %s6522_s17, %s4873_s14 }
  0x65   : > { %s4422_s15 = sshll.u32 %s517_s13, 4  ;;  %s4423_s15 = int_to_ptr.vmem [resolvable:$true] %s4422_s15 }
  0x66   : > { %5029 = vmatpush3.bf16.msra.mxu0 %v5245_v23  ;;  %s5501_s18 = scalar_lea.vmem %s4423_s15, 128  ;;  %p5508_p2 = scmp.lt.s32.totalorder %s4423_s15, %s5506_s19 }
  0x67   : > { %4993 = vmatpush3.bf16.msra.mxu1 %v5243_v21  ;;  %5030 = vmatprep.subr.bf16.mxu0 %v5246_v24  ;;  %p5502_p13 = scmp.ne.s32.totalorder %s4423_s15, %s5501_s18  ;;  %p5509_p3 = scmp.lt.s32.totalorder %s5507_s20, %s5501_s18 }
  0x69   : > { %4959 = vmatmul.mubr.msk.bf16.gmra.mrb[4].mxu0 %vm656_vm1, %v5227_v5  ;;  %p5503_p10 = pnand %p5502_p13, %p6524_p8  ;;  %p5510_p5 = por %p5509_p3, %p5508_p2 }
  0x6a   : > { %4962 = vmatprep.mubr.msk.bf16.mxu0 %vm656_vm1, %v5228_v6  ;;  %5031 = vmatpush3.bf16.msra.mxu0 %v5246_v24 }
  0x6b   : > { %5032 = vmatprep.subr.bf16.mxu0 %v5247_v25  ;;  %p5504_p11 = pneg %p5503_p10 }
  0x6d   : > { %p5511_p6 = pnand %p5510_p5, %p5504_p11 }
  0x6e   : > { %5033 = vmatpush3.bf16.msra.mxu0 %v5247_v25 }
  0x71   : > { %4963 = vmatmul.mubr.msk.bf16.gmra.mrb[8].mxu0 %vm656_vm1, %v5229_v7 }
  0x72   : > { %4966 = vmatprep.mubr.msk.bf16.mxu0 %vm656_vm1, %v5230_v8 }
  0x79   : > { %4967 = vmatmul.mubr.msk.bf16.gmra.mrb[12].mxu0 %vm656_vm1, %v5231_v11 }
  0x7a   : > { %4970 = vmatprep.mubr.msk.bf16.mxu0 %vm656_vm1, %v5232_v12 }
  0x81   : > { %4971 = vmatmul.mubr.msk.bf16.gmra.mrb[16].mxu0 %vm656_vm1, %v5233_v13 }
  0x82   : > { %4974 = vmatprep.mubr.msk.bf16.mxu0 %vm656_vm1, %v5234_v14 }
  0x89   : > { %4975 = vmatmul.mubr.msk.bf16.gmra.mrb[20].mxu0 %vm656_vm1, %v5235_v15 }
  0x8a   : > { %4978 = vmatprep.mubr.msk.bf16.mxu0 %vm656_vm1, %v5236_v16 }
  0x91   : > { %4979 = vmatmul.mubr.msk.bf16.gmra.mrb[24].mxu0 %vm656_vm1, %v5237_v17 }
  0x92   : > { %4982 = vmatprep.mubr.msk.bf16.mxu0 %vm656_vm1, %v5238_v18 }
  0x99   : > { %4983 = vmatmul.mubr.msk.bf16.gmra.mrb[28].mxu0 %vm656_vm1, %v5239_v19 }
 0x134   : > { %v4956_v27 = vpop.f32.mrb[0].mxu0 }
 0x135   : > { %v752_v28 = vadd.f32 %v4956_v27, %v5905_v26  ;;  %v743_v29 = vpop.f32.mrb[1].mxu0 }
 0x136   : > { %v744_v30 = vadd.f32 %v5905_v26, %v743_v29  ;;  %v4957_v31 = vpop.f32.mrb[2].mxu0 }
 0x137   : > { %v755_v32 = vadd.f32 %v4957_v31, %v5905_v26  ;;  %v746_v33 = vpop.f32.mrb[3].mxu0  ;;  %v872_v35 = vmax.f32 %v752_v28, 0.0 }
 0x138   : > { %v747_v34 = vadd.f32 %v5905_v26, %v746_v33  ;;  %v870_v37 = vmax.f32 %v744_v30, 0.0 }
 0x139   : > { %v873_v36 = vmax.f32 %v755_v32, 0.0 }
 0x13a   : > { %v871_v38 = vmax.f32 %v747_v34, 0.0 }
 0x13b   : > { %v903_v39 = vpack.c.bf16 %v873_v36, %v872_v35 }
 0x13c   : > { %v4960_v40 = vpop.f32.mrb[4].mxu0  ;;  %v902_v41 = vpack.c.bf16 %v871_v38, %v870_v37 }
 0x13d   : > { %v768_v42 = vadd.f32 %v4960_v40, %v5905_v26  ;;  %v759_v43 = vpop.f32.mrb[5].mxu0 }
 0x13e   : > { %v760_v44 = vadd.f32 %v5905_v26, %v759_v43  ;;  %v4961_v45 = vpop.f32.mrb[6].mxu0  ;;  %4994 = vmatprep.mubr.msk.bf16.mxu1 %vm957_vm2, %v902_v41 }
 0x13f   : > { %v771_v46 = vadd.f32 %v4961_v45, %v5905_v26  ;;  %v762_v47 = vpop.f32.mrb[7].mxu0  ;;  %4995 = vmatmul.mubr.msk.bf16.vlgmr.msra.gmra.mrb[0].mxu1 %vm957_vm2, %v903_v39  ;;  %v876_v49 = vmax.f32 %v768_v42, 0.0 }
 0x140   : > { %v763_v48 = vadd.f32 %v5905_v26, %v762_v47  ;;  %v874_v51 = vmax.f32 %v760_v44, 0.0 }
 0x141   : > { %v877_v50 = vmax.f32 %v771_v46, 0.0 }
 0x142   : > { %v875_v52 = vmax.f32 %v763_v48, 0.0 }
 0x143   : > { %v905_v53 = vpack.c.bf16 %v877_v50, %v876_v49 }
 0x144   : > { %v904_v54 = vpack.c.bf16 %v875_v52, %v874_v51  ;;  %v4964_v55 = vpop.f32.mrb[8].mxu0 }
 0x145   : > { %v784_v56 = vadd.f32 %v4964_v55, %v5905_v26  ;;  %v775_v57 = vpop.f32.mrb[9].mxu0 }
 0x146   : > { %v776_v58 = vadd.f32 %v5905_v26, %v775_v57  ;;  %v4965_v59 = vpop.f32.mrb[10].mxu0  ;;  %4998 = vmatprep.mubr.msk.bf16.mxu1 %vm957_vm2, %v904_v54 }
 0x147   : > { %v787_v60 = vadd.f32 %v4965_v59, %v5905_v26  ;;  %v778_v61 = vpop.f32.mrb[11].mxu0  ;;  %4999 = vmatmul.mubr.msk.bf16.gmra.mrb[4].mxu1 %vm957_vm2, %v905_v53  ;;  %v880_v63 = vmax.f32 %v784_v56, 0.0 }
 0x148   : > { %v779_v62 = vadd.f32 %v5905_v26, %v778_v61  ;;  %v878_v1 = vmax.f32 %v776_v58, 0.0 }
 0x149   : > { %v881_v0 = vmax.f32 %v787_v60, 0.0 }
 0x14a   : > { %v879_v2 = vmax.f32 %v779_v62, 0.0 }
 0x14b   : > { %v907_v3 = vpack.c.bf16 %v881_v0, %v880_v63 }
 0x14c   : > { %v906_v4 = vpack.c.bf16 %v879_v2, %v878_v1  ;;  %v4968_v5 = vpop.f32.mrb[12].mxu0 }
 0x14d   : > { %v800_v6 = vadd.f32 %v4968_v5, %v5905_v26  ;;  %v791_v7 = vpop.f32.mrb[13].mxu0 }
 0x14e   : > { %v792_v8 = vadd.f32 %v5905_v26, %v791_v7  ;;  %v4969_v9 = vpop.f32.mrb[14].mxu0  ;;  %5002 = vmatprep.mubr.msk.bf16.mxu1 %vm957_vm2, %v906_v4 }
 0x14f   : > { %v884_v10 = vmax.f32 %v800_v6, 0.0  ;;  %v803_v11 = vadd.f32 %v4969_v9, %v5905_v26  ;;  %v794_v12 = vpop.f32.mrb[15].mxu0  ;;  %5003 = vmatmul.mubr.msk.bf16.gmra.mrb[8].mxu1 %vm957_vm2, %v907_v3 }
 0x150   : > { %v882_v13 = vmax.f32 %v792_v8, 0.0  ;;  %v795_v14 = vadd.f32 %v5905_v26, %v794_v12  ;;  %v5248_v12 = vld [vmem:[%s6484_s7] sm:$0xff]  }
 0x151   : > { %v885_v15 = vmax.f32 %v803_v11, 0.0  ;;  %5066 = vmatprep.subr.bf16.mxu1 %v5248_v12 }
 0x152   : > { %v883_v16 = vmax.f32 %v795_v14, 0.0  ;;  %5067 = vmatpush3.bf16.msra.mxu1 %v5248_v12  ;;  %v5251_v14 = vld [vmem:[%s6484_s7 + $0x18] sm:$0xff]  }
 0x153   : > { %v909_v17 = vpack.c.bf16 %v885_v15, %v884_v10  ;;  %v5970_v15 = vld [vmem:[%s6481_s4] ss:$0 sm:$0xff] }
 0x154   : > { %v908_v18 = vpack.c.bf16 %v883_v16, %v882_v13  ;;  %v4972_v19 = vpop.f32.mrb[16].mxu0  ;;  %v5249_v13 = vld [vmem:[%s6484_s7 + $0x8] sm:$0xff]  }
 0x155   : > { %v816_v20 = vadd.f32 %v4972_v19, %v5905_v26  ;;  %v807_v21 = vpop.f32.mrb[17].mxu0  ;;  %5068 = vmatprep.subr.bf16.mxu1 %v5249_v13 }
 0x156   : > { %v808_v22 = vadd.f32 %v5905_v26, %v807_v21  ;;  %5006 = vmatprep.mubr.msk.bf16.mxu1 %vm957_vm2, %v908_v18  ;;  %v4973_v23 = vpop.f32.mrb[18].mxu0  ;;  %5069 = vmatpush3.bf16.msra.mxu1 %v5249_v13 }
 0x157   : > { %v888_v24 = vmax.f32 %v816_v20, 0.0  ;;  %v819_v25 = vadd.f32 %v4973_v23, %v5905_v26  ;;  %5007 = vmatmul.mubr.msk.bf16.gmra.mrb[12].mxu1 %vm957_vm2, %v909_v17  ;;  %v810_v27 = vpop.f32.mrb[19].mxu0 }
 0x158   : > { %v886_v28 = vmax.f32 %v808_v22, 0.0  ;;  %v811_v29 = vadd.f32 %v5905_v26, %v810_v27 }
 0x159   : > { %v889_v30 = vmax.f32 %v819_v25, 0.0 }
 0x15a   : > { %v887_v31 = vmax.f32 %v811_v29, 0.0 }
 0x15b   : > { %v911_v32 = vpack.c.bf16 %v889_v30, %v888_v24 }
 0x15c   : > { %v910_v33 = vpack.c.bf16 %v887_v31, %v886_v28  ;;  %v4976_v34 = vpop.f32.mrb[20].mxu0 }
 0x15d   : > { %v832_v35 = vadd.f32 %v4976_v34, %v5905_v26  ;;  %v823_v36 = vpop.f32.mrb[21].mxu0 }
 0x15e   : > { %5010 = vmatprep.mubr.msk.bf16.mxu1 %vm957_vm2, %v910_v33  ;;  %v824_v37 = vadd.f32 %v5905_v26, %v823_v36  ;;  %v4977_v38 = vpop.f32.mrb[22].mxu0 }
 0x15f   : > { %5011 = vmatmul.mubr.msk.bf16.gmra.mrb[16].mxu1 %vm957_vm2, %v911_v32  ;;  %v892_v39 = vmax.f32 %v832_v35, 0.0  ;;  %v835_v40 = vadd.f32 %v4977_v38, %v5905_v26  ;;  %v826_v41 = vpop.f32.mrb[23].mxu0 }
 0x160   : > { %v890_v42 = vmax.f32 %v824_v37, 0.0  ;;  %v827_v43 = vadd.f32 %v5905_v26, %v826_v41 }
 0x161   : > { %v893_v44 = vmax.f32 %v835_v40, 0.0 }
 0x162   : > { %v891_v45 = vmax.f32 %v827_v43, 0.0 }
 0x163   : > { %v913_v46 = vpack.c.bf16 %v893_v44, %v892_v39 }
 0x164   : > { %v912_v47 = vpack.c.bf16 %v891_v45, %v890_v42  ;;  %v4980_v48 = vpop.f32.mrb[24].mxu0 }
 0x165   : > { %v848_v49 = vadd.f32 %v4980_v48, %v5905_v26  ;;  %v839_v50 = vpop.f32.mrb[25].mxu0 }
 0x166   : > { %5014 = vmatprep.mubr.msk.bf16.mxu1 %vm957_vm2, %v912_v47  ;;  %v840_v51 = vadd.f32 %v5905_v26, %v839_v50  ;;  %v4981_v52 = vpop.f32.mrb[26].mxu0 }
 0x167   : > { %5015 = vmatmul.mubr.msk.bf16.gmra.mrb[20].mxu1 %vm957_vm2, %v913_v46  ;;  %v896_v53 = vmax.f32 %v848_v49, 0.0  ;;  %v851_v54 = vadd.f32 %v4981_v52, %v5905_v26  ;;  %v842_v55 = vpop.f32.mrb[27].mxu0 }
 0x168   : > { %v894_v56 = vmax.f32 %v840_v51, 0.0  ;;  %v843_v57 = vadd.f32 %v5905_v26, %v842_v55 }
 0x169   : > { %v897_v58 = vmax.f32 %v851_v54, 0.0 }
 0x16a   : > { %v895_v59 = vmax.f32 %v843_v57, 0.0 }
 0x16b   : > { %v915_v60 = vpack.c.bf16 %v897_v58, %v896_v53 }
 0x16c   : > { %v914_v61 = vpack.c.bf16 %v895_v59, %v894_v56  ;;  %v4984_v62 = vpop.f32.mrb[28].mxu0 }
 0x16d   : > { %v864_v63 = vadd.f32 %v4984_v62, %v5905_v26  ;;  %v855_v0 = vpop.f32.mrb[29].mxu0 }
 0x16e   : > { %5018 = vmatprep.mubr.msk.bf16.mxu1 %vm957_vm2, %v914_v61  ;;  %v856_v1 = vadd.f32 %v5905_v26, %v855_v0  ;;  %v4985_v2 = vpop.f32.mrb[30].mxu0 }
 0x16f   : > { %5019 = vmatmul.mubr.msk.bf16.gmra.mrb[24].mxu1 %vm957_vm2, %v915_v60  ;;  %v900_v3 = vmax.f32 %v864_v63, 0.0  ;;  %v867_v4 = vadd.f32 %v4985_v2, %v5905_v26  ;;  %v858_v5 = vpop.f32.mrb[31].mxu0 }
 0x170   : > { %v898_v6 = vmax.f32 %v856_v1, 0.0  ;;  %v859_v7 = vadd.f32 %v5905_v26, %v858_v5  ;;  %v5250_v26 = vld [vmem:[%s6484_s7 + $0x10] sm:$0xff]  }
 0x171   : > { %v901_v8 = vmax.f32 %v867_v4, 0.0  ;;  %5070 = vmatprep.subr.bf16.mxu1 %v5250_v26 }
 0x172   : > { %v899_v9 = vmax.f32 %v859_v7, 0.0  ;;  %5071 = vmatpush3.bf16.msra.mxu1 %v5250_v26 }
 0x173   : > { %v917_v10 = vpack.c.bf16 %v901_v8, %v900_v3  ;;  %5072 = vmatprep.subr.bf16.mxu1 %v5251_v14 }
 0x174   : > { %v916_v11 = vpack.c.bf16 %v899_v9, %v898_v6 }
 0x176   : > { %5022 = vmatprep.mubr.msk.bf16.mxu1 %vm957_vm2, %v916_v11  ;;  %5073 = vmatpush3.bf16.msra.mxu1 %v5251_v14 }
 0x177   : > { %5023 = vmatmul.mubr.msk.bf16.gmra.mrb[28].mxu1 %vm957_vm2, %v917_v10 }
 0x212   : > { %v4996_v16 = vpop.f32.mrb[0].mxu1 }
 0x213   : > { %v1049_v17 = vadd.f32 %v4996_v16, %v5970_v15  ;;  %v1040_v18 = vpop.f32.mrb[1].mxu1 }
 0x214   : > { %v1041_v19 = vadd.f32 %v5970_v15, %v1040_v18  ;;  %v4997_v20 = vpop.f32.mrb[2].mxu1 }
 0x215   : > { %v1052_v21 = vadd.f32 %v4997_v20, %v5970_v15  ;;  %v1043_v22 = vpop.f32.mrb[3].mxu1  ;;  %v1169_v24 = vmax.f32 %v1049_v17, 0.0 }
 0x216   : > { %v1044_v23 = vadd.f32 %v5970_v15, %v1043_v22  ;;  %v1167_v27 = vmax.f32 %v1041_v19, 0.0 }
 0x217   : > { %v1170_v25 = vmax.f32 %v1052_v21, 0.0 }
 0x218   : > { %v1168_v28 = vmax.f32 %v1044_v23, 0.0 }
 0x219   : > { %v1200_v29 = vpack.c.bf16 %v1170_v25, %v1169_v24 }
 0x21a   : > { %v1199_v30 = vpack.c.bf16 %v1168_v28, %v1167_v27  ;;  %v5000_v31 = vpop.f32.mrb[4].mxu1 }
 0x21b   : > { %v1065_v32 = vadd.f32 %v5000_v31, %v5970_v15  ;;  %v1056_v33 = vpop.f32.mrb[5].mxu1 }
 0x21c   : > { %v1057_v34 = vadd.f32 %v5970_v15, %v1056_v33  ;;  %v5001_v35 = vpop.f32.mrb[6].mxu1  ;;  %5034 = vmatprep.mubr.msk.bf16.mxu0 %vm957_vm2, %v1199_v30 }
 0x21d   : > { %v1068_v36 = vadd.f32 %v5001_v35, %v5970_v15  ;;  %v1059_v37 = vpop.f32.mrb[7].mxu1  ;;  %5035 = vmatmul.mubr.msk.bf16.vlgmr.msra.gmra.mrb[32].mxu0 %vm957_vm2, %v1200_v29  ;;  %v1173_v39 = vmax.f32 %v1065_v32, 0.0 }
 0x21e   : > { %v1060_v38 = vadd.f32 %v5970_v15, %v1059_v37  ;;  %v1171_v41 = vmax.f32 %v1057_v34, 0.0 }
 0x21f   : > { %v1174_v40 = vmax.f32 %v1068_v36, 0.0 }
 0x220   : > { %v1172_v42 = vmax.f32 %v1060_v38, 0.0 }
 0x221   : > { %v1202_v43 = vpack.c.bf16 %v1174_v40, %v1173_v39 }
 0x222   : > { %v1201_v44 = vpack.c.bf16 %v1172_v42, %v1171_v41  ;;  %v5004_v45 = vpop.f32.mrb[8].mxu1 }
 0x223   : > { %v1081_v46 = vadd.f32 %v5004_v45, %v5970_v15  ;;  %v1072_v47 = vpop.f32.mrb[9].mxu1 }
 0x224   : > { %v1073_v48 = vadd.f32 %v5970_v15, %v1072_v47  ;;  %v5005_v49 = vpop.f32.mrb[10].mxu1  ;;  %5038 = vmatprep.mubr.msk.bf16.mxu0 %vm957_vm2, %v1201_v44 }
 0x225   : > { %v1084_v50 = vadd.f32 %v5005_v49, %v5970_v15  ;;  %v1075_v51 = vpop.f32.mrb[11].mxu1  ;;  %5039 = vmatmul.mubr.msk.bf16.gmra.mrb[36].mxu0 %vm957_vm2, %v1202_v43  ;;  %v1177_v53 = vmax.f32 %v1081_v46, 0.0 }
 0x226   : > { %v1076_v52 = vadd.f32 %v5970_v15, %v1075_v51  ;;  %v1175_v55 = vmax.f32 %v1073_v48, 0.0 }
 0x227   : > { %v1178_v54 = vmax.f32 %v1084_v50, 0.0 }
 0x228   : > { %v1176_v56 = vmax.f32 %v1076_v52, 0.0 }
 0x229   : > { %v1204_v57 = vpack.c.bf16 %v1178_v54, %v1177_v53 }
 0x22a   : > { %v1203_v58 = vpack.c.bf16 %v1176_v56, %v1175_v55  ;;  %v5008_v59 = vpop.f32.mrb[12].mxu1 }
 0x22b   : > { %v1097_v60 = vadd.f32 %v5008_v59, %v5970_v15  ;;  %v1088_v61 = vpop.f32.mrb[13].mxu1 }
 0x22c   : > { %v1089_v62 = vadd.f32 %v5970_v15, %v1088_v61  ;;  %v5009_v63 = vpop.f32.mrb[14].mxu1  ;;  %5042 = vmatprep.mubr.msk.bf16.mxu0 %vm957_vm2, %v1203_v58 }
 0x22d   : > { %v1181_v0 = vmax.f32 %v1097_v60, 0.0  ;;  %v1100_v1 = vadd.f32 %v5009_v63, %v5970_v15  ;;  %v1091_v2 = vpop.f32.mrb[15].mxu1  ;;  %5043 = vmatmul.mubr.msk.bf16.gmra.mrb[40].mxu0 %vm957_vm2, %v1204_v57 }
 0x22e   : > { %v1179_v3 = vmax.f32 %v1089_v62, 0.0  ;;  %v1092_v4 = vadd.f32 %v5970_v15, %v1091_v2  ;;  %v1807_v2 = vld [vmem:[#allocation3] sm:$0xff] }
 0x22f   : > { %v1182_v5 = vmax.f32 %v1100_v1, 0.0 }
 0x230   : > { %v1180_v6 = vmax.f32 %v1092_v4, 0.0  ;;  %v1815_v4 = vld [vmem:[#allocation3 + $0x40] sm:$0xff] }
 0x231   : > { %v1206_v7 = vpack.c.bf16 %v1182_v5, %v1181_v0 }
 0x232   : > { %v1205_v8 = vpack.c.bf16 %v1180_v6, %v1179_v3  ;;  %v5012_v9 = vpop.f32.mrb[16].mxu1  ;;  %v1811_v3 = vld [vmem:[#allocation3 + $0x20] sm:$0xff] }
 0x233   : > { %v1113_v10 = vadd.f32 %v5012_v9, %v5970_v15  ;;  %v1104_v11 = vpop.f32.mrb[17].mxu1  ;;  %v4672_v5 = vcombine.low %v1807_v2, %v1811_v3  ;;  %v4673_v6 = vcombine.high %v1807_v2, %v1811_v3  ;;  %v1823_v9 = vld [vmem:[#allocation3 + $0x80] sm:$0xff] }
 0x234   : > { %v1105_v12 = vadd.f32 %v5970_v15, %v1104_v11  ;;  %5046 = vmatprep.mubr.msk.bf16.mxu0 %vm957_vm2, %v1205_v8  ;;  %v5013_v13 = vpop.f32.mrb[18].mxu1 }
 0x235   : > { %v1185_v26 = vmax.f32 %v1113_v10, 0.0  ;;  %v1116_v14 = vadd.f32 %v5013_v13, %v5970_v15  ;;  %5047 = vmatmul.mubr.msk.bf16.gmra.mrb[44].mxu0 %vm957_vm2, %v1206_v7  ;;  %v1107_v16 = vpop.f32.mrb[19].mxu1  ;;  %v1819_v7 = vld [vmem:[#allocation3 + $0x60] sm:$0xff]  ;;  %5106 = vmatprep.subr.bf16.mxu1 %v4673_v6 }
 0x236   : > { %v1183_v17 = vmax.f32 %v1105_v12, 0.0  ;;  %v1108_v18 = vadd.f32 %v5970_v15, %v1107_v16  ;;  %v4681_v8 = vcombine.high %v1815_v4, %v1819_v7  ;;  %v1827_v10 = vld [vmem:[#allocation3 + $0xa0] sm:$0xff]  ;;  %2191 = vmatprep.subr.bf16.mxu0 %v4673_v6 }
 0x237   : > { %v1186_v19 = vmax.f32 %v1116_v14, 0.0  ;;  %2192 = vmatpush1.bf16.msra.mxu0 %v4672_v5  ;;  %v4689_v11 = vcombine.high %v1823_v9, %v1827_v10  ;;  %v1831_v12 = vld [vmem:[#allocation3 + $0xc0] sm:$0xff] }
 0x238   : > { %v1184_v20 = vmax.f32 %v1108_v18, 0.0  ;;  %2193 = vmatprep.subr.bf16.mxu0 %v4681_v8  ;;  %v1835_v13 = vld [vmem:[#allocation3 + $0xe0] sm:$0xff] }
 0x239   : > { %v1208_v21 = vpack.c.bf16 %v1186_v19, %v1185_v26  ;;  %v6020_v26 = vcombine.low %v1823_v9, %v1827_v10  ;;  %v6022_v14 = vcombine.high %v1831_v12, %v1835_v13  ;;  %v1839_v16 = vld [vmem:[#allocation3 + $0x100] sm:$0xff]  ;;  %v6024_v18 = vcombine.low %v1831_v12, %v1835_v13 }
 0x23a   : > { %v1207_v22 = vpack.c.bf16 %v1184_v20, %v1183_v17  ;;  %v5016_v23 = vpop.f32.mrb[20].mxu1  ;;  %v1843_v17 = vld [vmem:[#allocation3 + $0x120] sm:$0xff] }
 0x23b   : > { %v1129_v24 = vadd.f32 %v5016_v23, %v5970_v15  ;;  %v1120_v25 = vpop.f32.mrb[21].mxu1  ;;  %v6028_v19 = vcombine.high %v1839_v16, %v1843_v17  ;;  %v1847_v20 = vld [vmem:[#allocation3 + $0x140] sm:$0xff] }
 0x23c   : > { %5050 = vmatprep.mubr.msk.bf16.mxu0 %vm957_vm2, %v1207_v22  ;;  %v1121_v27 = vadd.f32 %v5970_v15, %v1120_v25  ;;  %v5017_v28 = vpop.f32.mrb[22].mxu1  ;;  %v6031_v22 = vcombine.low %v1839_v16, %v1843_v17  ;;  %v6044_v25 = vld [vmem:[%s6483_s6] ss:$0 sm:$0xff] }
 0x23d   : > { %5051 = vmatmul.mubr.msk.bf16.gmra.mrb[48].mxu0 %vm957_vm2, %v1208_v21  ;;  %v1189_v29 = vmax.f32 %v1129_v24, 0.0  ;;  %v1132_v30 = vadd.f32 %v5017_v28, %v5970_v15  ;;  %v1123_v31 = vpop.f32.mrb[23].mxu1  ;;  %v1851_v21 = vld [vmem:[#allocation3 + $0x160] sm:$0xff] }
 0x23e   : > { %v1187_v32 = vmax.f32 %v1121_v27, 0.0  ;;  %v1124_v33 = vadd.f32 %v5970_v15, %v1123_v31  ;;  %v6034_v23 = vcombine.high %v1847_v20, %v1851_v21  ;;  %v6037_v24 = vcombine.low %v1847_v20, %v1851_v21 }
 0x23f   : > { %v1190_v34 = vmax.f32 %v1132_v30, 0.0 }
 0x240   : > { %v1188_v35 = vmax.f32 %v1124_v33, 0.0 }
 0x241   : > { %v1210_v36 = vpack.c.bf16 %v1190_v34, %v1189_v29 }
 0x242   : > { %v1209_v37 = vpack.c.bf16 %v1188_v35, %v1187_v32  ;;  %v5020_v38 = vpop.f32.mrb[24].mxu1 }
 0x243   : > { %v1145_v39 = vadd.f32 %v5020_v38, %v5970_v15  ;;  %v1136_v40 = vpop.f32.mrb[25].mxu1 }
 0x244   : > { %5054 = vmatprep.mubr.msk.bf16.mxu0 %vm957_vm2, %v1209_v37  ;;  %v1137_v41 = vadd.f32 %v5970_v15, %v1136_v40  ;;  %v5021_v42 = vpop.f32.mrb[26].mxu1 }
 0x245   : > { %5055 = vmatmul.mubr.msk.bf16.gmra.mrb[52].mxu0 %vm957_vm2, %v1210_v36  ;;  %v1193_v43 = vmax.f32 %v1145_v39, 0.0  ;;  %v1148_v44 = vadd.f32 %v5021_v42, %v5970_v15  ;;  %v1139_v45 = vpop.f32.mrb[27].mxu1 }
 0x246   : > { %v1191_v46 = vmax.f32 %v1137_v41, 0.0  ;;  %v1140_v47 = vadd.f32 %v5970_v15, %v1139_v45 }
 0x247   : > { %v1194_v48 = vmax.f32 %v1148_v44, 0.0 }
 0x248   : > { %v1192_v49 = vmax.f32 %v1140_v47, 0.0 }
 0x249   : > { %v1212_v50 = vpack.c.bf16 %v1194_v48, %v1193_v43 }
 0x24a   : > { %v1211_v51 = vpack.c.bf16 %v1192_v49, %v1191_v46  ;;  %v5024_v52 = vpop.f32.mrb[28].mxu1 }
 0x24b   : > { %v1161_v53 = vadd.f32 %v5024_v52, %v5970_v15  ;;  %v1152_v54 = vpop.f32.mrb[29].mxu1 }
 0x24c   : > { %5058 = vmatprep.mubr.msk.bf16.mxu0 %vm957_vm2, %v1211_v51  ;;  %v1153_v55 = vadd.f32 %v5970_v15, %v1152_v54  ;;  %v5025_v56 = vpop.f32.mrb[30].mxu1 }
 0x24d   : > { %5059 = vmatmul.mubr.msk.bf16.gmra.mrb[56].mxu0 %vm957_vm2, %v1212_v50  ;;  %v1197_v57 = vmax.f32 %v1161_v53, 0.0  ;;  %v1164_v58 = vadd.f32 %v5025_v56, %v5970_v15  ;;  %v1155_v59 = vpop.f32.mrb[31].mxu1 }
 0x24e   : > { %v1195_v60 = vmax.f32 %v1153_v55, 0.0  ;;  %v1156_v61 = vadd.f32 %v5970_v15, %v1155_v59  ;;  %v4680_v15 = vcombine.low %v1815_v4, %v1819_v7 }
 0x24f   : > { %v1198_v62 = vmax.f32 %v1164_v58, 0.0 }
 0x250   : > { %v1196_v63 = vmax.f32 %v1156_v61, 0.0  ;;  %2194 = vmatpush1.bf16.msra.mxu0 %v4680_v15 }
 0x251   : > { %v1214_v0 = vpack.c.bf16 %v1198_v62, %v1197_v57  ;;  %2195 = vmatprep.subr.bf16.mxu0 %v4689_v11 }
 0x252   : > { %v1213_v1 = vpack.c.bf16 %v1196_v63, %v1195_v60 }
 0x254   : > { %5062 = vmatprep.mubr.msk.bf16.mxu0 %vm957_vm2, %v1213_v1  ;;  %2196 = vmatpush1.bf16.msra.mxu0 %v6020_v26 }
 0x255   : > { %5063 = vmatmul.mubr.msk.bf16.gmra.mrb[60].mxu0 %vm957_vm2, %v1214_v0  ;;  %2197 = vmatprep.subr.bf16.mxu0 %v6022_v14 }
 0x258   : > { %2198 = vmatpush1.bf16.msra.mxu0 %v6024_v18 }
 0x259   : > { %2199 = vmatprep.subr.bf16.mxu0 %v6028_v19 }
 0x25c   : > { %2200 = vmatpush1.bf16.msra.mxu0 %v6031_v22 }
 0x25d   : > { %2201 = vmatprep.subr.bf16.mxu0 %v6034_v23 }
 0x260   : > { %2202 = vmatpush1.bf16.msra.mxu0 %v6037_v24 }
 0x2f0   : > { %v5036_v27 = vpop.f32.mrb[32].mxu0 }
 0x2f1   : > { %v1345_v28 = vadd.f32 %v5036_v27, %v6044_v25  ;;  %v1336_v29 = vpop.f32.mrb[33].mxu0 }
 0x2f2   : > { %v1337_v30 = vadd.f32 %v6044_v25, %v1336_v29  ;;  %v5037_v31 = vpop.f32.mrb[34].mxu0 }
 0x2f3   : > { %v1348_v32 = vadd.f32 %v5037_v31, %v6044_v25  ;;  %v1339_v33 = vpop.f32.mrb[35].mxu0  ;;  %v1465_v35 = vmax.f32 %v1345_v28, 0.0 }
 0x2f4   : > { %v1340_v34 = vadd.f32 %v6044_v25, %v1339_v33  ;;  %v1463_v37 = vmax.f32 %v1337_v30, 0.0 }
 0x2f5   : > { %v1466_v36 = vmax.f32 %v1348_v32, 0.0 }
 0x2f6   : > { %v1464_v38 = vmax.f32 %v1340_v34, 0.0 }
 0x2f7   : > { %v1496_v39 = vpack.c.bf16 %v1466_v36, %v1465_v35 }
 0x2f8   : > { %v1495_v40 = vpack.c.bf16 %v1464_v38, %v1463_v37  ;;  %v5040_v41 = vpop.f32.mrb[36].mxu0 }
 0x2f9   : > { %v1361_v42 = vadd.f32 %v5040_v41, %v6044_v25  ;;  %v1352_v43 = vpop.f32.mrb[37].mxu0 }
 0x2fa   : > { %v1353_v44 = vadd.f32 %v6044_v25, %v1352_v43  ;;  %v5041_v45 = vpop.f32.mrb[38].mxu0  ;;  %5074 = vmatprep.mubr.msk.bf16.mxu1 %vm957_vm2, %v1495_v40 }
 0x2fb   : > { %v1364_v46 = vadd.f32 %v5041_v45, %v6044_v25  ;;  %v1355_v47 = vpop.f32.mrb[39].mxu0  ;;  %5075 = vmatmul.mubr.msk.bf16.vlgmr.msra.gmra.mrb[32].mxu1 %vm957_vm2, %v1496_v39  ;;  %v1469_v49 = vmax.f32 %v1361_v42, 0.0 }
 0x2fc   : > { %v1356_v48 = vadd.f32 %v6044_v25, %v1355_v47  ;;  %5114 = vmatpush1.bf16.msra.mxu1 %v4672_v5  ;;  %v1467_v51 = vmax.f32 %v1353_v44, 0.0 }
 0x2fd   : > { %v1470_v50 = vmax.f32 %v1364_v46, 0.0  ;;  %5107 = vmatprep.subr.bf16.mxu1 %v4681_v8 }
 0x2fe   : > { %v1468_v52 = vmax.f32 %v1356_v48, 0.0 }
 0x2ff   : > { %v1498_v53 = vpack.c.bf16 %v1470_v50, %v1469_v49 }
 0x300   : > { %v1497_v54 = vpack.c.bf16 %v1468_v52, %v1467_v51  ;;  %v5044_v55 = vpop.f32.mrb[40].mxu0  ;;  %5115 = vmatpush1.bf16.msra.mxu1 %v4680_v15 }
 0x301   : > { %v1377_v56 = vadd.f32 %v5044_v55, %v6044_v25  ;;  %v1368_v57 = vpop.f32.mrb[41].mxu0  ;;  %5108 = vmatprep.subr.bf16.mxu1 %v4689_v11 }
 0x302   : > { %v1369_v58 = vadd.f32 %v6044_v25, %v1368_v57  ;;  %v5045_v59 = vpop.f32.mrb[42].mxu0  ;;  %5078 = vmatprep.mubr.msk.bf16.mxu1 %vm957_vm2, %v1497_v54 }
 0x303   : > { %v1380_v60 = vadd.f32 %v5045_v59, %v6044_v25  ;;  %v1371_v61 = vpop.f32.mrb[43].mxu0  ;;  %5079 = vmatmul.mubr.msk.bf16.gmra.mrb[36].mxu1 %vm957_vm2, %v1498_v53  ;;  %v1473_v63 = vmax.f32 %v1377_v56, 0.0 }
 0x304   : > { %v1372_v62 = vadd.f32 %v6044_v25, %v1371_v61  ;;  %5116 = vmatpush1.bf16.msra.mxu1 %v6020_v26  ;;  %v1471_v1 = vmax.f32 %v1369_v58, 0.0 }
 0x305   : > { %v1474_v0 = vmax.f32 %v1380_v60, 0.0  ;;  %5109 = vmatprep.subr.bf16.mxu1 %v6022_v14 }
 0x306   : > { %v1472_v2 = vmax.f32 %v1372_v62, 0.0 }
 0x307   : > { %v1500_v3 = vpack.c.bf16 %v1474_v0, %v1473_v63 }
 0x308   : > { %v1499_v4 = vpack.c.bf16 %v1472_v2, %v1471_v1  ;;  %v5048_v5 = vpop.f32.mrb[44].mxu0  ;;  %5117 = vmatpush1.bf16.msra.mxu1 %v6024_v18 }
 0x309   : > { %v1393_v6 = vadd.f32 %v5048_v5, %v6044_v25  ;;  %v1384_v7 = vpop.f32.mrb[45].mxu0  ;;  %5110 = vmatprep.subr.bf16.mxu1 %v6028_v19 }
 0x30a   : > { %v1385_v8 = vadd.f32 %v6044_v25, %v1384_v7  ;;  %v5049_v9 = vpop.f32.mrb[46].mxu0  ;;  %5082 = vmatprep.mubr.msk.bf16.mxu1 %vm957_vm2, %v1499_v4 }
 0x30b   : > { %v1396_v10 = vadd.f32 %v5049_v9, %v6044_v25  ;;  %v1387_v15 = vpop.f32.mrb[47].mxu0  ;;  %5083 = vmatmul.mubr.msk.bf16.gmra.mrb[40].mxu1 %vm957_vm2, %v1500_v3  ;;  %v1477_v12 = vmax.f32 %v1393_v6, 0.0 }
 0x30c   : > { %v1388_v11 = vadd.f32 %v6044_v25, %v1387_v15  ;;  %5118 = vmatpush1.bf16.msra.mxu1 %v6031_v22  ;;  %v1475_v26 = vmax.f32 %v1385_v8, 0.0 }
 0x30d   : > { %v1478_v13 = vmax.f32 %v1396_v10, 0.0  ;;  %5111 = vmatprep.subr.bf16.mxu1 %v6034_v23 }
 0x30e   : > { %v1476_v14 = vmax.f32 %v1388_v11, 0.0  ;;  %v1855_v11 = vld [vmem:[#allocation3 + $0x180] sm:$0xff] }
 0x30f   : > { %v1502_v16 = vpack.c.bf16 %v1478_v13, %v1477_v12  ;;  %v1859_v12 = vld [vmem:[#allocation3 + $0x1a0] sm:$0xff] }
 0x310   : > { %v1501_v17 = vpack.c.bf16 %v1476_v14, %v1475_v26  ;;  %v5052_v18 = vpop.f32.mrb[48].mxu0  ;;  %5119 = vmatpush1.bf16.msra.mxu1 %v6037_v24  ;;  %v4721_v13 = vcombine.high %v1855_v11, %v1859_v12  ;;  %v4720_v26 = vcombine.low %v1855_v11, %v1859_v12  ;;  %v1863_v14 = vld [vmem:[#allocation3 + $0x1c0] sm:$0xff] }
 0x311   : > { %v1409_v19 = vadd.f32 %v5052_v18, %v6044_v25  ;;  %v1400_v20 = vpop.f32.mrb[49].mxu0  ;;  %v1809_v18 = vld [vmem:[#allocation3 + $0x10] sm:$0xff] }
 0x312   : > { %v1401_v21 = vadd.f32 %v6044_v25, %v1400_v20  ;;  %5086 = vmatprep.mubr.msk.bf16.mxu1 %vm957_vm2, %v1501_v17  ;;  %v5053_v27 = vpop.f32.mrb[50].mxu0  ;;  %2203 = vmatprep.subr.bf16.mxu0 %v4721_v13 }
 0x313   : > { %v1481_v22 = vmax.f32 %v1409_v19, 0.0  ;;  %v1412_v28 = vadd.f32 %v5053_v27, %v6044_v25  ;;  %5087 = vmatmul.mubr.msk.bf16.gmra.mrb[44].mxu1 %vm957_vm2, %v1502_v16  ;;  %v1403_v23 = vpop.f32.mrb[51].mxu0  ;;  %5112 = vmatprep.subr.bf16.mxu1 %v4721_v13  ;;  %v1867_v16 = vld [vmem:[#allocation3 + $0x1e0] sm:$0xff]  ;;  %v1813_v19 = vld [vmem:[#allocation3 + $0x30] sm:$0xff] }
 0x314   : > { %v1479_v29 = vmax.f32 %v1401_v21, 0.0  ;;  %v1404_v30 = vadd.f32 %v6044_v25, %v1403_v23  ;;  %2204 = vmatpush1.bf16.msra.mxu0 %v4720_v26  ;;  %5120 = vmatpush1.bf16.msra.mxu1 %v4720_v26  ;;  %v4729_v17 = vcombine.high %v1863_v14, %v1867_v16  ;;  %v4677_v20 = vcombine.high %v1809_v18, %v1813_v19 }
 0x315   : > { %v1482_v31 = vmax.f32 %v1412_v28, 0.0  ;;  %v5627_v21 = vmov 0   ;;  %v4676_v27 = vcombine.low %v1809_v18, %v1813_v19  ;;  %v6105_v28 = vld [vmem:[#allocation3 + $0x28] sm:$0xff]  ;;  %v1853_v18 = vld [vmem:[#allocation3 + $0x170] sm:$0xff] }
 0x316   : > { %v1480_v32 = vmax.f32 %v1404_v30, 0.0  ;;  %2205 = vmatprep.subr.bf16.mxu0 %v4729_v17  ;;  %5113 = vmatprep.subr.bf16.mxu1 %v4729_v17  ;;  %v6114_v30 = vld [vmem:[%s6485_s8] ss:$0 sm:$0xff] }
 0x317   : > { %v1504_v24 = vpack.c.bf16 %v1482_v31, %v1481_v22  ;;  %2223 = vmatprep.mubr.bf16.mxu0 %v5627_v21  ;;  %v6103_v22 = vld [vmem:[#allocation3 + $0x8] sm:$0xff] }
 0x318   : > { %v1503_v33 = vpack.c.bf16 %v1480_v32, %v1479_v29  ;;  %v5056_v34 = vpop.f32.mrb[52].mxu0  ;;  %v4674_v23 = vcombine.low %v6103_v22, %v6105_v28  ;;  %v4675_v29 = vcombine.high %v6103_v22, %v6105_v28 }
 0x319   : > { %v1425_v35 = vadd.f32 %v5056_v34, %v6044_v25  ;;  %v1416_v36 = vpop.f32.mrb[53].mxu0 }
 0x31a   : > { %5090 = vmatprep.mubr.msk.bf16.mxu1 %vm957_vm2, %v1503_v33  ;;  %v1417_v37 = vadd.f32 %v6044_v25, %v1416_v36  ;;  %v5057_v38 = vpop.f32.mrb[54].mxu0 }
 0x31b   : > { %5091 = vmatmul.mubr.msk.bf16.gmra.mrb[48].mxu1 %vm957_vm2, %v1504_v24  ;;  %v1485_v39 = vmax.f32 %v1425_v35, 0.0  ;;  %v1428_v40 = vadd.f32 %v5057_v38, %v6044_v25  ;;  %v1419_v41 = vpop.f32.mrb[55].mxu0 }
 0x31c   : > { %v1483_v42 = vmax.f32 %v1417_v37, 0.0  ;;  %v1420_v43 = vadd.f32 %v6044_v25, %v1419_v41  ;;  %v1821_v41 = vld [vmem:[#allocation3 + $0x70] sm:$0xff] }
 0x31d   : > { %v1486_v44 = vmax.f32 %v1428_v40, 0.0  ;;  %v1817_v40 = vld [vmem:[#allocation3 + $0x50] sm:$0xff] }
 0x31e   : > { %v1484_v45 = vmax.f32 %v1420_v43, 0.0 }
 0x31f   : > { %v1506_v46 = vpack.c.bf16 %v1486_v44, %v1485_v39 }
 0x320   : > { %v1505_v47 = vpack.c.bf16 %v1484_v45, %v1483_v42  ;;  %v5060_v48 = vpop.f32.mrb[56].mxu0 }
 0x321   : > { %v1441_v49 = vadd.f32 %v5060_v48, %v6044_v25  ;;  %v1432_v50 = vpop.f32.mrb[57].mxu0 }
 0x322   : > { %5094 = vmatprep.mubr.msk.bf16.mxu1 %vm957_vm2, %v1505_v47  ;;  %v1433_v51 = vadd.f32 %v6044_v25, %v1432_v50  ;;  %v5061_v52 = vpop.f32.mrb[58].mxu0  ;;  %v4685_v47 = vcombine.high %v1817_v40, %v1821_v41  ;;  %v1825_v50 = vld [vmem:[#allocation3 + $0x90] sm:$0xff] }
 0x323   : > { %5095 = vmatmul.mubr.msk.bf16.gmra.mrb[52].mxu1 %vm957_vm2, %v1506_v46  ;;  %v1489_v53 = vmax.f32 %v1441_v49, 0.0  ;;  %v1444_v54 = vadd.f32 %v5061_v52, %v6044_v25  ;;  %v1435_v55 = vpop.f32.mrb[59].mxu0 }
 0x324   : > { %v1487_v56 = vmax.f32 %v1433_v51, 0.0  ;;  %v1436_v57 = vadd.f32 %v6044_v25, %v1435_v55  ;;  %v1829_v51 = vld [vmem:[#allocation3 + $0xb0] sm:$0xff] }
 0x325   : > { %v1490_v58 = vmax.f32 %v1444_v54, 0.0 }
 0x326   : > { %v1488_v59 = vmax.f32 %v1436_v57, 0.0 }
 0x327   : > { %v1508_v60 = vpack.c.bf16 %v1490_v58, %v1489_v53  ;;  %v4693_v58 = vcombine.high %v1825_v50, %v1829_v51 }
 0x328   : > { %v1507_v61 = vpack.c.bf16 %v1488_v59, %v1487_v56  ;;  %v5064_v62 = vpop.f32.mrb[60].mxu0  ;;  %v4684_v56 = vcombine.low %v1817_v40, %v1821_v41  ;;  %v1824_v40 = vld [vmem:[#allocation3 + $0x88] sm:$0xff] }
 0x329   : > { %v1457_v63 = vadd.f32 %v5064_v62, %v6044_v25  ;;  %v1448_v0 = vpop.f32.mrb[61].mxu0  ;;  %v1837_v62 = vld [vmem:[#allocation3 + $0xf0] sm:$0xff]  ;;  %v1828_v41 = vld [vmem:[#allocation3 + $0xa8] sm:$0xff] }
 0x32a   : > { %5098 = vmatprep.mubr.msk.bf16.mxu1 %vm957_vm2, %v1507_v61  ;;  %v1449_v1 = vadd.f32 %v6044_v25, %v1448_v0  ;;  %v5065_v2 = vpop.f32.mrb[62].mxu0  ;;  %v1833_v61 = vld [vmem:[#allocation3 + $0xd0] sm:$0xff] }
 0x32b   : > { %5099 = vmatmul.mubr.msk.bf16.gmra.mrb[56].mxu1 %vm957_vm2, %v1508_v60  ;;  %v1493_v3 = vmax.f32 %v1457_v63, 0.0  ;;  %v1460_v4 = vadd.f32 %v5065_v2, %v6044_v25  ;;  %v1451_v5 = vpop.f32.mrb[63].mxu0  ;;  %v4692_v2 = vcombine.low %v1825_v50, %v1829_v51  ;;  %v4700_v13 = vcombine.low %v1833_v61, %v1837_v62 }
 0x32c   : > { %v1491_v6 = vmax.f32 %v1449_v1, 0.0  ;;  %v1452_v7 = vadd.f32 %v6044_v25, %v1451_v5  ;;  %v4728_v25 = vcombine.low %v1863_v14, %v1867_v16  ;;  %v4701_v5 = vcombine.high %v1833_v61, %v1837_v62 }
 0x32d   : > { %v1494_v8 = vmax.f32 %v1460_v4, 0.0 }
 0x32e   : > { %v1492_v9 = vmax.f32 %v1452_v7, 0.0  ;;  %2206 = vmatpush1.bf16.msra.mxu0 %v4728_v25  ;;  %5121 = vmatpush1.bf16.msra.mxu1 %v4728_v25  ;;  %v1849_v25 = vld [vmem:[#allocation3 + $0x150] sm:$0xff] }
 0x32f   : > { %v1510_v10 = vpack.c.bf16 %v1494_v8, %v1493_v3  ;;  %2577 = vmatprep.subr.bf16.mxu0 %v4677_v20  ;;  %2384 = vmatprep.subr.bf16.mxu1 %v4675_v29  ;;  %v1841_v8 = vld [vmem:[#allocation3 + $0x110] sm:$0xff]  ;;  %v1820_v29 = vld [vmem:[#allocation3 + $0x68] sm:$0xff] }
 0x330   : > { %v1509_v15 = vpack.c.bf16 %v1492_v9, %v1491_v6  ;;  %v1845_v9 = vld [vmem:[#allocation3 + $0x130] sm:$0xff] }
 0x331   : > { %v4709_v14 = vcombine.high %v1841_v8, %v1845_v9 }
 0x332   : > { %5102 = vmatprep.mubr.msk.bf16.mxu1 %vm957_vm2, %v1509_v15 }
 0x333   : > { %5103 = vmatmul.mubr.msk.bf16.gmra.mrb[60].mxu1 %vm957_vm2, %v1510_v10 }
 0x334   : > { %2263 = vmatprep.mubr.bf16.mxu1 %v5627_v21 }
 0x3ce   : > { %v5076_v31 = vpop.f32.mrb[32].mxu1 }
 0x3cf   : > { %v1641_v32 = vadd.f32 %v5076_v31, %v6114_v30  ;;  %v1632_v24 = vpop.f32.mrb[33].mxu1 }
 0x3d0   : > { %v1633_v33 = vadd.f32 %v6114_v30, %v1632_v24  ;;  %v5077_v34 = vpop.f32.mrb[34].mxu1 }
 0x3d1   : > { %v1644_v35 = vadd.f32 %v5077_v34, %v6114_v30  ;;  %v1635_v36 = vpop.f32.mrb[35].mxu1  ;;  %v1761_v38 = vmax.f32 %v1641_v32, 0.0  ;;  %v4708_v32 = vcombine.low %v1841_v8, %v1845_v9  ;;  %v4717_v34 = vcombine.high %v1849_v25, %v1853_v18 }
 0x3d2   : > { %v1636_v37 = vadd.f32 %v6114_v30, %v1635_v36  ;;  %v1759_v42 = vmax.f32 %v1633_v33, 0.0 }
 0x3d3   : > { %v1762_v39 = vmax.f32 %v1644_v35, 0.0  ;;  %v1857_v35 = vld [vmem:[#allocation3 + $0x190] sm:$0xff] }
 0x3d4   : > { %v1760_v43 = vmax.f32 %v1636_v37, 0.0 }
 0x3d5   : > { %v6120_v44 = vpack.c.bf16 %v1762_v39, %v1761_v38  ;;  %v1861_v38 = vld [vmem:[#allocation3 + $0x1b0] sm:$0xff] }
 0x3d6   : > { %v6122_v45 = vpack.c.bf16 %v1760_v43, %v1759_v42  ;;  %v5080_v46 = vpop.f32.mrb[36].mxu1  ;;  %v4725_v51 = vcombine.high %v1857_v35, %v1861_v38 }
 0x3d7   : > { %v1657_v48 = vadd.f32 %v5080_v46, %v6114_v30  ;;  %v1648_v49 = vpop.f32.mrb[37].mxu1 }
 0x3d8   : > { %v1649_v52 = vadd.f32 %v6114_v30, %v1648_v49  ;;  %v5081_v53 = vpop.f32.mrb[38].mxu1  ;;  %2224 = vmatmul.mubr.bf16.vlgmr.msra.gmra.mrb[64].mxu0 %v6122_v45 }
 0x3d9   : > { %v1660_v54 = vadd.f32 %v5081_v53, %v6114_v30  ;;  %v1651_v55 = vpop.f32.mrb[39].mxu1  ;;  %2578 = vmatpush1.bf16.msra.mxu0 %v4676_v27  ;;  %2233 = vmatprep.mubr.bf16.mxu0 %v5627_v21  ;;  %v1765_v59 = vmax.f32 %v1657_v48, 0.0  ;;  %v1816_v27 = vld [vmem:[#allocation3 + $0x48] sm:$0xff]  ;;  %v4716_v48 = vcombine.low %v1849_v25, %v1853_v18 }
 0x3da   : > { %v1652_v57 = vadd.f32 %v6114_v30, %v1651_v55  ;;  %2579 = vmatprep.subr.bf16.mxu0 %v4685_v47  ;;  %v1763_v63 = vmax.f32 %v1649_v52, 0.0  ;;  %v4683_v39 = vcombine.high %v1816_v27, %v1820_v29  ;;  %v4682_v49 = vcombine.low %v1816_v27, %v1820_v29  ;;  %v1865_v55 = vld [vmem:[#allocation3 + $0x1d0] sm:$0xff]  ;;  %v1848_v25 = vld [vmem:[#allocation3 + $0x148] sm:$0xff] }
 0x3db   : > { %v1766_v60 = vmax.f32 %v1660_v54, 0.0  ;;  %v4691_v52 = vcombine.high %v1824_v40, %v1828_v41  ;;  %v1852_v18 = vld [vmem:[#allocation3 + $0x168] sm:$0xff] }
 0x3dc   : > { %v1764_v0 = vmax.f32 %v1652_v57, 0.0  ;;  %v4724_v57 = vcombine.low %v1857_v35, %v1861_v38 }
 0x3dd   : > { %v6130_v1 = vpack.c.bf16 %v1766_v60, %v1765_v59  ;;  %2580 = vmatpush1.bf16.msra.mxu0 %v4684_v56  ;;  %v1869_v56 = vld [vmem:[#allocation3 + $0x1f0] sm:$0xff]  ;;  %v1836_v59 = vld [vmem:[#allocation3 + $0xe8] sm:$0xff] }
 0x3de   : > { %v6132_v3 = vpack.c.bf16 %v1764_v0, %v1763_v63  ;;  %v5084_v4 = vpop.f32.mrb[40].mxu1  ;;  %2581 = vmatprep.subr.bf16.mxu0 %v4693_v58  ;;  %v1832_v58 = vld [vmem:[#allocation3 + $0xc8] sm:$0xff]  ;;  %v4733_v62 = vcombine.high %v1865_v55, %v1869_v56 }
 0x3df   : > { %v1673_v6 = vadd.f32 %v5084_v4, %v6114_v30  ;;  %v1664_v7 = vpop.f32.mrb[41].mxu1 }
 0x3e0   : > { %v1665_v10 = vadd.f32 %v6114_v30, %v1664_v7  ;;  %v5085_v15 = vpop.f32.mrb[42].mxu1  ;;  %2234 = vmatmul.mubr.bf16.gmra.mrb[68].mxu0 %v6120_v44 }
 0x3e1   : > { %v1676_v11 = vadd.f32 %v5085_v15, %v6114_v30  ;;  %v1667_v12 = vpop.f32.mrb[43].mxu1  ;;  %2582 = vmatpush1.bf16.msra.mxu0 %v4692_v2  ;;  %2243 = vmatprep.mubr.bf16.mxu0 %v5627_v21  ;;  %v1769_v16 = vmax.f32 %v1673_v6, 0.0  ;;  %v4690_v2 = vcombine.low %v1824_v40, %v1828_v41  ;;  %v4699_v6 = vcombine.high %v1832_v58, %v1836_v59 }
 0x3e2   : > { %v1668_v26 = vadd.f32 %v6114_v30, %v1667_v12  ;;  %2583 = vmatprep.subr.bf16.mxu0 %v4701_v5  ;;  %v1767_v19 = vmax.f32 %v1665_v10, 0.0  ;;  %v4732_v10 = vcombine.low %v1865_v55, %v1869_v56 }
 0x3e3   : > { %v1770_v17 = vmax.f32 %v1676_v11, 0.0 }
 0x3e4   : > { %v1768_v20 = vmax.f32 %v1668_v26, 0.0  ;;  %v1840_v26 = vld [vmem:[#allocation3 + $0x108] sm:$0xff] }
 0x3e5   : > { %v6140_v31 = vpack.c.bf16 %v1770_v17, %v1769_v16  ;;  %2584 = vmatpush1.bf16.msra.mxu0 %v4700_v13  ;;  %v4698_v13 = vcombine.low %v1832_v58, %v1836_v59 }
 0x3e6   : > { %v6142_v24 = vpack.c.bf16 %v1768_v20, %v1767_v19  ;;  %v5088_v33 = vpop.f32.mrb[44].mxu1  ;;  %2585 = vmatprep.subr.bf16.mxu0 %v4709_v14  ;;  %v1844_v14 = vld [vmem:[#allocation3 + $0x128] sm:$0xff] }
 0x3e7   : > { %v1689_v36 = vadd.f32 %v5088_v33, %v6114_v30  ;;  %v1680_v37 = vpop.f32.mrb[45].mxu1  ;;  %v4707_v27 = vcombine.high %v1840_v26, %v1844_v14  ;;  %v4706_v33 = vcombine.low %v1840_v26, %v1844_v14 }
 0x3e8   : > { %v1681_v42 = vadd.f32 %v6114_v30, %v1680_v37  ;;  %v5089_v43 = vpop.f32.mrb[46].mxu1  ;;  %2244 = vmatmul.mubr.bf16.gmra.mrb[72].mxu0 %v6132_v3  ;;  %2264 = vmatmul.mubr.bf16.vlgmr.msra.gmra.mrb[64].mxu1 %v6142_v24 }
 0x3e9   : > { %v1692_v46 = vadd.f32 %v5089_v43, %v6114_v30  ;;  %2385 = vmatpush1.bf16.msra.mxu1 %v4674_v23  ;;  %v1683_v47 = vpop.f32.mrb[47].mxu1  ;;  %2586 = vmatpush1.bf16.msra.mxu0 %v4708_v32  ;;  %v1773_v53 = vmax.f32 %v1689_v36, 0.0  ;;  %v4715_v36 = vcombine.high %v1848_v25, %v1852_v18  ;;  %v4714_v43 = vcombine.low %v1848_v25, %v1852_v18 }
 0x3ea   : > { %v1684_v50 = vadd.f32 %v6114_v30, %v1683_v47  ;;  %2587 = vmatprep.subr.bf16.mxu0 %v4717_v34  ;;  %2253 = vmatprep.mubr.bf16.mxu0 %v5627_v21  ;;  %v1771_v22 = vmax.f32 %v1681_v42, 0.0  ;;  %v1860_v47 = vld [vmem:[#allocation3 + $0x1a8] sm:$0xff] }
 0x3eb   : > { %v1774_v54 = vmax.f32 %v1692_v46, 0.0  ;;  %2273 = vmatprep.mubr.bf16.mxu1 %v5627_v21  ;;  %2386 = vmatprep.subr.bf16.mxu1 %v4683_v39  ;;  %v1856_v46 = vld [vmem:[#allocation3 + $0x188] sm:$0xff] }
 0x3ec   : > { %v1772_v28 = vmax.f32 %v1684_v50, 0.0  ;;  %v1864_v50 = vld [vmem:[#allocation3 + $0x1c8] sm:$0xff] }
 0x3ed   : > { %v6155_v23 = vpack.c.bf16 %v1774_v54, %v1773_v53  ;;  %2588 = vmatpush1.bf16.msra.mxu0 %v4716_v48  ;;  %2387 = vmatpush1.bf16.msra.mxu1 %v4682_v49  ;;  %v4723_v54 = vcombine.high %v1856_v46, %v1860_v47 }
 0x3ee   : > { %v6157_v60 = vpack.c.bf16 %v1772_v28, %v1771_v22  ;;  %v5092_v61 = vpop.f32.mrb[48].mxu1  ;;  %2589 = vmatprep.subr.bf16.mxu0 %v4725_v51  ;;  %2388 = vmatprep.subr.bf16.mxu1 %v4691_v52  ;;  %v1868_v51 = vld [vmem:[#allocation3 + $0x1e8] sm:$0xff]  ;;  %v4722_v22 = vcombine.low %v1856_v46, %v1860_v47  ;;  %v1842_v47 = vld [vmem:[#allocation3 + $0x118] sm:$0xff] }
 0x3ef   : > { %v1705_v63 = vadd.f32 %v5092_v61, %v6114_v30  ;;  %v1696_v0 = vpop.f32.mrb[49].mxu1  ;;  %v4731_v58 = vcombine.high %v1864_v50, %v1868_v51 }
 0x3f0   : > { %v1697_v4 = vadd.f32 %v6114_v30, %v1696_v0  ;;  %2254 = vmatmul.mubr.bf16.gmra.mrb[76].mxu0 %v6130_v1  ;;  %2274 = vmatmul.mubr.bf16.gmra.mrb[68].mxu1 %v6140_v31  ;;  %v5093_v5 = vpop.f32.mrb[50].mxu1 }
 0x3f1   : > { %v1777_v7 = vmax.f32 %v1705_v63, 0.0  ;;  %v1708_v8 = vadd.f32 %v5093_v5, %v6114_v30  ;;  %2590 = vmatpush1.bf16.msra.mxu0 %v4724_v57  ;;  %v1699_v9 = vpop.f32.mrb[51].mxu1  ;;  %2283 = vmatprep.mubr.bf16.mxu1 %v5627_v21  ;;  %v6191_v5 = vld [vmem:[#allocation3 + $0x18] sm:$0xff] }
 0x3f2   : > { %v1775_v15 = vmax.f32 %v1697_v4, 0.0  ;;  %v1700_v11 = vadd.f32 %v6114_v30, %v1699_v9  ;;  %2591 = vmatprep.subr.bf16.mxu0 %v4733_v62  ;;  %2609 = vmatprep.mubr.bf16.mxu0 %v5627_v21  ;;  %v4730_v4 = vcombine.low %v1864_v50, %v1868_v51 }
 0x3f3   : > { %v1778_v12 = vmax.f32 %v1708_v8, 0.0  ;;  %2389 = vmatpush1.bf16.msra.mxu1 %v4690_v2 }
 0x3f4   : > { %v1776_v16 = vmax.f32 %v1700_v11, 0.0  ;;  %2390 = vmatprep.subr.bf16.mxu1 %v4699_v6  ;;  %v1814_v6 = vld [vmem:[#allocation3 + $0x38] sm:$0xff] }
 0x3f5   : > { %v6167_v17 = vpack.c.bf16 %v1778_v12, %v1777_v7  ;;  %2592 = vmatpush1.bf16.msra.mxu0 %v4732_v10 }
 0x3f6   : > { %v6169_v19 = vpack.c.bf16 %v1776_v16, %v1775_v15  ;;  %v5096_v20 = vpop.f32.mrb[52].mxu1  ;;  %v4679_v15 = vcombine.high %v6191_v5, %v1814_v6 }
 0x3f7   : > { %v1721_v29 = vadd.f32 %v5096_v20, %v6114_v30  ;;  %v1712_v32 = vpop.f32.mrb[53].mxu1  ;;  %2391 = vmatpush1.bf16.msra.mxu1 %v4698_v13 }
 0x3f8   : > { %2284 = vmatmul.mubr.bf16.gmra.mrb[72].mxu1 %v6157_v60  ;;  %2610 = vmatmul.mubr.bf16.vlgmr.msra.gmra.mrb[80].mxu0 %v6122_v45  ;;  %v1713_v34 = vadd.f32 %v6114_v30, %v1712_v32  ;;  %v5097_v35 = vpop.f32.mrb[54].mxu1 }
 0x3f9   : > { %v1781_v37 = vmax.f32 %v1721_v29, 0.0  ;;  %2293 = vmatprep.mubr.bf16.mxu1 %v5627_v21  ;;  %2619 = vmatprep.mubr.bf16.mxu0 %v5627_v21  ;;  %v1724_v38 = vadd.f32 %v5097_v35, %v6114_v30  ;;  %v1715_v39 = vpop.f32.mrb[55].mxu1  ;;  %v4678_v35 = vcombine.low %v6191_v5, %v1814_v6  ;;  %v5257_v5 = vld [vmem:[#allocation6 + $0x14] ss:$8 sps:$4 sm:$0xff]   ;;  %v5255_v6 = vld [vmem:[#allocation6 + $0x10] ss:$8 sps:$4 sm:$0xff]  }
 0x3fa   : > { %v1779_v40 = vmax.f32 %v1713_v34, 0.0  ;;  %v1716_v41 = vadd.f32 %v6114_v30, %v1715_v39  ;;  %2392 = vmatprep.subr.bf16.mxu1 %v4707_v27  ;;  %v1822_v34 = vld [vmem:[#allocation3 + $0x78] sm:$0xff] }
 0x3fb   : > { %v1782_v42 = vmax.f32 %v1724_v38, 0.0  ;;  %2393 = vmatpush1.bf16.msra.mxu1 %v4706_v33  ;;  %v1830_v38 = vld [vmem:[#allocation3 + $0xb8] sm:$0xff] }
 0x3fc   : > { %v1780_v48 = vmax.f32 %v1716_v41, 0.0  ;;  %2394 = vmatprep.subr.bf16.mxu1 %v4715_v36  ;;  %v1834_v41 = vld [vmem:[#allocation3 + $0xd8] sm:$0xff] }
 0x3fd   : > { %v6179_v49 = vpack.c.bf16 %v1782_v42, %v1781_v37  ;;  %v1826_v37 = vld [vmem:[#allocation3 + $0x98] sm:$0xff] }
 0x3fe   : > { %v6181_v52 = vpack.c.bf16 %v1780_v48, %v1779_v40  ;;  %v5100_v53 = vpop.f32.mrb[56].mxu1  ;;  %v4695_v40 = vcombine.high %v1826_v37, %v1830_v38  ;;  %v1838_v42 = vld [vmem:[#allocation3 + $0xf8] sm:$0xff] }
 0x3ff   : > { %v1737_v55 = vadd.f32 %v5100_v53, %v6114_v30  ;;  %v1728_v56 = vpop.f32.mrb[57].mxu1  ;;  %2395 = vmatpush1.bf16.msra.mxu1 %v4714_v43  ;;  %v4694_v43 = vcombine.low %v1826_v37, %v1830_v38  ;;  %v4703_v46 = vcombine.high %v1834_v41, %v1838_v42  ;;  %v1846_v48 = vld [vmem:[#allocation3 + $0x138] sm:$0xff]  ;;  %v4702_v50 = vcombine.low %v1834_v41, %v1838_v42 }
 0x400   : > { %2294 = vmatmul.mubr.bf16.gmra.mrb[76].mxu1 %v6155_v23  ;;  %2620 = vmatmul.mubr.bf16.gmra.mrb[84].mxu0 %v6120_v44  ;;  %v1729_v28 = vadd.f32 %v6114_v30, %v1728_v56  ;;  %v5101_v57 = vpop.f32.mrb[58].mxu1  ;;  %v4711_v51 = vcombine.high %v1842_v47, %v1846_v48  ;;  %v1850_v53 = vld [vmem:[#allocation3 + $0x158] sm:$0xff] }
 0x401   : > { %2303 = vmatprep.mubr.bf16.mxu1 %v5627_v21  ;;  %2629 = vmatprep.mubr.bf16.mxu0 %v5627_v21  ;;  %v1785_v59 = vmax.f32 %v1737_v55, 0.0  ;;  %v1740_v61 = vadd.f32 %v5101_v57, %v6114_v30  ;;  %v1731_v62 = vpop.f32.mrb[59].mxu1  ;;  %v4710_v55 = vcombine.low %v1842_v47, %v1846_v48  ;;  %v5287_v37 = vld [vmem:[#allocation6 + $0xb4] ss:$8 sps:$4 sm:$0xff]   ;;  %v5285_v38 = vld [vmem:[#allocation6 + $0xb0] ss:$8 sps:$4 sm:$0xff]  }
 0x402   : > { %v1783_v63 = vmax.f32 %v1729_v28, 0.0  ;;  %v1732_v0 = vadd.f32 %v6114_v30, %v1731_v62  ;;  %2396 = vmatprep.subr.bf16.mxu1 %v4723_v54  ;;  %v1854_v54 = vld [vmem:[#allocation3 + $0x178] sm:$0xff] }
 0x403   : > { %v1786_v2 = vmax.f32 %v1740_v61, 0.0  ;;  %2397 = vmatpush1.bf16.msra.mxu1 %v4722_v22  ;;  %v4719_v56 = vcombine.high %v1850_v53, %v1854_v54  ;;  %v1858_v22 = vld [vmem:[#allocation3 + $0x198] sm:$0xff]  ;;  %v4718_v57 = vcombine.low %v1850_v53, %v1854_v54 }
 0x404   : > { %v1784_v7 = vmax.f32 %v1732_v0, 0.0  ;;  %2398 = vmatprep.subr.bf16.mxu1 %v4731_v58  ;;  %v1862_v28 = vld [vmem:[#allocation3 + $0x1b8] sm:$0xff] }
 0x405   : > { %v6193_v8 = vpack.c.bf16 %v1786_v2, %v1785_v59  ;;  %v4727_v58 = vcombine.high %v1858_v22, %v1862_v28  ;;  %v1866_v59 = vld [vmem:[#allocation3 + $0x1d8] sm:$0xff]  ;;  %v4726_v62 = vcombine.low %v1858_v22, %v1862_v28  ;;  %v5254_v2 = vld [vmem:[#allocation6 + $0x4] ss:$8 sps:$4 sm:$0xff]  }
 0x406   : > { %v6195_v9 = vpack.c.bf16 %v1784_v7, %v1783_v63  ;;  %v5104_v10 = vpop.f32.mrb[60].mxu1  ;;  %v1870_v61 = vld [vmem:[#allocation3 + $0x1f8] sm:$0xff]  ;;  %4215 = vmatprep.subr.bf16.mxu0 %v5254_v2  ;;  %v5260_v7 = vld [vmem:[#allocation6 + $0x24] ss:$8 sps:$4 sm:$0xff]  }
 0x407   : > { %v1753_v11 = vadd.f32 %v5104_v10, %v6114_v30  ;;  %v1744_v12 = vpop.f32.mrb[61].mxu1  ;;  %2399 = vmatpush1.bf16.msra.mxu1 %v4730_v4  ;;  %v4735_v63 = vcombine.high %v1866_v59, %v1870_v61  ;;  %v4734_v0 = vcombine.low %v1866_v59, %v1870_v61  ;;  %v5252_v4 = vld [vmem:[#allocation6] ss:$8 sps:$4 sm:$0xff]   ;;  %v5293_v41 = vld [vmem:[#allocation6 + $0xd4] ss:$8 sps:$4 sm:$0xff]  }
 0x408   : > { %2304 = vmatmul.mubr.bf16.gmra.mrb[80].mxu1 %v6169_v19  ;;  %2630 = vmatmul.mubr.bf16.gmra.mrb[88].mxu0 %v6132_v3  ;;  %v1745_v13 = vadd.f32 %v6114_v30, %v1744_v12  ;;  %v5105_v26 = vpop.f32.mrb[62].mxu1  ;;  %v5258_v10 = vld [vmem:[#allocation6 + $0x20] ss:$8 sps:$4 sm:$0xff]   ;;  %v5266_v12 = vld [vmem:[#allocation6 + $0x44] ss:$8 sps:$4 sm:$0xff]  }
 0x409   : > { %2313 = vmatprep.mubr.bf16.mxu1 %v5627_v21  ;;  %2639 = vmatprep.mubr.bf16.mxu0 %v5627_v21  ;;  %v1789_v14 = vmax.f32 %v1753_v11, 0.0  ;;  %v1756_v16 = vadd.f32 %v5105_v26, %v6114_v30  ;;  %v1747_v25 = vpop.f32.mrb[63].mxu1  ;;  %v5261_v11 = vld [vmem:[#allocation6 + $0x30] ss:$8 sps:$4 sm:$0xff]   ;;  %v5269_v26 = vld [vmem:[#allocation6 + $0x54] ss:$8 sps:$4 sm:$0xff]  }
 0x40a   : > { %v1787_v18 = vmax.f32 %v1745_v13, 0.0  ;;  %v1748_v20 = vadd.f32 %v6114_v30, %v1747_v25  ;;  %2770 = vmatprep.subr.bf16.mxu1 %v4679_v15  ;;  %v1818_v30 = vld [vmem:[#allocation3 + $0x58] sm:$0xff]  ;;  %4216 = vmatpush1.bf16.msra.mxu0 %v5252_v4  ;;  %v5264_v13 = vld [vmem:[#allocation6 + $0x40] ss:$8 sps:$4 sm:$0xff]  }
 0x40b   : > { %v1790_v27 = vmax.f32 %v1756_v16, 0.0  ;;  %v4687_v36 = vcombine.high %v1818_v30, %v1822_v34  ;;  %v4686_v39 = vcombine.low %v1818_v30, %v1822_v34  ;;  %4217 = vmatprep.subr.bf16.mxu0 %v5257_v5  ;;  %v5263_v15 = vld [vmem:[#allocation6 + $0x34] ss:$8 sps:$4 sm:$0xff]   ;;  %v5272_v16 = vld [vmem:[#allocation6 + $0x64] ss:$8 sps:$4 sm:$0xff]  }
 0x40c   : > { %v1788_v29 = vmax.f32 %v1748_v20, 0.0  ;;  %v5270_v25 = vld [vmem:[#allocation6 + $0x60] ss:$8 sps:$4 sm:$0xff]   ;;  %v5273_v20 = vld [vmem:[#allocation6 + $0x70] ss:$8 sps:$4 sm:$0xff]  }
 0x40d   : > { %v6206_v32 = vpack.c.bf16 %v1790_v27, %v1789_v14  ;;  %v5267_v14 = vld [vmem:[#allocation6 + $0x50] ss:$8 sps:$4 sm:$0xff]   ;;  %v5278_v27 = vld [vmem:[#allocation6 + $0x84] ss:$8 sps:$4 sm:$0xff]   ;;  %v5281_v30 = vld [vmem:[#allocation6 + $0x94] ss:$8 sps:$4 sm:$0xff]  }
 0x40e   : > { %v6208_v33 = vpack.c.bf16 %v1788_v29, %v1787_v18  ;;  %4218 = vmatpush1.bf16.msra.mxu0 %v5255_v6  ;;  %v5275_v18 = vld [vmem:[#allocation6 + $0x74] ss:$8 sps:$4 sm:$0xff]   ;;  %v5276_v29 = vld [vmem:[#allocation6 + $0x80] ss:$8 sps:$4 sm:$0xff]   ;;  %v5279_v34 = vld [vmem:[#allocation6 + $0x90] ss:$8 sps:$4 sm:$0xff]  }
 0x40f   : > { %4219 = vmatprep.subr.bf16.mxu0 %v5260_v7  ;;  %v5291_v42 = vld [vmem:[#allocation6 + $0xd0] ss:$8 sps:$4 sm:$0xff]   ;;  %v5299_v47 = vld [vmem:[#allocation6 + $0xf4] ss:$8 sps:$4 sm:$0xff]  }
 0x410   : > { %2314 = vmatmul.mubr.bf16.gmra.mrb[84].mxu1 %v6167_v17  ;;  %2640 = vmatmul.mubr.bf16.gmra.mrb[92].mxu0 %v6130_v1  ;;  %v5297_v48 = vld [vmem:[#allocation6 + $0xf0] ss:$8 sps:$4 sm:$0xff]  }
 0x411   : > { %2323 = vmatprep.mubr.bf16.mxu1 %v5627_v21  ;;  %2649 = vmatprep.mubr.bf16.mxu0 %v5627_v21 }
 0x412   : > { %4220 = vmatpush1.bf16.msra.mxu0 %v5258_v10 }
 0x413   : > { %4221 = vmatprep.subr.bf16.mxu0 %v5263_v15 }
 0x416   : > { %4222 = vmatpush1.bf16.msra.mxu0 %v5261_v11 }
 0x417   : > { %4223 = vmatprep.subr.bf16.mxu0 %v5266_v12 }
 0x418   : > { %2324 = vmatmul.mubr.bf16.gmra.mrb[88].mxu1 %v6181_v52  ;;  %2650 = vmatmul.mubr.bf16.gmra.mrb[96].mxu0 %v6142_v24 }
 0x419   : > { %2333 = vmatprep.mubr.bf16.mxu1 %v5627_v21  ;;  %2659 = vmatprep.mubr.bf16.mxu0 %v5627_v21 }
 0x41a   : > { %4224 = vmatpush1.bf16.msra.mxu0 %v5264_v13 }
 0x41b   : > { %4225 = vmatprep.subr.bf16.mxu0 %v5269_v26 }
 0x41e   : > { %4226 = vmatpush1.bf16.msra.mxu0 %v5267_v14 }
 0x41f   : > { %4227 = vmatprep.subr.bf16.mxu0 %v5272_v16 }
 0x420   : > { %2334 = vmatmul.mubr.bf16.gmra.mrb[92].mxu1 %v6179_v49  ;;  %2660 = vmatmul.mubr.bf16.gmra.mrb[100].mxu0 %v6140_v31 }
 0x421   : > { %2343 = vmatprep.mubr.bf16.mxu1 %v5627_v21  ;;  %2669 = vmatprep.mubr.bf16.mxu0 %v5627_v21 }
 0x422   : > { %4228 = vmatpush1.bf16.msra.mxu0 %v5270_v25 }
 0x423   : > { %4229 = vmatprep.subr.bf16.mxu0 %v5275_v18 }
 0x426   : > { %4230 = vmatpush1.bf16.msra.mxu0 %v5273_v20 }
 0x427   : > { %4231 = vmatprep.subr.bf16.mxu0 %v5278_v27 }
 0x428   : > { %2344 = vmatmul.mubr.bf16.gmra.mrb[96].mxu1 %v6195_v9  ;;  %2670 = vmatmul.mubr.bf16.gmra.mrb[104].mxu0 %v6157_v60 }
 0x429   : > { %2353 = vmatprep.mubr.bf16.mxu1 %v5627_v21  ;;  %2679 = vmatprep.mubr.bf16.mxu0 %v5627_v21 }
 0x42a   : > { %4232 = vmatpush1.bf16.msra.mxu0 %v5276_v29 }
 0x42b   : > { %4233 = vmatprep.subr.bf16.mxu0 %v5281_v30 }
 0x42e   : > { %4234 = vmatpush1.bf16.msra.mxu0 %v5279_v34 }
 0x430   : > { %2354 = vmatmul.mubr.bf16.gmra.mrb[100].mxu1 %v6193_v8  ;;  %2680 = vmatmul.mubr.bf16.gmra.mrb[108].mxu0 %v6155_v23 }
 0x431   : > { %2363 = vmatprep.mubr.bf16.mxu1 %v5627_v21  ;;  %2689 = vmatprep.mubr.bf16.mxu0 %v5627_v21 }
 0x438   : > { %2364 = vmatmul.mubr.bf16.gmra.mrb[104].mxu1 %v6208_v33  ;;  %2690 = vmatmul.mubr.bf16.gmra.mrb[112].mxu0 %v6169_v19 }
 0x439   : > { %2373 = vmatprep.mubr.bf16.mxu1 %v5627_v21  ;;  %2699 = vmatprep.mubr.bf16.mxu0 %v5627_v21 }
 0x440   : > { %2374 = vmatmul.mubr.bf16.gmra.mrb[108].mxu1 %v6206_v32  ;;  %2700 = vmatmul.mubr.bf16.gmra.mrb[116].mxu0 %v6167_v17 }
 0x441   : > { %2416 = vmatprep.mubr.bf16.mxu1 %v5627_v21  ;;  %2709 = vmatprep.mubr.bf16.mxu0 %v5627_v21 }
 0x448   : > { %2417 = vmatmul.mubr.bf16.vlgmr.msra.gmra.mrb[112].mxu1 %v6122_v45  ;;  %2710 = vmatmul.mubr.bf16.gmra.mrb[120].mxu0 %v6181_v52 }
 0x449   : > { %2771 = vmatpush1.bf16.msra.mxu1 %v4678_v35  ;;  %2426 = vmatprep.mubr.bf16.mxu1 %v5627_v21  ;;  %v5284_v35 = vld [vmem:[#allocation6 + $0xa4] ss:$8 sps:$4 sm:$0xff]  }
 0x44a   : > { %2719 = vmatprep.mubr.bf16.mxu0 %v5627_v21  ;;  %2772 = vmatprep.subr.bf16.mxu1 %v4687_v36  ;;  %v5282_v36 = vld [vmem:[#allocation6 + $0xa0] ss:$8 sps:$4 sm:$0xff]  }
 0x44b   : > { %4235 = vmatprep.subr.bf16.mxu0 %v5284_v35 }
 0x44c   : > { %4236 = vmatpush1.bf16.msra.mxu0 %v5282_v36 }
 0x44d   : > { %2773 = vmatpush1.bf16.msra.mxu1 %v4686_v39  ;;  %4237 = vmatprep.subr.bf16.mxu0 %v5287_v37  ;;  %v5290_v39 = vld [vmem:[#allocation6 + $0xc4] ss:$8 sps:$4 sm:$0xff]  }
 0x44e   : > { %2774 = vmatprep.subr.bf16.mxu1 %v4695_v40  ;;  %v5288_v40 = vld [vmem:[#allocation6 + $0xc0] ss:$8 sps:$4 sm:$0xff]  }
 0x450   : > { %2427 = vmatmul.mubr.bf16.gmra.mrb[116].mxu1 %v6120_v44  ;;  %2720 = vmatmul.mubr.bf16.gmra.mrb[124].mxu0 %v6179_v49 }
 0x451   : > { %2436 = vmatprep.mubr.bf16.mxu1 %v5627_v21  ;;  %2729 = vmatprep.mubr.bf16.mxu0 %v5627_v21 }
 0x452   : > { %2775 = vmatpush1.bf16.msra.mxu1 %v4694_v43  ;;  %4238 = vmatpush1.bf16.msra.mxu0 %v5285_v38  ;;  %v5296_v43 = vld [vmem:[#allocation6 + $0xe4] ss:$8 sps:$4 sm:$0xff]  }
 0x453   : > { %2776 = vmatprep.subr.bf16.mxu1 %v4703_v46  ;;  %4239 = vmatprep.subr.bf16.mxu0 %v5290_v39  ;;  %v5294_v46 = vld [vmem:[#allocation6 + $0xe0] ss:$8 sps:$4 sm:$0xff]  }
 0x456   : > { %2777 = vmatpush1.bf16.msra.mxu1 %v4702_v50  ;;  %4240 = vmatpush1.bf16.msra.mxu0 %v5288_v40 }
 0x457   : > { %2778 = vmatprep.subr.bf16.mxu1 %v4711_v51  ;;  %4241 = vmatprep.subr.bf16.mxu0 %v5293_v41 }
 0x458   : > { %2437 = vmatmul.mubr.bf16.gmra.mrb[120].mxu1 %v6132_v3  ;;  %2730 = vmatmul.mubr.bf16.gmra.mrb[128].mxu0 %v6195_v9 }
 0x459   : > { %2446 = vmatprep.mubr.bf16.mxu1 %v5627_v21  ;;  %2739 = vmatprep.mubr.bf16.mxu0 %v5627_v21 }
 0x45a   : > { %2779 = vmatpush1.bf16.msra.mxu1 %v4710_v55  ;;  %4242 = vmatpush1.bf16.msra.mxu0 %v5291_v42 }
 0x45b   : > { %2780 = vmatprep.subr.bf16.mxu1 %v4719_v56  ;;  %4243 = vmatprep.subr.bf16.mxu0 %v5296_v43 }
 0x45e   : > { %2781 = vmatpush1.bf16.msra.mxu1 %v4718_v57  ;;  %4244 = vmatpush1.bf16.msra.mxu0 %v5294_v46 }
 0x45f   : > { %2782 = vmatprep.subr.bf16.mxu1 %v4727_v58  ;;  %4245 = vmatprep.subr.bf16.mxu0 %v5299_v47 }
 0x460   : > { %2447 = vmatmul.mubr.bf16.gmra.mrb[124].mxu1 %v6130_v1  ;;  %2740 = vmatmul.mubr.bf16.gmra.mrb[132].mxu0 %v6193_v8 }
 0x461   : > { %2456 = vmatprep.mubr.bf16.mxu1 %v5627_v21  ;;  %2749 = vmatprep.mubr.bf16.mxu0 %v5627_v21 }
 0x462   : > { %2783 = vmatpush1.bf16.msra.mxu1 %v4726_v62  ;;  %4246 = vmatpush1.bf16.msra.mxu0 %v5297_v48 }
 0x463   : > { %2784 = vmatprep.subr.bf16.mxu1 %v4735_v63 }
 0x466   : > { %2785 = vmatpush1.bf16.msra.mxu1 %v4734_v0 }
 0x468   : > { %2457 = vmatmul.mubr.bf16.gmra.mrb[128].mxu1 %v6142_v24  ;;  %2750 = vmatmul.mubr.bf16.gmra.mrb[136].mxu0 %v6208_v33 }
 0x469   : > { %2466 = vmatprep.mubr.bf16.mxu1 %v5627_v21  ;;  %2759 = vmatprep.mubr.bf16.mxu0 %v5627_v21 }
 0x470   : > { %2467 = vmatmul.mubr.bf16.gmra.mrb[132].mxu1 %v6140_v31  ;;  %2760 = vmatmul.mubr.bf16.gmra.mrb[140].mxu0 %v6206_v32 }
 0x471   : > { %2476 = vmatprep.mubr.bf16.mxu1 %v5627_v21 }
 0x478   : > { %2477 = vmatmul.mubr.bf16.gmra.mrb[136].mxu1 %v6157_v60 }
 0x479   : > { %2486 = vmatprep.mubr.bf16.mxu1 %v5627_v21 }
 0x480   : > { %2487 = vmatmul.mubr.bf16.gmra.mrb[140].mxu1 %v6155_v23 }
 0x481   : > { %2496 = vmatprep.mubr.bf16.mxu1 %v5627_v21 }
 0x488   : > { %2497 = vmatmul.mubr.bf16.gmra.mrb[144].mxu1 %v6169_v19 }
 0x489   : > { %2506 = vmatprep.mubr.bf16.mxu1 %v5627_v21 }
 0x490   : > { %2507 = vmatmul.mubr.bf16.gmra.mrb[148].mxu1 %v6167_v17 }
 0x491   : > { %2516 = vmatprep.mubr.bf16.mxu1 %v5627_v21 }
 0x498   : > { %2517 = vmatmul.mubr.bf16.gmra.mrb[152].mxu1 %v6181_v52 }
 0x499   : > { %2526 = vmatprep.mubr.bf16.mxu1 %v5627_v21 }
 0x4a0   : > { %2527 = vmatmul.mubr.bf16.gmra.mrb[156].mxu1 %v6179_v49 }
 0x4a1   : > { %2536 = vmatprep.mubr.bf16.mxu1 %v5627_v21 }
 0x4a8   : > { %2537 = vmatmul.mubr.bf16.gmra.mrb[160].mxu1 %v6195_v9 }
 0x4a9   : > { %2546 = vmatprep.mubr.bf16.mxu1 %v5627_v21 }
 0x4ab   : > { %v2225_v50 = vpop.f32.mrb[64].mxu0 }
 0x4ac   : > { %v2227_v51 = vpop.f32.mrb[65].mxu0 }
 0x4ad   : > { %v2229_v53 = vpop.f32.mrb[66].mxu0 }
 0x4ae   : > { %v2963_v54 = vmax.f32 %v2225_v50, %v2229_v53  ;;  %v2231_v55 = vpop.f32.mrb[67].mxu0 }
 0x4af   : > { %v2994_v56 = vmax.f32 %v2227_v51, %v2231_v55 }
 0x4b0   : > { %2547 = vmatmul.mubr.bf16.gmra.mrb[164].mxu1 %v6193_v8 }
 0x4b1   : > { %2556 = vmatprep.mubr.bf16.mxu1 %v5627_v21 }
 0x4b3   : > { %v2235_v22 = vpop.f32.mrb[68].mxu0 }
 0x4b4   : > { %v2964_v28 = vmax.f32 %v2963_v54, %v2235_v22  ;;  %v2237_v57 = vpop.f32.mrb[69].mxu0 }
 0x4b5   : > { %v2995_v58 = vmax.f32 %v2994_v56, %v2237_v57  ;;  %v2239_v59 = vpop.f32.mrb[70].mxu0 }
 0x4b6   : > { %v2965_v61 = vmax.f32 %v2964_v28, %v2239_v59  ;;  %v2241_v62 = vpop.f32.mrb[71].mxu0 }
 0x4b7   : > { %v2996_v63 = vmax.f32 %v2995_v58, %v2241_v62 }
 0x4b8   : > { %2557 = vmatmul.mubr.bf16.gmra.mrb[168].mxu1 %v6208_v33 }
 0x4b9   : > { %2566 = vmatprep.mubr.bf16.mxu1 %v5627_v21 }
 0x4bb   : > { %v2245_v0 = vpop.f32.mrb[72].mxu0  ;;  %v2265_v2 = vpop.f32.mrb[64].mxu1 }
 0x4bc   : > { %v2966_v4 = vmax.f32 %v2965_v61, %v2245_v0  ;;  %v2247_v5 = vpop.f32.mrb[73].mxu0  ;;  %v2267_v6 = vpop.f32.mrb[65].mxu1 }
 0x4bd   : > { %v2997_v7 = vmax.f32 %v2996_v63, %v2247_v5  ;;  %v2249_v10 = vpop.f32.mrb[74].mxu0  ;;  %v2269_v15 = vpop.f32.mrb[66].mxu1 }
 0x4be   : > { %v2967_v11 = vmax.f32 %v2966_v4, %v2249_v10  ;;  %v2251_v12 = vpop.f32.mrb[75].mxu0  ;;  %v2271_v13 = vpop.f32.mrb[67].mxu1 }
 0x4bf   : > { %v2998_v26 = vmax.f32 %v2997_v7, %v2251_v12 }
 0x4c0   : > { %2567 = vmatmul.mubr.bf16.gmra.mrb[172].mxu1 %v6206_v32 }
 0x4c1   : > { %2802 = vmatprep.mubr.bf16.mxu1 %v5627_v21 }
 0x4c3   : > { %v2255_v14 = vpop.f32.mrb[76].mxu0  ;;  %v2275_v16 = vpop.f32.mrb[68].mxu1 }
 0x4c4   : > { %v2968_v25 = vmax.f32 %v2967_v11, %v2255_v14  ;;  %v2257_v18 = vpop.f32.mrb[77].mxu0  ;;  %v2277_v20 = vpop.f32.mrb[69].mxu1 }
 0x4c5   : > { %v2999_v27 = vmax.f32 %v2998_v26, %v2257_v18  ;;  %v2259_v29 = vpop.f32.mrb[78].mxu0  ;;  %v2279_v30 = vpop.f32.mrb[70].mxu1 }
 0x4c6   : > { %v2969_v34 = vmax.f32 %v2968_v25, %v2259_v29  ;;  %v2261_v35 = vpop.f32.mrb[79].mxu0  ;;  %v2281_v36 = vpop.f32.mrb[71].mxu1 }
 0x4c7   : > { %v3000_v37 = vmax.f32 %v2999_v27, %v2261_v35 }
 0x4c8   : > { %v2970_v38 = vmax.f32 %v2969_v34, %v2265_v2  ;;  %2803 = vmatmul.mubr.bf16.vlgmr.msra.gmra.mrb[176].mxu1 %v6122_v45 }
 0x4c9   : > { %v3001_v39 = vmax.f32 %v3000_v37, %v2267_v6  ;;  %2812 = vmatprep.mubr.bf16.mxu1 %v5627_v21 }
 0x4ca   : > { %v2971_v40 = vmax.f32 %v2970_v38, %v2269_v15 }
 0x4cb   : > { %v3002_v41 = vmax.f32 %v3001_v39, %v2271_v13  ;;  %v2285_v42 = vpop.f32.mrb[72].mxu1  ;;  %v2611_v43 = vpop.f32.mrb[80].mxu0 }
 0x4cc   : > { %v2972_v46 = vmax.f32 %v2971_v40, %v2275_v16  ;;  %v2287_v47 = vpop.f32.mrb[73].mxu1  ;;  %v2613_v48 = vpop.f32.mrb[81].mxu0 }
 0x4cd   : > { %v3003_v50 = vmax.f32 %v3002_v41, %v2277_v20  ;;  %v2289_v51 = vpop.f32.mrb[74].mxu1  ;;  %v2615_v53 = vpop.f32.mrb[82].mxu0 }
 0x4ce   : > { %v2973_v54 = vmax.f32 %v2972_v46, %v2279_v30  ;;  %v3087_v55 = vmax.f32 %v2611_v43, %v2615_v53  ;;  %v2291_v56 = vpop.f32.mrb[75].mxu1  ;;  %v2617_v22 = vpop.f32.mrb[83].mxu0 }
 0x4cf   : > { %v3004_v28 = vmax.f32 %v3003_v50, %v2281_v36  ;;  %v3118_v57 = vmax.f32 %v2613_v48, %v2617_v22 }
 0x4d0   : > { %v2974_v45 = vmax.f32 %v2973_v54, %v2285_v42  ;;  %2813 = vmatmul.mubr.bf16.gmra.mrb[180].mxu1 %v6120_v44 }
 0x4d1   : > { %v3005_v58 = vmax.f32 %v3004_v28, %v2287_v47  ;;  %2822 = vmatprep.mubr.bf16.mxu1 %v5627_v21 }
 0x4d2   : > { %v2975_v59 = vmax.f32 %v2974_v45, %v2289_v51 }
 0x4d3   : > { %v3006_v61 = vmax.f32 %v3005_v58, %v2291_v56  ;;  %v2295_v62 = vpop.f32.mrb[76].mxu1  ;;  %v2621_v63 = vpop.f32.mrb[84].mxu0 }
 0x4d4   : > { %v2976_v0 = vmax.f32 %v2975_v59, %v2295_v62  ;;  %v3088_v2 = vmax.f32 %v3087_v55, %v2621_v63  ;;  %v2297_v4 = vpop.f32.mrb[77].mxu1  ;;  %v2623_v5 = vpop.f32.mrb[85].mxu0 }
 0x4d5   : > { %v3007_v6 = vmax.f32 %v3006_v61, %v2297_v4  ;;  %v3119_v7 = vmax.f32 %v3118_v57, %v2623_v5  ;;  %v2299_v10 = vpop.f32.mrb[78].mxu1  ;;  %v2625_v15 = vpop.f32.mrb[86].mxu0 }
 0x4d6   : > { %v2977_v11 = vmax.f32 %v2976_v0, %v2299_v10  ;;  %v3089_v12 = vmax.f32 %v3088_v2, %v2625_v15  ;;  %v2301_v13 = vpop.f32.mrb[79].mxu1  ;;  %v2627_v26 = vpop.f32.mrb[87].mxu0 }
 0x4d7   : > { %v3008_v44 = vmax.f32 %v3007_v6, %v2301_v13  ;;  %v3120_v14 = vmax.f32 %v3119_v7, %v2627_v26 }
 0x4d8   : > { %2823 = vmatmul.mubr.bf16.gmra.mrb[184].mxu1 %v6132_v3 }
 0x4d9   : > { %2832 = vmatprep.mubr.bf16.mxu1 %v5627_v21 }
 0x4db   : > { %v2305_v16 = vpop.f32.mrb[80].mxu1  ;;  %v2631_v25 = vpop.f32.mrb[88].mxu0 }
 0x4dc   : > { %v2978_v18 = vmax.f32 %v2977_v11, %v2305_v16  ;;  %v3090_v20 = vmax.f32 %v3089_v12, %v2631_v25  ;;  %v2307_v27 = vpop.f32.mrb[81].mxu1  ;;  %v2633_v29 = vpop.f32.mrb[89].mxu0 }
 0x4dd   : > { %v3009_v30 = vmax.f32 %v3008_v44, %v2307_v27  ;;  %v3121_v34 = vmax.f32 %v3120_v14, %v2633_v29  ;;  %v2309_v35 = vpop.f32.mrb[82].mxu1  ;;  %v2635_v36 = vpop.f32.mrb[90].mxu0 }
 0x4de   : > { %v2979_v37 = vmax.f32 %v2978_v18, %v2309_v35  ;;  %v3091_v38 = vmax.f32 %v3090_v20, %v2635_v36  ;;  %v2311_v39 = vpop.f32.mrb[83].mxu1  ;;  %v2637_v40 = vpop.f32.mrb[91].mxu0 }
 0x4df   : > { %v3010_v41 = vmax.f32 %v3009_v30, %v2311_v39  ;;  %v3122_v42 = vmax.f32 %v3121_v34, %v2637_v40 }
 0x4e0   : > { %2833 = vmatmul.mubr.bf16.gmra.mrb[188].mxu1 %v6130_v1  ;;  %v5302_v1 = vld [vmem:[#allocation6 + $0x104] ss:$8 sps:$4 sm:$0xff]  }
 0x4e1   : > { %2842 = vmatprep.mubr.bf16.mxu1 %v5627_v21  ;;  %4256 = vmatprep.subr.bf16.mxu0 %v5302_v1 }
 0x4e3   : > { %v2315_v3 = vpop.f32.mrb[84].mxu1  ;;  %v2641_v43 = vpop.f32.mrb[92].mxu0 }
 0x4e4   : > { %v2980_v46 = vmax.f32 %v2979_v37, %v2315_v3  ;;  %v3092_v47 = vmax.f32 %v3091_v38, %v2641_v43  ;;  %v2317_v48 = vpop.f32.mrb[85].mxu1  ;;  %v2643_v50 = vpop.f32.mrb[93].mxu0 }
 0x4e5   : > { %v3011_v51 = vmax.f32 %v3010_v41, %v2317_v48  ;;  %v3123_v53 = vmax.f32 %v3122_v42, %v2643_v50  ;;  %v2319_v54 = vpop.f32.mrb[86].mxu1  ;;  %v2645_v55 = vpop.f32.mrb[94].mxu0 }
 0x4e6   : > { %v2981_v56 = vmax.f32 %v2980_v46, %v2319_v54  ;;  %v3093_v22 = vmax.f32 %v3092_v47, %v2645_v55  ;;  %v2321_v28 = vpop.f32.mrb[87].mxu1  ;;  %v2647_v57 = vpop.f32.mrb[95].mxu0 }
 0x4e7   : > { %v3012_v45 = vmax.f32 %v3011_v51, %v2321_v28  ;;  %v3124_v58 = vmax.f32 %v3123_v53, %v2647_v57 }
 0x4e8   : > { %2843 = vmatmul.mubr.bf16.gmra.mrb[192].mxu1 %v6142_v24 }
 0x4e9   : > { %2852 = vmatprep.mubr.bf16.mxu1 %v5627_v21 }
 0x4eb   : > { %v2325_v59 = vpop.f32.mrb[88].mxu1  ;;  %v2651_v61 = vpop.f32.mrb[96].mxu0 }
 0x4ec   : > { %v2982_v62 = vmax.f32 %v2981_v56, %v2325_v59  ;;  %v3094_v63 = vmax.f32 %v3093_v22, %v2651_v61  ;;  %v2327_v0 = vpop.f32.mrb[89].mxu1  ;;  %v2653_v2 = vpop.f32.mrb[97].mxu0 }
 0x4ed   : > { %v3013_v4 = vmax.f32 %v3012_v45, %v2327_v0  ;;  %v3125_v5 = vmax.f32 %v3124_v58, %v2653_v2  ;;  %v2329_v6 = vpop.f32.mrb[90].mxu1  ;;  %v2655_v7 = vpop.f32.mrb[98].mxu0 }
 0x4ee   : > { %v2983_v10 = vmax.f32 %v2982_v62, %v2329_v6  ;;  %v3095_v15 = vmax.f32 %v3094_v63, %v2655_v7  ;;  %v2331_v11 = vpop.f32.mrb[91].mxu1  ;;  %v2657_v12 = vpop.f32.mrb[99].mxu0 }
 0x4ef   : > { %v3014_v13 = vmax.f32 %v3013_v4, %v2331_v11  ;;  %v3126_v24 = vmax.f32 %v3125_v5, %v2657_v12 }
 0x4f0   : > { %2853 = vmatmul.mubr.bf16.gmra.mrb[196].mxu1 %v6140_v31 }
 0x4f1   : > { %2862 = vmatprep.mubr.bf16.mxu1 %v5627_v21 }
 0x4f3   : > { %v2335_v26 = vpop.f32.mrb[92].mxu1  ;;  %v2661_v44 = vpop.f32.mrb[100].mxu0 }
 0x4f4   : > { %v2984_v14 = vmax.f32 %v2983_v10, %v2335_v26  ;;  %v3096_v16 = vmax.f32 %v3095_v15, %v2661_v44  ;;  %v2337_v25 = vpop.f32.mrb[93].mxu1  ;;  %v2663_v18 = vpop.f32.mrb[101].mxu0 }
 0x4f5   : > { %v3015_v20 = vmax.f32 %v3014_v13, %v2337_v25  ;;  %v3127_v27 = vmax.f32 %v3126_v24, %v2663_v18  ;;  %v2339_v29 = vpop.f32.mrb[94].mxu1  ;;  %v2665_v30 = vpop.f32.mrb[102].mxu0 }
 0x4f6   : > { %v2985_v34 = vmax.f32 %v2984_v14, %v2339_v29  ;;  %v3097_v35 = vmax.f32 %v3096_v16, %v2665_v30  ;;  %v2341_v36 = vpop.f32.mrb[95].mxu1  ;;  %v2667_v37 = vpop.f32.mrb[103].mxu0 }
 0x4f7   : > { %v3016_v38 = vmax.f32 %v3015_v20, %v2341_v36  ;;  %v3128_v39 = vmax.f32 %v3127_v27, %v2667_v37 }
 0x4f8   : > { %2863 = vmatmul.mubr.bf16.gmra.mrb[200].mxu1 %v6157_v60 }
 0x4f9   : > { %2872 = vmatprep.mubr.bf16.mxu1 %v5627_v21 }
 0x4fb   : > { %v2345_v31 = vpop.f32.mrb[96].mxu1  ;;  %v2671_v40 = vpop.f32.mrb[104].mxu0 }
 0x4fc   : > { %v2986_v41 = vmax.f32 %v2985_v34, %v2345_v31  ;;  %v3098_v42 = vmax.f32 %v3097_v35, %v2671_v40  ;;  %v2347_v3 = vpop.f32.mrb[97].mxu1  ;;  %v2673_v43 = vpop.f32.mrb[105].mxu0 }
 0x4fd   : > { %v3017_v46 = vmax.f32 %v3016_v38, %v2347_v3  ;;  %v3129_v47 = vmax.f32 %v3128_v39, %v2673_v43  ;;  %v2349_v48 = vpop.f32.mrb[98].mxu1  ;;  %v2675_v50 = vpop.f32.mrb[106].mxu0  ;;  %v3312_v38 = vlaneseq }
 0x4fe   : > { %v2987_v51 = vmax.f32 %v2986_v41, %v2349_v48  ;;  %v3099_v53 = vmax.f32 %v3098_v42, %v2675_v50  ;;  %v2351_v54 = vpop.f32.mrb[99].mxu1  ;;  %v2677_v55 = vpop.f32.mrb[107].mxu0 }
 0x4ff   : > { %v3018_v56 = vmax.f32 %v3017_v46, %v2351_v54  ;;  %v3130_v22 = vmax.f32 %v3129_v47, %v2677_v55  ;;  %v6303_v50 = vshrl.u32 %v3312_v38, 7 }
 0x500   : > { %2873 = vmatmul.mubr.bf16.gmra.mrb[204].mxu1 %v6155_v23 }
 0x501   : > { %2882 = vmatprep.mubr.bf16.mxu1 %v5627_v21 }
 0x503   : > { %v2355_v60 = vpop.f32.mrb[100].mxu1  ;;  %v2681_v28 = vpop.f32.mrb[108].mxu0 }
 0x504   : > { %v2988_v57 = vmax.f32 %v2987_v51, %v2355_v60  ;;  %v3100_v45 = vmax.f32 %v3099_v53, %v2681_v28  ;;  %v2357_v58 = vpop.f32.mrb[101].mxu1  ;;  %v2683_v1 = vpop.f32.mrb[109].mxu0  ;;  %v3314_v60 = vsub.s32 0, %v6303_v50 }
 0x505   : > { %v3019_v59 = vmax.f32 %v3018_v56, %v2357_v58  ;;  %v3131_v61 = vmax.f32 %v3130_v22, %v2683_v1  ;;  %v2359_v62 = vpop.f32.mrb[102].mxu1  ;;  %v2685_v63 = vpop.f32.mrb[110].mxu0  ;;  %v6311_v58 = vld [vmem:[%s6487_s10] sm:$0xff] }
 0x506   : > { %v2989_v0 = vmax.f32 %v2988_v57, %v2359_v62  ;;  %v3101_v2 = vmax.f32 %v3100_v45, %v2685_v63  ;;  %v2361_v4 = vpop.f32.mrb[103].mxu1  ;;  %v2687_v5 = vpop.f32.mrb[111].mxu0  ;;  %v3318_v62 = vsub.s32 1, %v6303_v50 }
 0x507   : > { %v3020_v6 = vmax.f32 %v3019_v59, %v2361_v4  ;;  %v3132_v7 = vmax.f32 %v3131_v61, %v2687_v5 }
 0x508   : > { %2883 = vmatmul.mubr.bf16.gmra.mrb[208].mxu1 %v6169_v19 }
 0x509   : > { %2892 = vmatprep.mubr.bf16.mxu1 %v5627_v21 }
 0x50b   : > { %v2365_v23 = vpop.f32.mrb[104].mxu1  ;;  %v2691_v10 = vpop.f32.mrb[112].mxu0 }
 0x50c   : > { %v2990_v15 = vmax.f32 %v2989_v0, %v2365_v23  ;;  %v3102_v11 = vmax.f32 %v3101_v2, %v2691_v10  ;;  %v2367_v12 = vpop.f32.mrb[105].mxu1  ;;  %v2693_v13 = vpop.f32.mrb[113].mxu0 }
 0x50d   : > { %v3021_v24 = vmax.f32 %v3020_v6, %v2367_v12  ;;  %v3133_v26 = vmax.f32 %v3132_v7, %v2693_v13  ;;  %v2369_v44 = vpop.f32.mrb[106].mxu1  ;;  %v2695_v14 = vpop.f32.mrb[114].mxu0  ;;  %v3319_v12 = vrot.slane %v6311_v58, %v3318_v62 }
 0x50e   : > { %v2991_v16 = vmax.f32 %v2990_v15, %v2369_v44  ;;  %v3103_v25 = vmax.f32 %v3102_v11, %v2695_v14  ;;  %v2371_v18 = vpop.f32.mrb[107].mxu1  ;;  %v2697_v20 = vpop.f32.mrb[115].mxu0  ;;  %v3315_v15 = vrot.slane %v6311_v58, %v3314_v60 }
 0x50f   : > { %v3022_v27 = vmax.f32 %v3021_v24, %v2371_v18  ;;  %v3134_v29 = vmax.f32 %v3133_v26, %v2697_v20 }
 0x510   : > { %2893 = vmatmul.mubr.bf16.gmra.mrb[212].mxu1 %v6167_v17 }
 0x511   : > { %2902 = vmatprep.mubr.bf16.mxu1 %v5627_v21 }
 0x513   : > { %v2375_v19 = vpop.f32.mrb[108].mxu1  ;;  %v2701_v30 = vpop.f32.mrb[116].mxu0 }
 0x514   : > { %v2992_v34 = vmax.f32 %v2991_v16, %v2375_v19  ;;  %v3104_v35 = vmax.f32 %v3103_v25, %v2701_v30  ;;  %v2377_v36 = vpop.f32.mrb[109].mxu1  ;;  %v2703_v37 = vpop.f32.mrb[117].mxu0 }
 0x515   : > { %v3023_v39 = vmax.f32 %v3022_v27, %v2377_v36  ;;  %v3135_v31 = vmax.f32 %v3134_v29, %v2703_v37  ;;  %v2379_v40 = vpop.f32.mrb[110].mxu1  ;;  %v2705_v41 = vpop.f32.mrb[118].mxu0 }
 0x516   : > { %v2993_v42 = vmax.f32 %v2992_v34, %v2379_v40  ;;  %v3105_v3 = vmax.f32 %v3104_v35, %v2705_v41  ;;  %v2381_v43 = vpop.f32.mrb[111].mxu1  ;;  %v2707_v46 = vpop.f32.mrb[119].mxu0 }
 0x517   : > { %v3024_v47 = vmax.f32 %v3023_v39, %v2381_v43  ;;  %v3136_v48 = vmax.f32 %v3135_v31, %v2707_v46  ;;  %v5300_v43 = vld [vmem:[#allocation6 + $0x100] ss:$8 sps:$4 sm:$0xff]  }
 0x518   : > { %v3262_v17 = vrot.slane %v2993_v42, 4  ;;  %2903 = vmatmul.mubr.bf16.gmra.mrb[216].mxu1 %v6181_v52 }
 0x519   : > { %v3268_v51 = vrot.slane %v3024_v47, 4  ;;  %2912 = vmatprep.mubr.bf16.mxu1 %v5627_v21 }
 0x51a   : > { %v3263_v53 = vmax.f32 %v2993_v42, %v3262_v17 }
 0x51b   : > { %v3269_v54 = vmax.f32 %v3024_v47, %v3268_v51  ;;  %v2418_v55 = vpop.f32.mrb[112].mxu1  ;;  %v2711_v56 = vpop.f32.mrb[120].mxu0  ;;  %v5305_v47 = vld [vmem:[#allocation6 + $0x114] ss:$8 sps:$4 sm:$0xff]  }
 0x51c   : > { %v3264_v22 = vrot.slane %v3263_v53, 2  ;;  %v3106_v28 = vmax.f32 %v3105_v3, %v2711_v56  ;;  %v2420_v57 = vpop.f32.mrb[113].mxu1  ;;  %v2713_v45 = vpop.f32.mrb[121].mxu0 }
 0x51d   : > { %v3270_v1 = vrot.slane %v3269_v54, 2  ;;  %v3137_v52 = vmax.f32 %v3136_v48, %v2713_v45  ;;  %v2422_v59 = vpop.f32.mrb[114].mxu1  ;;  %v2715_v61 = vpop.f32.mrb[122].mxu0 }
 0x51e   : > { %v3265_v63 = vmax.f32 %v3263_v53, %v3264_v22  ;;  %v3025_v0 = vmax.f32 %v2418_v55, %v2422_v59  ;;  %v3107_v2 = vmax.f32 %v3106_v28, %v2715_v61  ;;  %v2424_v4 = vpop.f32.mrb[115].mxu1  ;;  %v2717_v5 = vpop.f32.mrb[123].mxu0  ;;  %v5308_v61 = vld [vmem:[#allocation6 + $0x124] ss:$8 sps:$4 sm:$0xff]  }
 0x51f   : > { %v3271_v6 = vmax.f32 %v3269_v54, %v3270_v1  ;;  %v3056_v7 = vmax.f32 %v2420_v57, %v2424_v4  ;;  %v3138_v23 = vmax.f32 %v3137_v52, %v2717_v5  ;;  %v5303_v57 = vld [vmem:[#allocation6 + $0x110] ss:$8 sps:$4 sm:$0xff]   ;;  %v5311_v4 = vld [vmem:[#allocation6 + $0x134] ss:$8 sps:$4 sm:$0xff]  }
 0x520   : > { %v3266_v10 = vrot.slane %v3265_v63, 1  ;;  %2913 = vmatmul.mubr.bf16.gmra.mrb[220].mxu1 %v6179_v49 }
 0x521   : > { %v3272_v11 = vrot.slane %v3271_v6, 1  ;;  %2922 = vmatprep.mubr.bf16.mxu1 %v5627_v21 }
 0x522   : > { %v3267_v13 = vmax.f32 %v3265_v63, %v3266_v10 }
 0x523   : > { %v3273_v24 = vmax.f32 %v3271_v6, %v3272_v11  ;;  %v2428_v26 = vpop.f32.mrb[116].mxu1  ;;  %v2721_v44 = vpop.f32.mrb[124].mxu0 }
 0x524   : > { %v3352_v14 = vadd.f32 %v3315_v15, %v3267_v13  ;;  %v3026_v16 = vmax.f32 %v3025_v0, %v2428_v26  ;;  %v3108_v25 = vmax.f32 %v3107_v2, %v2721_v44  ;;  %v2430_v18 = vpop.f32.mrb[117].mxu1  ;;  %v2723_v20 = vpop.f32.mrb[125].mxu0  ;;  %v5306_v2 = vld [vmem:[#allocation6 + $0x120] ss:$8 sps:$4 sm:$0xff]   ;;  %v5309_v26 = vld [vmem:[#allocation6 + $0x130] ss:$8 sps:$4 sm:$0xff]  }
 0x525   : > { %v3057_v27 = vmax.f32 %v3056_v7, %v2430_v18  ;;  %v3139_v29 = vmax.f32 %v3138_v23, %v2723_v20  ;;  %v2432_v19 = vpop.f32.mrb[118].mxu1  ;;  %v2725_v49 = vpop.f32.mrb[126].mxu0  ;;  %v3353_v30 = vadd.f32 %v3319_v12, %v3273_v24 }
 0x526   : > { %v6322_v34 = vmax.f32 %v3352_v14, 0.0  ;;  %v3027_v35 = vmax.f32 %v3026_v16, %v2432_v19  ;;  %v3109_v36 = vmax.f32 %v3108_v25, %v2725_v49  ;;  %v2434_v37 = vpop.f32.mrb[119].mxu1  ;;  %v2727_v39 = vpop.f32.mrb[127].mxu0  ;;  %v5314_v25 = vld [vmem:[#allocation6 + $0x144] ss:$8 sps:$4 sm:$0xff]  }
 0x527   : > { %v3058_v31 = vmax.f32 %v3057_v27, %v2434_v37  ;;  %v3140_v40 = vmax.f32 %v3139_v29, %v2727_v39  ;;  %v6324_v41 = vmax.f32 %v3353_v30, 0.0  ;;  %v5312_v27 = vld [vmem:[#allocation6 + $0x140] ss:$8 sps:$4 sm:$0xff]   ;;  %v5317_v29 = vld [vmem:[#allocation6 + $0x154] ss:$8 sps:$4 sm:$0xff]  }
 0x528   : > { %2923 = vmatmul.mubr.bf16.gmra.mrb[224].mxu1 %v6195_v9  ;;  %v3427_v46 = vpack.c.bf16 %v6322_v34, %v6322_v34 }
 0x529   : > { %v3376_v42 = vcombine.low %v6322_v34, %v6324_v41  ;;  %v3428_v3 = vpack.c.bf16 %v6324_v41, %v6324_v41  ;;  %2932 = vmatprep.mubr.bf16.mxu1 %v5627_v21  ;;  %v5351_v34 = vld [vmem:[#allocation6 + $0x210] ss:$8 sps:$4 sm:$0xff]  }
 0x52b   : > { %v2438_v48 = vpop.f32.mrb[120].mxu1  ;;  %v2731_v17 = vpop.f32.mrb[128].mxu0  ;;  %4247 = vmatprep.mubr.bf16.mxu0 %v3428_v3 }
 0x52c   : > { %v3028_v51 = vmax.f32 %v3027_v35, %v2438_v48  ;;  %v3110_v53 = vmax.f32 %v3109_v36, %v2731_v17  ;;  %v2440_v54 = vpop.f32.mrb[121].mxu1  ;;  %v2733_v9 = vpop.f32.mrb[129].mxu0  ;;  %4248 = vmatmul.mubr.bf16.vlgmr.msra.gmra.mrb[144].mxu0 %v3427_v46  ;;  %v5320_v48 = vld [vmem:[#allocation6 + $0x164] ss:$8 sps:$4 sm:$0xff]  }
 0x52d   : > { %v3059_v55 = vmax.f32 %v3058_v31, %v2440_v54  ;;  %v3141_v56 = vmax.f32 %v3140_v40, %v2733_v9  ;;  %v2442_v22 = vpop.f32.mrb[122].mxu1  ;;  %v2735_v28 = vpop.f32.mrb[130].mxu0  ;;  %4257 = vmatpush1.bf16.msra.mxu0 %v5300_v43  ;;  %v5315_v43 = vld [vmem:[#allocation6 + $0x150] ss:$8 sps:$4 sm:$0xff]   ;;  %v5323_v54 = vld [vmem:[#allocation6 + $0x174] ss:$8 sps:$4 sm:$0xff]  }
 0x52e   : > { %v3029_v45 = vmax.f32 %v3028_v51, %v2442_v22  ;;  %v3111_v1 = vmax.f32 %v3110_v53, %v2735_v28  ;;  %v2444_v52 = vpop.f32.mrb[123].mxu1  ;;  %v2737_v59 = vpop.f32.mrb[131].mxu0  ;;  %4258 = vmatprep.subr.bf16.mxu0 %v5305_v47  ;;  %v5318_v53 = vld [vmem:[#allocation6 + $0x160] ss:$8 sps:$4 sm:$0xff]  }
 0x52f   : > { %v3060_v63 = vmax.f32 %v3059_v55, %v2444_v52  ;;  %v3142_v0 = vmax.f32 %v3141_v56, %v2737_v59 }
 0x530   : > { %2933 = vmatmul.mubr.bf16.gmra.mrb[228].mxu1 %v6193_v8 }
 0x531   : > { %2942 = vmatprep.mubr.bf16.mxu1 %v5627_v21  ;;  %4259 = vmatpush1.bf16.msra.mxu0 %v5303_v57 }
 0x532   : > { %4260 = vmatprep.subr.bf16.mxu0 %v5308_v61  ;;  %v5321_v61 = vld [vmem:[#allocation6 + $0x170] ss:$8 sps:$4 sm:$0xff]  }
 0x533   : > { %v2448_v5 = vpop.f32.mrb[124].mxu1  ;;  %v2741_v6 = vpop.f32.mrb[132].mxu0 }
 0x534   : > { %v3030_v7 = vmax.f32 %v3029_v45, %v2448_v5  ;;  %v3112_v23 = vmax.f32 %v3111_v1, %v2741_v6  ;;  %v2450_v10 = vpop.f32.mrb[125].mxu1  ;;  %v2743_v15 = vpop.f32.mrb[133].mxu0 }
 0x535   : > { %v3061_v11 = vmax.f32 %v3060_v63, %v2450_v10  ;;  %v3143_v12 = vmax.f32 %v3142_v0, %v2743_v15  ;;  %v2452_v13 = vpop.f32.mrb[126].mxu1  ;;  %v2745_v24 = vpop.f32.mrb[134].mxu0  ;;  %4261 = vmatpush1.bf16.msra.mxu0 %v5306_v2  ;;  %v5324_v10 = vld [vmem:[#allocation6 + $0x180] ss:$8 sps:$4 sm:$0xff]  }
 0x536   : > { %v3031_v44 = vmax.f32 %v3030_v7, %v2452_v13  ;;  %v3113_v8 = vmax.f32 %v3112_v23, %v2745_v24  ;;  %v2454_v14 = vpop.f32.mrb[127].mxu1  ;;  %v2747_v16 = vpop.f32.mrb[135].mxu0  ;;  %4262 = vmatprep.subr.bf16.mxu0 %v5311_v4  ;;  %v5326_v4 = vld [vmem:[#allocation6 + $0x184] ss:$8 sps:$4 sm:$0xff]  }
 0x537   : > { %v3062_v18 = vmax.f32 %v3061_v11, %v2454_v14  ;;  %v3144_v20 = vmax.f32 %v3143_v12, %v2747_v16  ;;  %v5329_v11 = vld [vmem:[#allocation6 + $0x194] ss:$8 sps:$4 sm:$0xff]  }
 0x538   : > { %2943 = vmatmul.mubr.bf16.gmra.mrb[232].mxu1 %v6208_v33 }
 0x539   : > { %2952 = vmatprep.mubr.bf16.mxu1 %v5627_v21  ;;  %4263 = vmatpush1.bf16.msra.mxu0 %v5309_v26  ;;  %v3330_v26 = vsub.s32 4, %v6303_v50 }
 0x53a   : > { %4264 = vmatprep.subr.bf16.mxu0 %v5314_v25 }
 0x53b   : > { %v2458_v19 = vpop.f32.mrb[128].mxu1  ;;  %v2751_v49 = vpop.f32.mrb[136].mxu0 }
 0x53c   : > { %v3032_v30 = vmax.f32 %v3031_v44, %v2458_v19  ;;  %v3114_v35 = vmax.f32 %v3113_v8, %v2751_v49  ;;  %v2460_v36 = vpop.f32.mrb[129].mxu1  ;;  %v2753_v37 = vpop.f32.mrb[137].mxu0  ;;  %v5332_v49 = vld [vmem:[#allocation6 + $0x1a4] ss:$8 sps:$4 sm:$0xff]  }
 0x53d   : > { %v3063_v39 = vmax.f32 %v3062_v18, %v2460_v36  ;;  %v3145_v31 = vmax.f32 %v3144_v20, %v2753_v37  ;;  %v2462_v40 = vpop.f32.mrb[130].mxu1  ;;  %v2755_v3 = vpop.f32.mrb[138].mxu0  ;;  %4265 = vmatpush1.bf16.msra.mxu0 %v5312_v27  ;;  %v5327_v18 = vld [vmem:[#allocation6 + $0x190] ss:$8 sps:$4 sm:$0xff]   ;;  %v3334_v20 = vsub.s32 5, %v6303_v50  ;;  %v3331_v37 = vrot.slane %v6311_v58, %v3330_v26 }
 0x53e   : > { %v3033_v46 = vmax.f32 %v3032_v30, %v2462_v40  ;;  %v3115_v33 = vmax.f32 %v3114_v35, %v2755_v3  ;;  %v2464_v47 = vpop.f32.mrb[131].mxu1  ;;  %v2757_v21 = vpop.f32.mrb[139].mxu0  ;;  %4266 = vmatprep.subr.bf16.mxu0 %v5317_v29  ;;  %v5345_v26 = vld [vmem:[#allocation6 + $0x1f0] ss:$8 sps:$4 sm:$0xff]  }
 0x53f   : > { %v3064_v17 = vmax.f32 %v3063_v39, %v2464_v47  ;;  %v3146_v51 = vmax.f32 %v3145_v31, %v2757_v21  ;;  %v5330_v31 = vld [vmem:[#allocation6 + $0x1a0] ss:$8 sps:$4 sm:$0xff]   ;;  %v3335_v40 = vrot.slane %v6311_v58, %v3334_v20 }
 0x540   : > { %2953 = vmatmul.mubr.bf16.gmra.mrb[236].mxu1 %v6206_v32 }
 0x541   : > { %4267 = vmatpush1.bf16.msra.mxu0 %v5315_v43  ;;  %v5335_v43 = vld [vmem:[#allocation6 + $0x1b4] ss:$8 sps:$4 sm:$0xff]  }
 0x542   : > { %4268 = vmatprep.subr.bf16.mxu0 %v5320_v48 }
 0x543   : > { %v2468_v9 = vpop.f32.mrb[132].mxu1  ;;  %v2761_v55 = vpop.f32.mrb[140].mxu0 }
 0x544   : > { %v3034_v56 = vmax.f32 %v3033_v46, %v2468_v9  ;;  %v3116_v22 = vmax.f32 %v3115_v33, %v2761_v55  ;;  %v2470_v28 = vpop.f32.mrb[133].mxu1  ;;  %v2763_v57 = vpop.f32.mrb[141].mxu0 }
 0x545   : > { %v3065_v45 = vmax.f32 %v3064_v17, %v2470_v28  ;;  %v3147_v1 = vmax.f32 %v3146_v51, %v2763_v57  ;;  %v2472_v52 = vpop.f32.mrb[134].mxu1  ;;  %v2765_v59 = vpop.f32.mrb[142].mxu0  ;;  %4269 = vmatpush1.bf16.msra.mxu0 %v5318_v53  ;;  %v5333_v53 = vld [vmem:[#allocation6 + $0x1b0] ss:$8 sps:$4 sm:$0xff]  }
 0x546   : > { %v3035_v63 = vmax.f32 %v3034_v56, %v2472_v52  ;;  %v3117_v0 = vmax.f32 %v3116_v22, %v2765_v59  ;;  %v2474_v2 = vpop.f32.mrb[135].mxu1  ;;  %v2767_v32 = vpop.f32.mrb[143].mxu0  ;;  %4270 = vmatprep.subr.bf16.mxu0 %v5323_v54  ;;  %v5338_v22 = vld [vmem:[#allocation6 + $0x1c4] ss:$8 sps:$4 sm:$0xff]   ;;  %v5341_v52 = vld [vmem:[#allocation6 + $0x1d4] ss:$8 sps:$4 sm:$0xff]  }
 0x547   : > { %v3066_v5 = vmax.f32 %v3065_v45, %v2474_v2  ;;  %v3148_v6 = vmax.f32 %v3147_v1, %v2767_v32  ;;  %v5336_v45 = vld [vmem:[#allocation6 + $0x1c0] ss:$8 sps:$4 sm:$0xff]   ;;  %v5339_v32 = vld [vmem:[#allocation6 + $0x1d0] ss:$8 sps:$4 sm:$0xff]  }
 0x548   : > { %v3286_v7 = vrot.slane %v3117_v0, 4 }
 0x549   : > { %v3292_v23 = vrot.slane %v3148_v6, 4  ;;  %4271 = vmatpush1.bf16.msra.mxu0 %v5321_v61 }
 0x54a   : > { %v3287_v15 = vmax.f32 %v3117_v0, %v3286_v7  ;;  %4272 = vmatprep.subr.bf16.mxu0 %v5326_v4 }
 0x54b   : > { %v3293_v12 = vmax.f32 %v3148_v6, %v3292_v23  ;;  %v2478_v13 = vpop.f32.mrb[136].mxu1  ;;  %v5344_v6 = vld [vmem:[#allocation6 + $0x1e4] ss:$8 sps:$4 sm:$0xff]   ;;  %v5342_v23 = vld [vmem:[#allocation6 + $0x1e0] ss:$8 sps:$4 sm:$0xff]  }
 0x54c   : > { %v3288_v24 = vrot.slane %v3287_v15, 2  ;;  %v3036_v44 = vmax.f32 %v3035_v63, %v2478_v13  ;;  %v2480_v8 = vpop.f32.mrb[137].mxu1 }
 0x54d   : > { %v3294_v14 = vrot.slane %v3293_v12, 2  ;;  %v3067_v16 = vmax.f32 %v3066_v5, %v2480_v8  ;;  %v2482_v25 = vpop.f32.mrb[138].mxu1  ;;  %4273 = vmatpush1.bf16.msra.mxu0 %v5324_v10  ;;  %v5347_v10 = vld [vmem:[#allocation6 + $0x1f4] ss:$8 sps:$4 sm:$0xff]  }
 0x54e   : > { %v3289_v27 = vmax.f32 %v3287_v15, %v3288_v24  ;;  %v3037_v29 = vmax.f32 %v3036_v44, %v2482_v25  ;;  %v2484_v19 = vpop.f32.mrb[139].mxu1  ;;  %4274 = vmatprep.subr.bf16.mxu0 %v5329_v11 }
 0x54f   : > { %v3295_v30 = vmax.f32 %v3293_v12, %v3294_v14  ;;  %v3068_v35 = vmax.f32 %v3067_v16, %v2484_v19  ;;  %v5350_v14 = vld [vmem:[#allocation6 + $0x204] ss:$8 sps:$4 sm:$0xff]  }
 0x550   : > { %v3290_v36 = vrot.slane %v3289_v27, 1 }
 0x551   : > { %v3296_v39 = vrot.slane %v3295_v30, 1  ;;  %4275 = vmatpush1.bf16.msra.mxu0 %v5327_v18 }
 0x552   : > { %v3291_v3 = vmax.f32 %v3289_v27, %v3290_v36  ;;  %4276 = vmatprep.subr.bf16.mxu0 %v5332_v49 }
 0x553   : > { %v3297_v46 = vmax.f32 %v3295_v30, %v3296_v39  ;;  %v2488_v33 = vpop.f32.mrb[140].mxu1 }
 0x554   : > { %v3356_v47 = vadd.f32 %v3331_v37, %v3291_v3  ;;  %v3038_v21 = vmax.f32 %v3037_v29, %v2488_v33  ;;  %v2490_v48 = vpop.f32.mrb[141].mxu1 }
 0x555   : > { %v3069_v17 = vmax.f32 %v3068_v35, %v2490_v48  ;;  %v2492_v51 = vpop.f32.mrb[142].mxu1  ;;  %4277 = vmatpush1.bf16.msra.mxu0 %v5330_v31  ;;  %v3357_v54 = vadd.f32 %v3335_v40, %v3297_v46 }
 0x556   : > { %v6343_v9 = vmax.f32 %v3356_v47, 0.0  ;;  %v3039_v55 = vmax.f32 %v3038_v21, %v2492_v51  ;;  %v2494_v56 = vpop.f32.mrb[143].mxu1  ;;  %4278 = vmatprep.subr.bf16.mxu0 %v5335_v43 }
 0x557   : > { %v3070_v28 = vmax.f32 %v3069_v17, %v2494_v56  ;;  %v6345_v57 = vmax.f32 %v3357_v54, 0.0 }
 0x559   : > { %4279 = vmatpush1.bf16.msra.mxu0 %v5333_v53  ;;  %v3378_v1 = vcombine.low %v6343_v9, %v6345_v57 }
 0x55a   : > { %4280 = vmatprep.subr.bf16.mxu0 %v5338_v22 }
 0x55b   : > { %v2498_v59 = vpop.f32.mrb[144].mxu1 }
 0x55c   : > { %v3040_v61 = vmax.f32 %v3039_v55, %v2498_v59  ;;  %v2500_v63 = vpop.f32.mrb[145].mxu1 }
 0x55d   : > { %v3071_v0 = vmax.f32 %v3070_v28, %v2500_v63  ;;  %v2502_v2 = vpop.f32.mrb[146].mxu1  ;;  %4281 = vmatpush1.bf16.msra.mxu0 %v5336_v45 }
 0x55e   : > { %v3041_v4 = vmax.f32 %v3040_v61, %v2502_v2  ;;  %v2504_v5 = vpop.f32.mrb[147].mxu1  ;;  %4282 = vmatprep.subr.bf16.mxu0 %v5341_v52 }
 0x55f   : > { %v3072_v7 = vmax.f32 %v3071_v0, %v2504_v5 }
 0x561   : > { %4283 = vmatpush1.bf16.msra.mxu0 %v5339_v32 }
 0x562   : > { %4284 = vmatprep.subr.bf16.mxu0 %v5344_v6 }
 0x563   : > { %v2508_v15 = vpop.f32.mrb[148].mxu1 }
 0x564   : > { %v3042_v11 = vmax.f32 %v3041_v4, %v2508_v15  ;;  %v2510_v12 = vpop.f32.mrb[149].mxu1 }
 0x565   : > { %v3073_v13 = vmax.f32 %v3072_v7, %v2510_v12  ;;  %v2512_v24 = vpop.f32.mrb[150].mxu1  ;;  %4285 = vmatpush1.bf16.msra.mxu0 %v5342_v23 }
 0x566   : > { %v3043_v44 = vmax.f32 %v3042_v11, %v2512_v24  ;;  %v2514_v8 = vpop.f32.mrb[151].mxu1  ;;  %4286 = vmatprep.subr.bf16.mxu0 %v5347_v10 }
 0x567   : > { %v3074_v16 = vmax.f32 %v3073_v13, %v2514_v8 }
 0x569   : > { %4287 = vmatpush1.bf16.msra.mxu0 %v5345_v26 }
 0x56a   : > { %4297 = vmatprep.subr.bf16.mxu0 %v5350_v14 }
 0x56b   : > { %v2518_v25 = vpop.f32.mrb[152].mxu1 }
 0x56c   : > { %v3044_v18 = vmax.f32 %v3043_v44, %v2518_v25  ;;  %v2520_v20 = vpop.f32.mrb[153].mxu1 }
 0x56d   : > { %v3075_v27 = vmax.f32 %v3074_v16, %v2520_v20  ;;  %v2522_v29 = vpop.f32.mrb[154].mxu1 }
 0x56e   : > { %v3045_v19 = vmax.f32 %v3044_v18, %v2522_v29  ;;  %v2524_v49 = vpop.f32.mrb[155].mxu1  ;;  %v3322_v18 = vsub.s32 2, %v6303_v50 }
 0x56f   : > { %v3076_v30 = vmax.f32 %v3075_v27, %v2524_v49 }
 0x573   : > { %v2528_v35 = vpop.f32.mrb[156].mxu1 }
 0x574   : > { %v3046_v36 = vmax.f32 %v3045_v19, %v2528_v35  ;;  %v2530_v37 = vpop.f32.mrb[157].mxu1  ;;  %v3326_v19 = vsub.s32 3, %v6303_v50 }
 0x575   : > { %v3077_v39 = vmax.f32 %v3076_v30, %v2530_v37  ;;  %v2532_v31 = vpop.f32.mrb[158].mxu1 }
 0x576   : > { %v3047_v40 = vmax.f32 %v3046_v36, %v2532_v31  ;;  %v2534_v3 = vpop.f32.mrb[159].mxu1  ;;  %v5628_v36 = vmov 1966171168  }
 0x577   : > { %v3078_v43 = vmax.f32 %v3077_v39, %v2534_v3  ;;  %v3381_v37 = vunpack.c.l.s4 %v5628_v36  ;;  %v3323_v3 = vrot.slane %v6311_v58, %v3322_v18 }
 0x57b   : > { %v2538_v46 = vpop.f32.mrb[160].mxu1 }
 0x57c   : > { %v3048_v33 = vmax.f32 %v3047_v40, %v2538_v46  ;;  %v2540_v47 = vpop.f32.mrb[161].mxu1  ;;  %v3327_v46 = vrot.slane %v6311_v58, %v3326_v19  ;;  %v5362_v19 = vld [vmem:[#allocation6 + $0x244] ss:$8 sps:$4 sm:$0xff]  }
 0x57d   : > { %v3079_v21 = vmax.f32 %v3078_v43, %v2540_v47  ;;  %v2542_v48 = vpop.f32.mrb[162].mxu1  ;;  %v3382_v47 = vunpack.c.0.s8 %v3381_v37 }
 0x57e   : > { %v3049_v17 = vmax.f32 %v3048_v33, %v2542_v48  ;;  %v2544_v51 = vpop.f32.mrb[163].mxu1 }
 0x57f   : > { %v3080_v53 = vmax.f32 %v3079_v21, %v2544_v51 }
 0x583   : > { %v2548_v54 = vpop.f32.mrb[164].mxu1 }
 0x584   : > { %v3050_v55 = vmax.f32 %v3049_v17, %v2548_v54  ;;  %v2550_v56 = vpop.f32.mrb[165].mxu1 }
 0x585   : > { %v3081_v22 = vmax.f32 %v3080_v53, %v2550_v56  ;;  %v2552_v28 = vpop.f32.mrb[166].mxu1 }
 0x586   : > { %v3051_v45 = vmax.f32 %v3050_v55, %v2552_v28  ;;  %v2554_v52 = vpop.f32.mrb[167].mxu1 }
 0x587   : > { %v3082_v59 = vmax.f32 %v3081_v22, %v2554_v52  ;;  %v6354_v52 = vsub.s32 %v3382_v47, %v6303_v50 }
 0x58b   : > { %v2558_v61 = vpop.f32.mrb[168].mxu1 }
 0x58c   : > { %v3052_v63 = vmax.f32 %v3051_v45, %v2558_v61  ;;  %v2560_v0 = vpop.f32.mrb[169].mxu1 }
 0x58d   : > { %v3083_v2 = vmax.f32 %v3082_v59, %v2560_v0  ;;  %v2562_v32 = vpop.f32.mrb[170].mxu1  ;;  %v5348_v0 = vld [vmem:[#allocation6 + $0x200] ss:$8 sps:$4 sm:$0xff]  }
 0x58e   : > { %v3053_v4 = vmax.f32 %v3052_v63, %v2562_v32  ;;  %v2564_v5 = vpop.f32.mrb[171].mxu1  ;;  %v5353_v32 = vld [vmem:[#allocation6 + $0x214] ss:$8 sps:$4 sm:$0xff]  }
 0x58f   : > { %v3084_v6 = vmax.f32 %v3083_v2, %v2564_v5 }
 0x593   : > { %v2568_v7 = vpop.f32.mrb[172].mxu1 }
 0x594   : > { %v3054_v23 = vmax.f32 %v3053_v4, %v2568_v7  ;;  %v2570_v10 = vpop.f32.mrb[173].mxu1  ;;  %v6360_v4 = vrot.slane %v3376_v42, %v6354_v52  ;;  %v3432_v7 = vpack.c.bf16 %v6345_v57, %v6345_v57 }
 0x595   : > { %v3085_v15 = vmax.f32 %v3084_v6, %v2570_v10  ;;  %v2572_v11 = vpop.f32.mrb[174].mxu1 }
 0x596   : > { %v3055_v12 = vmax.f32 %v3054_v23, %v2572_v11  ;;  %v2574_v13 = vpop.f32.mrb[175].mxu1 }
 0x597   : > { %v3086_v24 = vmax.f32 %v3085_v15, %v2574_v13  ;;  %v5356_v13 = vld [vmem:[#allocation6 + $0x224] ss:$8 sps:$4 sm:$0xff]  }
 0x598   : > { %v3274_v26 = vrot.slane %v3055_v12, 4 }
 0x599   : > { %v3280_v44 = vrot.slane %v3086_v24, 4 }
 0x59a   : > { %v3275_v8 = vmax.f32 %v3055_v12, %v3274_v26  ;;  %v5354_v26 = vld [vmem:[#allocation6 + $0x220] ss:$8 sps:$4 sm:$0xff]  }
 0x59b   : > { %v3281_v14 = vmax.f32 %v3086_v24, %v3280_v44  ;;  %v2804_v16 = vpop.f32.mrb[176].mxu1  ;;  %v5359_v44 = vld [vmem:[#allocation6 + $0x234] ss:$8 sps:$4 sm:$0xff]  }
 0x59c   : > { %v3276_v25 = vrot.slane %v3275_v8, 2  ;;  %v2806_v20 = vpop.f32.mrb[177].mxu1 }
 0x59d   : > { %v3282_v27 = vrot.slane %v3281_v14, 2  ;;  %v2808_v29 = vpop.f32.mrb[178].mxu1 }
 0x59e   : > { %v3277_v49 = vmax.f32 %v3275_v8, %v3276_v25  ;;  %v3149_v30 = vmax.f32 %v2804_v16, %v2808_v29  ;;  %v2810_v35 = vpop.f32.mrb[179].mxu1 }
 0x59f   : > { %v3283_v39 = vmax.f32 %v3281_v14, %v3282_v27  ;;  %v3180_v31 = vmax.f32 %v2806_v20, %v2810_v35  ;;  %v5357_v20 = vld [vmem:[#allocation6 + $0x230] ss:$8 sps:$4 sm:$0xff]   ;;  %v5365_v35 = vld [vmem:[#allocation6 + $0x254] ss:$8 sps:$4 sm:$0xff]  }
 0x5a0   : > { %v3278_v40 = vrot.slane %v3277_v49, 1 }
 0x5a1   : > { %v3284_v43 = vrot.slane %v3283_v39, 1 }
 0x5a2   : > { %v3279_v33 = vmax.f32 %v3277_v49, %v3278_v40 }
 0x5a3   : > { %v3285_v21 = vmax.f32 %v3283_v39, %v3284_v43  ;;  %v2814_v48 = vpop.f32.mrb[180].mxu1 }
 0x5a4   : > { %v3354_v17 = vadd.f32 %v3323_v3, %v3279_v33  ;;  %v3150_v51 = vmax.f32 %v3149_v30, %v2814_v48  ;;  %v2816_v53 = vpop.f32.mrb[181].mxu1  ;;  %v5360_v30 = vld [vmem:[#allocation6 + $0x240] ss:$8 sps:$4 sm:$0xff]   ;;  %v5363_v3 = vld [vmem:[#allocation6 + $0x250] ss:$8 sps:$4 sm:$0xff]  }
 0x5a5   : > { %v3181_v54 = vmax.f32 %v3180_v31, %v2816_v53  ;;  %v2818_v55 = vpop.f32.mrb[182].mxu1  ;;  %v3355_v56 = vadd.f32 %v3327_v46, %v3285_v21  ;;  %v5368_v33 = vld [vmem:[#allocation6 + $0x264] ss:$8 sps:$4 sm:$0xff]   ;;  %v5366_v21 = vld [vmem:[#allocation6 + $0x260] ss:$8 sps:$4 sm:$0xff]  }
 0x5a6   : > { %v3362_v22 = vmax.f32 %v3354_v17, 0.0  ;;  %v3151_v28 = vmax.f32 %v3150_v51, %v2818_v55  ;;  %v2820_v45 = vpop.f32.mrb[183].mxu1  ;;  %v5371_v48 = vld [vmem:[#allocation6 + $0x274] ss:$8 sps:$4 sm:$0xff]  }
 0x5a7   : > { %v3182_v59 = vmax.f32 %v3181_v54, %v2820_v45  ;;  %v3363_v61 = vmax.f32 %v3355_v56, 0.0  ;;  %v5369_v56 = vld [vmem:[#allocation6 + $0x270] ss:$8 sps:$4 sm:$0xff]   ;;  %v5374_v45 = vld [vmem:[#allocation6 + $0x284] ss:$8 sps:$4 sm:$0xff]  }
 0x5a8   : > { %v3429_v2 = vpack.c.bf16 %v3362_v22, %v3362_v22 }
 0x5a9   : > { %v3377_v63 = vcombine.low %v3362_v22, %v3363_v61  ;;  %v3430_v58 = vpack.c.bf16 %v3363_v61, %v3363_v61  ;;  %v5372_v61 = vld [vmem:[#allocation6 + $0x280] ss:$8 sps:$4 sm:$0xff]  }
 0x5ab   : > { %v2824_v5 = vpop.f32.mrb[184].mxu1  ;;  %v6363_v6 = vrot.slane %v3377_v63, %v6354_v52  ;;  %4288 = vmatprep.mubr.bf16.mxu0 %v3430_v58  ;;  %v5377_v63 = vld [vmem:[#allocation6 + $0x294] ss:$8 sps:$4 sm:$0xff]  }
 0x5ac   : > { %v3152_v23 = vmax.f32 %v3151_v28, %v2824_v5  ;;  %v2826_v10 = vpop.f32.mrb[185].mxu1  ;;  %4289 = vmatmul.mubr.bf16.vlgmr.msra.gmra.mrb[144].mxu0 %v3429_v2 }
 0x5ad   : > { %v3408_v15 = vcombine.low %v6360_v4, %v6363_v6  ;;  %v3183_v11 = vmax.f32 %v3182_v59, %v2826_v10  ;;  %4298 = vmatpush1.bf16.msra.mxu0 %v5348_v0  ;;  %v2828_v12 = vpop.f32.mrb[186].mxu1  ;;  %4329 = vmatprep.mubr.bf16.mxu0 %v3432_v7  ;;  %v5375_v7 = vld [vmem:[#allocation6 + $0x290] ss:$8 sps:$4 sm:$0xff]  }
 0x5ae   : > { %v3153_v41 = vmax.f32 %v3152_v23, %v2828_v12  ;;  %v2830_v42 = vpop.f32.mrb[187].mxu1  ;;  %4299 = vmatprep.subr.bf16.mxu0 %v5353_v32 }
 0x5af   : > { %v3184_v24 = vmax.f32 %v3183_v11, %v2830_v42  ;;  %v5380_v11 = vld [vmem:[#allocation6 + $0x2a4] ss:$8 sps:$4 sm:$0xff]  }
 0x5b1   : > { %4300 = vmatpush1.bf16.msra.mxu0 %v5351_v34  ;;  %v5378_v34 = vld [vmem:[#allocation6 + $0x2a0] ss:$8 sps:$4 sm:$0xff]  }
 0x5b2   : > { %4301 = vmatprep.subr.bf16.mxu0 %v5356_v13 }
 0x5b3   : > { %v2834_v8 = vpop.f32.mrb[188].mxu1 }
 0x5b4   : > { %v3154_v14 = vmax.f32 %v3153_v41, %v2834_v8  ;;  %v2836_v16 = vpop.f32.mrb[189].mxu1  ;;  %v5383_v41 = vld [vmem:[#allocation6 + $0x2b4] ss:$8 sps:$4 sm:$0xff]   ;;  %v5381_v8 = vld [vmem:[#allocation6 + $0x2b0] ss:$8 sps:$4 sm:$0xff]  }
 0x5b5   : > { %v3185_v25 = vmax.f32 %v3184_v24, %v2836_v16  ;;  %4302 = vmatpush1.bf16.msra.mxu0 %v5354_v26  ;;  %v2838_v18 = vpop.f32.mrb[190].mxu1 }
 0x5b6   : > { %v3155_v27 = vmax.f32 %v3154_v14, %v2838_v18  ;;  %v2840_v29 = vpop.f32.mrb[191].mxu1  ;;  %4303 = vmatprep.subr.bf16.mxu0 %v5359_v44 }
 0x5b7   : > { %v3186_v49 = vmax.f32 %v3185_v25, %v2840_v29  ;;  %v5386_v25 = vld [vmem:[#allocation6 + $0x2c4] ss:$8 sps:$4 sm:$0xff]  }
 0x5b9   : > { %4304 = vmatpush1.bf16.msra.mxu0 %v5357_v20  ;;  %v5384_v20 = vld [vmem:[#allocation6 + $0x2c0] ss:$8 sps:$4 sm:$0xff]  }
 0x5ba   : > { %4305 = vmatprep.subr.bf16.mxu0 %v5362_v19 }
 0x5bb   : > { %v2844_v36 = vpop.f32.mrb[192].mxu1 }
 0x5bc   : > { %v3156_v37 = vmax.f32 %v3155_v27, %v2844_v36  ;;  %v2846_v39 = vpop.f32.mrb[193].mxu1  ;;  %v5389_v27 = vld [vmem:[#allocation6 + $0x2d4] ss:$8 sps:$4 sm:$0xff]   ;;  %v5387_v36 = vld [vmem:[#allocation6 + $0x2d0] ss:$8 sps:$4 sm:$0xff]  }
 0x5bd   : > { %v3187_v31 = vmax.f32 %v3186_v49, %v2846_v39  ;;  %4306 = vmatpush1.bf16.msra.mxu0 %v5360_v30  ;;  %v2848_v40 = vpop.f32.mrb[194].mxu1 }
 0x5be   : > { %v3157_v43 = vmax.f32 %v3156_v37, %v2848_v40  ;;  %v2850_v46 = vpop.f32.mrb[195].mxu1  ;;  %4307 = vmatprep.subr.bf16.mxu0 %v5365_v35 }
 0x5bf   : > { %v3188_v47 = vmax.f32 %v3187_v31, %v2850_v46  ;;  %v5392_v31 = vld [vmem:[#allocation6 + $0x2e4] ss:$8 sps:$4 sm:$0xff]  }
 0x5c1   : > { %4308 = vmatpush1.bf16.msra.mxu0 %v5363_v3  ;;  %v5390_v3 = vld [vmem:[#allocation6 + $0x2e0] ss:$8 sps:$4 sm:$0xff]  }
 0x5c2   : > { %4309 = vmatprep.subr.bf16.mxu0 %v5368_v33 }
 0x5c3   : > { %v2854_v17 = vpop.f32.mrb[196].mxu1 }
 0x5c4   : > { %v3158_v51 = vmax.f32 %v3157_v43, %v2854_v17  ;;  %v2856_v53 = vpop.f32.mrb[197].mxu1  ;;  %v5395_v43 = vld [vmem:[#allocation6 + $0x2f4] ss:$8 sps:$4 sm:$0xff]   ;;  %v5393_v17 = vld [vmem:[#allocation6 + $0x2f0] ss:$8 sps:$4 sm:$0xff]  }
 0x5c5   : > { %v3189_v54 = vmax.f32 %v3188_v47, %v2856_v53  ;;  %4310 = vmatpush1.bf16.msra.mxu0 %v5366_v21  ;;  %v2858_v55 = vpop.f32.mrb[198].mxu1 }
 0x5c6   : > { %v3159_v22 = vmax.f32 %v3158_v51, %v2858_v55  ;;  %v2860_v28 = vpop.f32.mrb[199].mxu1  ;;  %4311 = vmatprep.subr.bf16.mxu0 %v5371_v48 }
 0x5c7   : > { %v3190_v59 = vmax.f32 %v3189_v54, %v2860_v28  ;;  %v5398_v54 = vld [vmem:[#allocation6 + $0x304] ss:$8 sps:$4 sm:$0xff]   ;;  %v5401_v28 = vld [vmem:[#allocation6 + $0x314] ss:$8 sps:$4 sm:$0xff]  }
 0x5c9   : > { %4312 = vmatpush1.bf16.msra.mxu0 %v5369_v56  ;;  %v5396_v56 = vld [vmem:[#allocation6 + $0x300] ss:$8 sps:$4 sm:$0xff]  }
 0x5ca   : > { %4313 = vmatprep.subr.bf16.mxu0 %v5374_v45 }
 0x5cb   : > { %v2864_v58 = vpop.f32.mrb[200].mxu1 }
 0x5cc   : > { %v3160_v0 = vmax.f32 %v3159_v22, %v2864_v58  ;;  %v2866_v2 = vpop.f32.mrb[201].mxu1  ;;  %v3431_v22 = vpack.c.bf16 %v6343_v9, %v6343_v9 }
 0x5cd   : > { %v3191_v32 = vmax.f32 %v3190_v59, %v2866_v2  ;;  %4314 = vmatpush1.bf16.msra.mxu0 %v5372_v61  ;;  %v2868_v5 = vpop.f32.mrb[202].mxu1 }
 0x5ce   : > { %v3161_v23 = vmax.f32 %v3160_v0, %v2868_v5  ;;  %v2870_v10 = vpop.f32.mrb[203].mxu1  ;;  %4315 = vmatprep.subr.bf16.mxu0 %v5377_v63  ;;  %v5399_v0 = vld [vmem:[#allocation6 + $0x310] ss:$8 sps:$4 sm:$0xff]   ;;  %v5404_v5 = vld [vmem:[#allocation6 + $0x324] ss:$8 sps:$4 sm:$0xff]  }
 0x5cf   : > { %v3192_v12 = vmax.f32 %v3191_v32, %v2870_v10  ;;  %v5407_v10 = vld [vmem:[#allocation6 + $0x334] ss:$8 sps:$4 sm:$0xff]  }
 0x5d1   : > { %4316 = vmatpush1.bf16.msra.mxu0 %v5375_v7 }
 0x5d2   : > { %4317 = vmatprep.subr.bf16.mxu0 %v5380_v11 }
 0x5d3   : > { %v2874_v42 = vpop.f32.mrb[204].mxu1 }
 0x5d4   : > { %v3162_v13 = vmax.f32 %v3161_v23, %v2874_v42  ;;  %v2876_v24 = vpop.f32.mrb[205].mxu1  ;;  %v5402_v23 = vld [vmem:[#allocation6 + $0x320] ss:$8 sps:$4 sm:$0xff]  }
 0x5d5   : > { %v3193_v26 = vmax.f32 %v3192_v12, %v2876_v24  ;;  %4318 = vmatpush1.bf16.msra.mxu0 %v5378_v34  ;;  %v2878_v44 = vpop.f32.mrb[206].mxu1 }
 0x5d6   : > { %v3163_v14 = vmax.f32 %v3162_v13, %v2878_v44  ;;  %v2880_v16 = vpop.f32.mrb[207].mxu1  ;;  %4319 = vmatprep.subr.bf16.mxu0 %v5383_v41  ;;  %v5405_v13 = vld [vmem:[#allocation6 + $0x330] ss:$8 sps:$4 sm:$0xff]   ;;  %v5410_v44 = vld [vmem:[#allocation6 + $0x344] ss:$8 sps:$4 sm:$0xff]  }
 0x5d7   : > { %v3194_v18 = vmax.f32 %v3193_v26, %v2880_v16  ;;  %v5413_v16 = vld [vmem:[#allocation6 + $0x354] ss:$8 sps:$4 sm:$0xff]  }
 0x5d9   : > { %4320 = vmatpush1.bf16.msra.mxu0 %v5381_v8 }
 0x5da   : > { %4321 = vmatprep.subr.bf16.mxu0 %v5386_v25 }
 0x5db   : > { %v2884_v29 = vpop.f32.mrb[208].mxu1 }
 0x5dc   : > { %v3164_v19 = vmax.f32 %v3163_v14, %v2884_v29  ;;  %v2886_v49 = vpop.f32.mrb[209].mxu1  ;;  %v5408_v14 = vld [vmem:[#allocation6 + $0x340] ss:$8 sps:$4 sm:$0xff]  }
 0x5dd   : > { %v3195_v30 = vmax.f32 %v3194_v18, %v2886_v49  ;;  %4322 = vmatpush1.bf16.msra.mxu0 %v5384_v20  ;;  %v2888_v35 = vpop.f32.mrb[210].mxu1 }
 0x5de   : > { %v3165_v37 = vmax.f32 %v3164_v19, %v2888_v35  ;;  %v2890_v39 = vpop.f32.mrb[211].mxu1  ;;  %4323 = vmatprep.subr.bf16.mxu0 %v5389_v27  ;;  %v5411_v19 = vld [vmem:[#allocation6 + $0x350] ss:$8 sps:$4 sm:$0xff]   ;;  %v5416_v35 = vld [vmem:[#allocation6 + $0x364] ss:$8 sps:$4 sm:$0xff]  }
 0x5df   : > { %v3196_v40 = vmax.f32 %v3195_v30, %v2890_v39  ;;  %v5419_v39 = vld [vmem:[#allocation6 + $0x374] ss:$8 sps:$4 sm:$0xff]  }
 0x5e1   : > { %4324 = vmatpush1.bf16.msra.mxu0 %v5387_v36 }
 0x5e2   : > { %4325 = vmatprep.subr.bf16.mxu0 %v5392_v31 }
 0x5e3   : > { %v2894_v46 = vpop.f32.mrb[212].mxu1 }
 0x5e4   : > { %v3166_v33 = vmax.f32 %v3165_v37, %v2894_v46  ;;  %v2896_v47 = vpop.f32.mrb[213].mxu1  ;;  %v5414_v37 = vld [vmem:[#allocation6 + $0x360] ss:$8 sps:$4 sm:$0xff]  }
 0x5e5   : > { %v3197_v21 = vmax.f32 %v3196_v40, %v2896_v47  ;;  %4326 = vmatpush1.bf16.msra.mxu0 %v5390_v3  ;;  %v2898_v48 = vpop.f32.mrb[214].mxu1 }
 0x5e6   : > { %v3167_v51 = vmax.f32 %v3166_v33, %v2898_v48  ;;  %v2900_v53 = vpop.f32.mrb[215].mxu1  ;;  %4327 = vmatprep.subr.bf16.mxu0 %v5395_v43  ;;  %v5417_v33 = vld [vmem:[#allocation6 + $0x370] ss:$8 sps:$4 sm:$0xff]   ;;  %v5422_v48 = vld [vmem:[#allocation6 + $0x384] ss:$8 sps:$4 sm:$0xff]  }
 0x5e7   : > { %v3198_v55 = vmax.f32 %v3197_v21, %v2900_v53  ;;  %v5425_v53 = vld [vmem:[#allocation6 + $0x394] ss:$8 sps:$4 sm:$0xff]  }
 0x5e9   : > { %4328 = vmatpush1.bf16.msra.mxu0 %v5393_v17 }
 0x5ea   : > { %4338 = vmatprep.subr.bf16.mxu0 %v5398_v54 }
 0x5eb   : > { %v2904_v45 = vpop.f32.mrb[216].mxu1 }
 0x5ec   : > { %v3168_v59 = vmax.f32 %v3167_v51, %v2904_v45  ;;  %4330 = vmatmul.mubr.bf16.vlgmr.msra.gmra.mrb[144].mxu0 %v3431_v22  ;;  %v2906_v61 = vpop.f32.mrb[217].mxu1  ;;  %v5420_v51 = vld [vmem:[#allocation6 + $0x380] ss:$8 sps:$4 sm:$0xff]   ;;  %v5423_v45 = vld [vmem:[#allocation6 + $0x390] ss:$8 sps:$4 sm:$0xff]  }
 0x5ed   : > { %v3199_v63 = vmax.f32 %v3198_v55, %v2906_v61  ;;  %v2908_v58 = vpop.f32.mrb[218].mxu1  ;;  %4339 = vmatpush1.bf16.msra.mxu0 %v5396_v56 }
 0x5ee   : > { %v3169_v2 = vmax.f32 %v3168_v59, %v2908_v58  ;;  %v2910_v32 = vpop.f32.mrb[219].mxu1  ;;  %4340 = vmatprep.subr.bf16.mxu0 %v5401_v28 }
 0x5ef   : > { %v3200_v7 = vmax.f32 %v3199_v63, %v2910_v32  ;;  %v5428_v63 = vld [vmem:[#allocation6 + $0x3a4] ss:$8 sps:$4 sm:$0xff]  }
 0x5f1   : > { %4341 = vmatpush1.bf16.msra.mxu0 %v5399_v0  ;;  %v5426_v0 = vld [vmem:[#allocation6 + $0x3a0] ss:$8 sps:$4 sm:$0xff]  }
 0x5f2   : > { %4342 = vmatprep.subr.bf16.mxu0 %v5404_v5 }
 0x5f3   : > { %v2914_v11 = vpop.f32.mrb[220].mxu1 }
 0x5f4   : > { %v3170_v12 = vmax.f32 %v3169_v2, %v2914_v11  ;;  %v2916_v34 = vpop.f32.mrb[221].mxu1  ;;  %v5431_v2 = vld [vmem:[#allocation6 + $0x3b4] ss:$8 sps:$4 sm:$0xff]   ;;  %v5429_v11 = vld [vmem:[#allocation6 + $0x3b0] ss:$8 sps:$4 sm:$0xff]  }
 0x5f5   : > { %v3201_v41 = vmax.f32 %v3200_v7, %v2916_v34  ;;  %v2918_v42 = vpop.f32.mrb[222].mxu1  ;;  %4343 = vmatpush1.bf16.msra.mxu0 %v5402_v23 }
 0x5f6   : > { %v3171_v24 = vmax.f32 %v3170_v12, %v2918_v42  ;;  %v2920_v26 = vpop.f32.mrb[223].mxu1  ;;  %4344 = vmatprep.subr.bf16.mxu0 %v5407_v10 }
 0x5f7   : > { %v3202_v8 = vmax.f32 %v3201_v41, %v2920_v26  ;;  %v5434_v41 = vld [vmem:[#allocation6 + $0x3c4] ss:$8 sps:$4 sm:$0xff]   ;;  %v5432_v26 = vld [vmem:[#allocation6 + $0x3c0] ss:$8 sps:$4 sm:$0xff]  }
 0x5f9   : > { %4345 = vmatpush1.bf16.msra.mxu0 %v5405_v13 }
 0x5fa   : > { %4346 = vmatprep.subr.bf16.mxu0 %v5410_v44 }
 0x5fb   : > { %v2924_v25 = vpop.f32.mrb[224].mxu1 }
 0x5fc   : > { %v3172_v18 = vmax.f32 %v3171_v24, %v2924_v25  ;;  %v2926_v20 = vpop.f32.mrb[225].mxu1  ;;  %v3338_v25 = vsub.s32 6, %v6303_v50 }
 0x5fd   : > { %v3203_v27 = vmax.f32 %v3202_v8, %v2926_v20  ;;  %v2928_v29 = vpop.f32.mrb[226].mxu1  ;;  %4347 = vmatpush1.bf16.msra.mxu0 %v5408_v14  ;;  %v5437_v8 = vld [vmem:[#allocation6 + $0x3d4] ss:$8 sps:$4 sm:$0xff]   ;;  %v5435_v20 = vld [vmem:[#allocation6 + $0x3d0] ss:$8 sps:$4 sm:$0xff]  }
 0x5fe   : > { %v3173_v49 = vmax.f32 %v3172_v18, %v2928_v29  ;;  %v2930_v30 = vpop.f32.mrb[227].mxu1  ;;  %4348 = vmatprep.subr.bf16.mxu0 %v5413_v16 }
 0x5ff   : > { %v3204_v36 = vmax.f32 %v3203_v27, %v2930_v30  ;;  %v3342_v27 = vsub.s32 7, %v6303_v50 }
 0x601   : > { %4349 = vmatpush1.bf16.msra.mxu0 %v5411_v19  ;;  %v5440_v19 = vld [vmem:[#allocation6 + $0x3e4] ss:$8 sps:$4 sm:$0xff]  }
 0x602   : > { %4350 = vmatprep.subr.bf16.mxu0 %v5416_v35  ;;  %v5444_v35 = vld [vmem:[%s6487_s10] sm:$0xff] }
 0x603   : > { %v2934_v31 = vpop.f32.mrb[228].mxu1 }
 0x604   : > { %v3174_v40 = vmax.f32 %v3173_v49, %v2934_v31  ;;  %v2936_v3 = vpop.f32.mrb[229].mxu1  ;;  %v3343_v31 = vrot.slane %v5444_v35, %v3342_v27 }
 0x605   : > { %v3205_v43 = vmax.f32 %v3204_v36, %v2936_v3  ;;  %v2938_v46 = vpop.f32.mrb[230].mxu1  ;;  %4351 = vmatpush1.bf16.msra.mxu0 %v5414_v37  ;;  %v3339_v36 = vrot.slane %v5444_v35, %v3338_v25  ;;  %v5443_v3 = vld [vmem:[#allocation6 + $0x3f4] ss:$8 sps:$4 sm:$0xff]  }
 0x606   : > { %v3175_v47 = vmax.f32 %v3174_v40, %v2938_v46  ;;  %v2940_v21 = vpop.f32.mrb[231].mxu1  ;;  %4352 = vmatprep.subr.bf16.mxu0 %v5419_v39  ;;  %v5438_v39 = vld [vmem:[#allocation6 + $0x3e0] ss:$8 sps:$4 sm:$0xff]  }
 0x607   : > { %v3206_v17 = vmax.f32 %v3205_v43, %v2940_v21 }
 0x609   : > { %4353 = vmatpush1.bf16.msra.mxu0 %v5417_v33  ;;  %v5441_v33 = vld [vmem:[#allocation6 + $0x3f0] ss:$8 sps:$4 sm:$0xff]  }
 0x60a   : > { %4354 = vmatprep.subr.bf16.mxu0 %v5422_v48 }
 0x60b   : > { %v2944_v54 = vpop.f32.mrb[232].mxu1 }
 0x60c   : > { %v3176_v55 = vmax.f32 %v3175_v47, %v2944_v54  ;;  %v2946_v56 = vpop.f32.mrb[233].mxu1  ;;  %v3400_v54 = vrot.slane %v3378_v1, %v6354_v52 }
 0x60d   : > { %v3207_v22 = vmax.f32 %v3206_v17, %v2946_v56  ;;  %v2948_v28 = vpop.f32.mrb[234].mxu1  ;;  %4355 = vmatpush1.bf16.msra.mxu0 %v5420_v51 }
 0x60e   : > { %v3177_v59 = vmax.f32 %v3176_v55, %v2948_v28  ;;  %v2950_v61 = vpop.f32.mrb[235].mxu1  ;;  %4356 = vmatprep.subr.bf16.mxu0 %v5425_v53 }
 0x60f   : > { %v3208_v58 = vmax.f32 %v3207_v22, %v2950_v61  ;;  %v3416_v22 = vrot.slane %v3408_v15, %v6354_v52 }
 0x611   : > { %4357 = vmatpush1.bf16.msra.mxu0 %v5423_v45 }
 0x612   : > { %4358 = vmatprep.subr.bf16.mxu0 %v5428_v63 }
 0x613   : > { %v2954_v32 = vpop.f32.mrb[236].mxu1 }
 0x614   : > { %v3178_v5 = vmax.f32 %v3177_v59, %v2954_v32  ;;  %v2956_v7 = vpop.f32.mrb[237].mxu1 }
 0x615   : > { %v3209_v23 = vmax.f32 %v3208_v58, %v2956_v7  ;;  %v2958_v10 = vpop.f32.mrb[238].mxu1  ;;  %4359 = vmatpush1.bf16.msra.mxu0 %v5426_v0 }
 0x616   : > { %v3179_v12 = vmax.f32 %v3178_v5, %v2958_v10  ;;  %v2960_v34 = vpop.f32.mrb[239].mxu1  ;;  %4360 = vmatprep.subr.bf16.mxu0 %v5431_v2 }
 0x617   : > { %v3210_v42 = vmax.f32 %v3209_v23, %v2960_v34 }
 0x618   : > { %v3298_v13 = vrot.slane %v3179_v12, 4 }
 0x619   : > { %v3304_v24 = vrot.slane %v3210_v42, 4  ;;  %4361 = vmatpush1.bf16.msra.mxu0 %v5429_v11 }
 0x61a   : > { %v3299_v44 = vmax.f32 %v3179_v12, %v3298_v13  ;;  %4362 = vmatprep.subr.bf16.mxu0 %v5434_v41 }
 0x61b   : > { %v3305_v14 = vmax.f32 %v3210_v42, %v3304_v24 }
 0x61c   : > { %v3300_v16 = vrot.slane %v3299_v44, 2 }
 0x61d   : > { %v3306_v18 = vrot.slane %v3305_v14, 2  ;;  %4363 = vmatpush1.bf16.msra.mxu0 %v5432_v26 }
 0x61e   : > { %v3301_v29 = vmax.f32 %v3299_v44, %v3300_v16  ;;  %4364 = vmatprep.subr.bf16.mxu0 %v5437_v8 }
 0x61f   : > { %v3307_v49 = vmax.f32 %v3305_v14, %v3306_v18 }
 0x620   : > { %v3302_v30 = vrot.slane %v3301_v29, 1 }
 0x621   : > { %v3308_v37 = vrot.slane %v3307_v49, 1  ;;  %4365 = vmatpush1.bf16.msra.mxu0 %v5435_v20 }
 0x622   : > { %v3303_v40 = vmax.f32 %v3301_v29, %v3302_v30  ;;  %4366 = vmatprep.subr.bf16.mxu0 %v5440_v19 }
 0x623   : > { %v3309_v43 = vmax.f32 %v3307_v49, %v3308_v37 }
 0x624   : > { %v3358_v46 = vadd.f32 %v3339_v36, %v3303_v40 }
 0x625   : > { %4367 = vmatpush1.bf16.msra.mxu0 %v5438_v39  ;;  %v3359_v47 = vadd.f32 %v3343_v31, %v3309_v43 }
 0x626   : > { %v3366_v21 = vmax.f32 %v3358_v46, 0.0  ;;  %4368 = vmatprep.subr.bf16.mxu0 %v5443_v3 }
 0x627   : > { %v3367_v48 = vmax.f32 %v3359_v47, 0.0 }
 0x628   : > { %v3433_v53 = vpack.c.bf16 %v3366_v21, %v3366_v21 }
 0x629   : > { %4369 = vmatpush1.bf16.msra.mxu0 %v5441_v33  ;;  %v3379_v17 = vcombine.low %v3366_v21, %v3367_v48  ;;  %v3434_v51 = vpack.c.bf16 %v3367_v48, %v3367_v48 }
 0x62b   : > { %v3407_v55 = vrot.slane %v3379_v17, %v6354_v52  ;;  %4370 = vmatprep.mubr.bf16.mxu0 %v3434_v51 }
 0x62c   : > { %4371 = vmatmul.mubr.bf16.vlgmr.msra.gmra.mrb[144].mxu0 %v3433_v53 }
 0x62d   : > { %v3409_v56 = vcombine.low %v3400_v54, %v3407_v55 }
 0x62f   : > { %v3423_v28 = vrot.slane %v3409_v56, %v6354_v52 }
 0x631   : > { %v3424_v45 = vcombine.low %v3416_v22, %v3423_v28 }
 0x633   : > { %3426 = vst [vmem:[%s517_s13] sm:$0xff] %v3424_v45 }
 0x634   : > { %5514 = shalt.err (!%p5511_p6)
}
 0x635   : > { %s5515_s22 = scalar_lea.hbm %s6394_s25, 128  ;;  %s5519_s14 = scalar_lea.hbm %s6523_s27, 256 }
 0x636   : > { %p5516_p7 = scmp.ne.s32.totalorder %s6394_s25, %s5515_s22  ;;  %p5520_p0 = scmp.lt.u32.totalorder %s6394_s25, %s6523_s27 }
 0x637   : > { %p5521_p1 = scmp.lt.u32.totalorder %s5519_s14, %s5515_s22  ;;  %p5523_p13 = scmp.lt.u32.totalorder %s5515_s22, %s6394_s25 }
 0x638   : > { %p5517_p9 = pnand %p5516_p7, %p6524_p8 }
 0x639   : > { %p5522_p4 = por %p5521_p1, %p5520_p0 }
 0x63a   : > { %p5518_p12 = pneg %p5517_p9 }
 0x63b   : > { %p5524_p10 = por %p5523_p13, %p5522_p4 }
 0x63d   : > { %p5525_p11 = pnand %p5524_p10, %p5518_p12 }
 0x63f   : > { %5528 = shalt.err (!%p5525_p11)
}
 0x640   : > { %5145 = dma.vmem_to_hbm [thread:$0]  (%p6524_p8), %s4423_s15, 128, %s6394_s25, %s4403_s28   ;;  %vm4399_vm3 = vcmp.lt.s32.totalorder %v3312_v38, 256 }
 0x641   : > { %s6525_s26 = sld [smem:[#allocation22_spill]]  ;;  %s4573_s19 = sshll.u32 %s6377_s24, 1 }
 0x642   : > { %s4874_s25 = sshll.u32 %s5611_s16, 5  ;;  %s524_s15 = scalar_lea.vmem [#allocation9], %s4573_s19 }
 0x643   : > { %s4436_s28 = sshll.u32 %s524_s15, 4  ;;  %s6526_s12 = sld [smem:[#allocation24_spill]]  ;;  %s6431_s28 = int_to_ptr.vmem [resolvable:$true] %s4436_s28 }
 0x644   : > { %s4408_s16 = scalar_lea.sflag [#allocation10], %s6377_s24  ;;  %s5529_s14 = scalar_lea.vmem %s6431_s28, 32 }
 0x645   : > { %p5530_p2 = scmp.ne.s32.totalorder %s6431_s28, %s5529_s14  ;;  %s5630_s29 = smov [#allocation9]  }
 0x646   : > { %s5533_s21 = sshll.u32 %s5630_s29, 4  ;;  %s5534_s21 = int_to_ptr.vmem [resolvable:$false] %s5533_s21 }
 0x647   : > { %v3563_v9 = vld [vmem:[%s6525_s26] sm:$0x3]  ;;  %p5531_p3 = pnand %p5530_p2, %p6524_p8  ;;  %s5535_s17 = scalar_lea.vmem %s5534_s21, 64 }
 0x648   : > { %v4208_v57 = vrot.slane %v3563_v9, %v3314_v60  ;;  %v4212_v1 = vrot.slane %v3563_v9, %v3318_v62  ;;  %p5536_p6 = scmp.lt.s32.totalorder %s6431_s28, %s5534_s21  ;;  %p5537_p7 = scmp.lt.s32.totalorder %s5535_s17, %s5529_s14 }
 0x649   : > { %s6429_s13 = scalar_lea.hbm %s6526_s12, %s4874_s25  ;;  %p5532_p5 = pneg %p5531_p3 }
 0x64a   : > { %p5538_p9 = por %p5537_p7, %p5536_p6 }
 0x64c   : > { %p5539_p12 = pnand %p5538_p9, %p5532_p5 }
 0x6ff   : > { %v4372_v4 = vpop.f32.mrb[144].mxu0 }
 0x700   : > { %v5122_v6 = vadd.f32 %v4372_v4, %v4208_v57  ;;  %v4374_v15 = vpop.f32.mrb[145].mxu0 }
 0x701   : > { %v5123_v59 = vadd.f32 %v4374_v15, %v4212_v1  ;;  %v4376_v61 = vpop.f32.mrb[146].mxu0 }
 0x702   : > { %v4377_v63 = vpop.f32.mrb[147].mxu0 }
 0x703   : > { %v4381_v58 = vcombine.low %v5122_v6, %v5123_v59 }
 0x705   : > { %v4388_v0 = vrot.slane %v4381_v58, %v6354_v52 }
 0x707   : > { %v4395_v50 = vrot.slane %v4388_v0, %v6354_v52 }
 0x709   : > { %4401 = vst.msk [vmem:[%s524_s15] sm:$0x3] %vm4399_vm3, %v4395_v50 }
 0x70a   : > { %5542 = shalt.err (!%p5539_p12)
}
 0x70b   : > { %s5543_s24 = scalar_lea.hbm %s6429_s13, 32  ;;  %s5547_s19 = scalar_lea.hbm %s6526_s12, 64 }
 0x70c   : > { %p5544_p0 = scmp.ne.s32.totalorder %s6429_s13, %s5543_s24  ;;  %p5548_p13 = scmp.lt.u32.totalorder %s6429_s13, %s6526_s12 }
 0x70d   : > { %p5549_p10 = scmp.lt.u32.totalorder %s5547_s19, %s5543_s24  ;;  %p5551_p2 = scmp.lt.u32.totalorder %s5543_s24, %s6429_s13 }
 0x70e   : > { %p5545_p1 = pnand %p5544_p0, %p6524_p8 }
 0x70f   : > { %p5550_p11 = por %p5549_p10, %p5548_p13 }
 0x710   : > { %p5546_p4 = pneg %p5545_p1 }
 0x711   : > { %p5552_p3 = por %p5551_p2, %p5550_p11 }
 0x713   : > { %p5553_p5 = pnand %p5552_p3, %p5546_p4 }
 0x715   : > { %5556 = shalt.err (!%p5553_p5)
}
 0x716   : > { %5146 = dma.vmem_to_hbm [thread:$0]  (%p6524_p8), %s6431_s28, 32, %s6429_s13, %s4408_s16  }
 0x717 PF: > { %s6527_s20 = sld [smem:[#allocation18_spill]]  ;;  %s6528_s22 = sld [smem:[#allocation15_spill]] }
 0x718   : > { %s6529_s14 = sld [smem:[#allocation20_spill]] }
 0x71d   : > { %p5167_p6 = scmp.ge.s32.totalorder %s6527_s20, 2  ;;  %s4448_s29 = sand.u32 1, %s6528_s22  }
 0x71e   : > { %p6530_p7 = scmp.ne.s32.totalorder %s6529_s14, 0  ;;  %s4449_s21 = scalar_lea.sflag [#allocation5], %s4448_s29 }
 0x720   : > { %p5157_p9 = pnand %p5167_p6, %p6530_p7 }
 0x722   : > { %5590 = dma.done.wait (!%p5157_p9), %s4449_s21, 128  }
 0x723   : > { %5592 = vsyncadd (!%p5157_p9), %s4449_s21, 4294967168  ;;  %s4458_s17 = scalar_lea.sflag [#allocation10], %s4448_s29 }
 0x724   : > { %5594 = dma.done.wait (!%p5157_p9), %s4458_s17, 32  }
 0x725   : > { %5596 = vsyncadd (!%p5157_p9), %s4458_s17, 4294967264  ;;  %s33_s18 = sadd.s32 1, %s6527_s20   ;;  %s6531_s23 = sld [smem:[#allocation16_spill]] }
 0x726   : > { %p30_p12 = scmp.ge.s32.totalorder %s33_s18, 4   ;;  %s6532_s15 = sld [smem:[#allocation21_spill]] }
 0x727   : > { %s6533_s16 = sld [smem:[#allocation17_spill]]  ;;  %s6534_s17 = sld [smem:[#allocation19_spill]] }
 0x728   : > { %s6535_s29 = smov %s5603_s30  ;;  %32 = sbr.rel (!%p30_p12) target bundleno = 12 (0xc), region = 145 }
 0x72b   : > { %s6536_s30 = smov %s6531_s23 }
 0x72f   :  { %4463 = vsyncpa [#allocation4], 1 }
 0x730   :  { %4465 = vsyncpa [#allocation4 + $0x1], 1 }
 0x731   :  { %4466 = vsyncpa [#allocation7], 1 }
 0x732   :  { %4467 = vsyncpa [#allocation5], 1 }
 0x733   :  { %4469 = vsyncpa [#allocation5 + $0x1], 1 }
 0x734   :  { %4470 = vsyncpa [#allocation10], 1 }
 0x735   :  { %4472 = vsyncpa [#allocation10 + $0x1], 1 }

</bundles_post_ra>
